<compile_context>
chip_gen: v5e
topology: v5e:2x2
jax: 0.10.0
libtpu: 0.0.40
codegen_flags: <defaults>
</compile_context>

<pallas_src>
import jax
import jax.numpy as jnp
from jax.experimental import pallas as pl
from jax.experimental.pallas import tpu as pltpu

LRELU_SLOPE = 0.01   # nn.LeakyReLU default negative_slope
BN_EPS = 1e-5        # nn.BatchNorm1d default eps
OFF = 1              # leading zero rows per batch segment (absorbs max conv pad = 1)


def _rup(x, m):
    return -(-x // m) * m


# ------------------------------ fused Pallas kernel ------------------------------

def _make_encoder_kernel(plan, N, n_layers):
    n_bn = n_layers - 1

    def kernel(*refs):
        x_ref = refs[0]
        w_refs = refs[1:1 + n_layers]
        g_refs = refs[1 + n_layers:1 + n_layers + n_bn]
        bt_refs = refs[1 + n_layers + n_bn:1 + n_layers + 2 * n_bn]
        b_last_ref = refs[1 + n_layers + 2 * n_bn]
        o_ref = refs[2 + n_layers + 2 * n_bn]
        act_refs = refs[3 + n_layers + 2 * n_bn:]

        src = x_ref
        for i, lp in enumerate(plan):
            k, s, p = lp["k"], lp["s"], lp["p"]
            L_out = lp["L_out"]
            cin_p, cout_p = lp["cin_pad"], lp["cout_pad"]
            src_lbuf = lp["src_lbuf"]
            w_ref = w_refs[i]
            last = (i == n_layers - 1)

            def conv_tile(n, src=src, w_ref=w_ref, k=k, s=s, p=p,
                          L_out=L_out, cin_p=cin_p, src_lbuf=src_lbuf):
                # Conv1d for batch item n as a sum of per-tap matmuls (bf16 MXU, f32 acc).
                base = n * src_lbuf + OFF - p
                acc = None
                for t in range(k):
                    if s == 1:
                        xv = src[pl.ds(base + t, L_out), :]
                    else:
                        xv = src[pl.ds(base + t, L_out, stride=s), :]
                    xv = xv.astype(jnp.bfloat16)           # no-op when src is bf16
                    wt = w_ref[pl.ds(t * cin_p, cin_p), :]  # (cin_p, cout_p) bf16
                    d = jnp.dot(xv, wt, preferred_element_type=jnp.float32)
                    acc = d if acc is None else acc + d
                return acc                                  # (L_out, cout_p) f32

            if last:
                # Final Conv1d: bias only, no BN / activation. Output is lane-dense.
                bias = b_last_ref[...]                      # (1, cout_p) f32
                for n in range(N):                          # N small: unrolled is fine
                    o_ref[pl.ds(n * L_out, L_out), :] = conv_tile(n) + bias
            else:
                dst = act_refs[i]
                dst_lbuf = lp["dst_lbuf"]
                tail = dst_lbuf - OFF - L_out
                csum = jnp.zeros((1, cout_p), jnp.float32)
                csq = jnp.zeros((1, cout_p), jnp.float32)

                # --- streaming pass 1: conv -> raw store + per-channel sum / sumsq ---
                for n in range(N):
                    acc = conv_tile(n)
                    csum = csum + acc.sum(axis=0, keepdims=True)
                    csq = csq + (acc * acc).sum(axis=0, keepdims=True)
                    dst[pl.ds(n * dst_lbuf + OFF, L_out), :] = acc.astype(dst.dtype)
                    # zero only the halo rows the next layer's conv padding reads
                    dst[pl.ds(n * dst_lbuf, OFF), :] = jnp.zeros((OFF, cout_p), dst.dtype)
                    if tail > 0:
                        dst[pl.ds(n * dst_lbuf + OFF + L_out, tail), :] = (
                            jnp.zeros((tail, cout_p), dst.dtype))

                # --- BatchNorm1d (training-mode stats over N*L_out) as scale/shift ---
                inv_cnt = 1.0 / float(N * L_out)
                mu = csum * inv_cnt
                var = jnp.maximum(csq * inv_cnt - mu * mu, 0.0)
                scale = g_refs[i][...] * jax.lax.rsqrt(var + BN_EPS)   # EUP rsqrt
                shift = bt_refs[i][...] - mu * scale
                scale_b = jnp.broadcast_to(scale, (L_out, cout_p))      # hoisted
                shift_b = jnp.broadcast_to(shift, (L_out, cout_p))

                # --- streaming pass 2: normalize + LeakyReLU in place ---
                for n in range(N):
                    rows = pl.ds(n * dst_lbuf + OFF, L_out)
                    z = dst[rows, :].astype(jnp.float32) * scale_b + shift_b
                    z = jnp.where(z > 0, z, z * LRELU_SLOPE)
                    dst[rows, :] = z.astype(dst.dtype)
                src = dst

    return kernel


# ---------------------------------- JAX wrapper ----------------------------------

def encoder_forward(params, x):
    """x: (N, C_in, L) float32 in PyTorch NCL layout -> (N, latent_size, L_final).

    BatchNorm1d is evaluated in training mode (batch statistics over N and L), matching
    a freshly constructed nn.BatchNorm1d; eval mode with running stats is not implemented.
    """
    N, C_in, L = x.shape
    n_layers = len(params)
    latent = int(params[-1]["w"].shape[0])

    # ---- static per-layer plan: lengths + per-layer lane-dense channel padding ----
    plan, Lc, cin = [], L, C_in
    for pr in params:
        k, s, p = int(pr["k"]), int(pr["s"]), int(pr["p"])
        assert p <= OFF
        cout = int(pr["w"].shape[0])
        L_out = (Lc + 2 * p - k) // s + 1
        assert L_out >= 1, "input sequence too short for the encoder stack"
        plan.append(dict(k=k, s=s, p=p, L_in=Lc, L_out=L_out, cin=cin, cout=cout,
                         cin_pad=_rup(cin, 128), cout_pad=_rup(cout, 128)))
        Lc, cin = L_out, cout
    L_final = Lc
    cout_pad_last = plan[-1]["cout_pad"]

    # ---- activation buffer plan (per-layer width, per-layer dtype) ----
    # Buffer i = layer i's output; bf16 when its consumer is stride-1, f32 when the
    # consumer does stride-2 sublane reads (packed strided loads avoided on purpose).
    in_lbuf = _rup(OFF + L + plan[0]["p"], 16)     # input buffer (bf16)
    buf_dtypes, buf_lbufs = [], []
    for i in range(n_layers - 1):
        nxt = plan[i + 1]
        dt = jnp.bfloat16 if nxt["s"] == 1 else jnp.float32
        mult = 16 if dt == jnp.bfloat16 else 8
        buf_dtypes.append(dt)
        buf_lbufs.append(_rup(OFF + plan[i]["L_out"] + nxt["p"], mult))
    for i, lp in enumerate(plan):
        lp["src_lbuf"] = in_lbuf if i == 0 else buf_lbufs[i - 1]
        lp["dst_lbuf"] = buf_lbufs[i] if i < n_layers - 1 else None

    # ---- pack per-layer weights as (k*cin_pad, cout_pad) bf16 slabs ----
    w_slabs = []
    for lp, pr in zip(plan, params):
        w = jnp.transpose(pr["w"], (2, 1, 0))                       # (k, cin, cout)
        w = jnp.pad(w, ((0, 0),
                        (0, lp["cin_pad"] - lp["cin"]),
                        (0, lp["cout_pad"] - lp["cout"])))
        w_slabs.append(w.reshape(lp["k"] * lp["cin_pad"], lp["cout_pad"]).astype(jnp.bfloat16))

    g_list, bt_list = [], []
    for lp, pr in zip(plan[:-1], params[:-1]):
        padc = lp["cout_pad"] - lp["cout"]
        g_list.append(jnp.pad(pr["gamma"], (0, padc)).reshape(1, lp["cout_pad"]).astype(jnp.float32))
        bt_list.append(jnp.pad(pr["beta"], (0, padc)).reshape(1, lp["cout_pad"]).astype(jnp.float32))
    b_last = jnp.pad(params[-1]["b"], (0, cout_pad_last - plan[-1]["cout"]))
    b_last = b_last.reshape(1, cout_pad_last).astype(jnp.float32)

    # ---- input: NCL -> channels-last bf16, lane-dense, OFF leading zero rows ----
    x_nlc = jnp.transpose(x, (0, 2, 1)).astype(jnp.bfloat16)        # (N, L, C_in)
    x_pad = jnp.pad(x_nlc, ((0, 0), (OFF, in_lbuf - L - OFF), (0, plan[0]["cin_pad"] - C_in)))
    x_flat = x_pad.reshape(N * in_lbuf, plan[0]["cin_pad"])

    inputs = [x_flat] + w_slabs + g_list + bt_list + [b_last]
    in_specs = [pl.BlockSpec(a.shape, lambda i: (0, 0)) for a in inputs]
    out_shape = jax.ShapeDtypeStruct((N * L_final, cout_pad_last), jnp.float32)
    out_spec = pl.BlockSpec((N * L_final, cout_pad_last), lambda i: (0, 0))
    scratch_shapes = [pltpu.VMEM((N * lb, plan[i]["cout_pad"]), dt)
                      for i, (lb, dt) in enumerate(zip(buf_lbufs, buf_dtypes))]

    # VMEM budget: operands (x2 for pipeline buffers) + output + scratch, with headroom.
    est = sum(int(a.size) * a.dtype.itemsize for a in inputs) * 2
    est += N * L_final * cout_pad_last * 4 * 2
    est += sum(N * lb * plan[i]["cout_pad"] * jnp.dtype(dt).itemsize
               for i, (lb, dt) in enumerate(zip(buf_lbufs, buf_dtypes)))
    vmem_limit = int(min(120 * 2**20, max(32 * 2**20, 2 * est)))

    kernel = _make_encoder_kernel(plan, N, n_layers)
    out = pl.pallas_call(
        kernel,
        grid=(1,),
        in_specs=in_specs,
        out_specs=out_spec,
        out_shape=out_shape,
        scratch_shapes=scratch_shapes,
        compiler_params=pltpu.CompilerParams(
            dimension_semantics=("arbitrary",),
            vmem_limit_bytes=vmem_limit),
    )(*inputs)

    # (N*L_final, cout_pad) -> (N, latent, L_final) NCL, dropping channel padding.
    return jnp.transpose(out.reshape(N, L_final, cout_pad_last)[:, :, :latent], (0, 2, 1))


def init_encoder_params(key, window_size, latent_size):
    W = window_size
    layer_cfg = [
        # (C_in,   C_out,        ksize, stride, pad)
        (W,        2 * W,        7,     1,      0),
        (2 * W,    4 * W,        4,     2,      1),
        (4 * W,    8 * W,        4,     2,      1),
        (8 * W,    16 * W,       4,     2,      1),
        (16 * W,   latent_size,  10,    1,      0),
    ]
    params = []
    for (cin, cout, k, s, p) in layer_cfg:
        key, kw, kb = jax.random.split(key, 3)
        fan_in = cin * k
        bound = 1.0 / (fan_in ** 0.5)
        w = jax.random.uniform(kw, (cout, cin, k), jnp.float32, -bound, bound)
        b = jax.random.uniform(kb, (cout,), jnp.float32, -bound, bound)
        gamma = jnp.ones((cout,), jnp.float32)   # nn.BatchNorm1d affine defaults
        beta = jnp.zeros((cout,), jnp.float32)
        params.append(dict(w=w, b=b, gamma=gamma, beta=beta, k=k, s=s, p=p))
    return params


if __name__ == "__main__":
    # Small, shape-consistent example: window_size=4, latent_size=8, batch=2, seq len 86.
    # Length trace through the stack: 86 -> 80 -> 40 -> 20 -> 10 -> 1.
    window_size = 4
    latent_size = 8
    N, L = 2, 86

    key = jax.random.PRNGKey(0)
    kx, kp = jax.random.split(key)
    x = jax.random.normal(kx, (N, window_size, L), dtype=jnp.float32)  # NCL, like PyTorch

    params = init_encoder_params(kp, window_size, latent_size)
    out = encoder_forward(params, x)
    out = jax.block_until_ready(out)

    assert out.shape == (N, latent_size, 1), out.shape
    assert bool(jnp.all(jnp.isfinite(out)))
    print("KERNEL_OK")
</pallas_src>

<mosaic_0001>
module attributes {stable_mosaic.version = 11 : i64} {
  func.func @kernel(%arg0: i32, %arg1: memref<192x128xbf16, #tpu.memory_space<vmem>>, %arg2: memref<896x128xbf16, #tpu.memory_space<vmem>>, %arg3: memref<512x128xbf16, #tpu.memory_space<vmem>>, %arg4: memref<512x128xbf16, #tpu.memory_space<vmem>>, %arg5: memref<512x128xbf16, #tpu.memory_space<vmem>>, %arg6: memref<1280x128xbf16, #tpu.memory_space<vmem>>, %arg7: memref<1x128xf32, #tpu.memory_space<vmem>>, %arg8: memref<1x128xf32, #tpu.memory_space<vmem>>, %arg9: memref<1x128xf32, #tpu.memory_space<vmem>>, %arg10: memref<1x128xf32, #tpu.memory_space<vmem>>, %arg11: memref<1x128xf32, #tpu.memory_space<vmem>>, %arg12: memref<1x128xf32, #tpu.memory_space<vmem>>, %arg13: memref<1x128xf32, #tpu.memory_space<vmem>>, %arg14: memref<1x128xf32, #tpu.memory_space<vmem>>, %arg15: memref<1x128xf32, #tpu.memory_space<vmem>>, %arg16: memref<2x128xf32, #tpu.memory_space<vmem>>, %arg17: memref<176x128xf32, #tpu.memory_space<vmem>>, %arg18: memref<96x128xf32, #tpu.memory_space<vmem>>, %arg19: memref<48x128xf32, #tpu.memory_space<vmem>>, %arg20: memref<32x128xbf16, #tpu.memory_space<vmem>>) attributes {dimension_semantics = [#tpu.dimension_semantics<arbitrary>], iteration_bounds = array<i64: 1>, scalar_prefetch = 0 : i64, scratch_operands = 4 : i64, tpu.core_type = #tpu.core_type<tc>, window_params = [{pipeline_mode = #tpu.pipeline_mode<synchronous>, transform_indices = @transform_0, window_bounds = array<i64: 192, 128>}, {pipeline_mode = #tpu.pipeline_mode<synchronous>, transform_indices = @transform_1, window_bounds = array<i64: 896, 128>}, {pipeline_mode = #tpu.pipeline_mode<synchronous>, transform_indices = @transform_2, window_bounds = array<i64: 512, 128>}, {pipeline_mode = #tpu.pipeline_mode<synchronous>, transform_indices = @transform_3, window_bounds = array<i64: 512, 128>}, {pipeline_mode = #tpu.pipeline_mode<synchronous>, transform_indices = @transform_4, window_bounds = array<i64: 512, 128>}, {pipeline_mode = #tpu.pipeline_mode<synchronous>, transform_indices = @transform_5, window_bounds = array<i64: 1280, 128>}, {pipeline_mode = #tpu.pipeline_mode<synchronous>, transform_indices = @transform_6, window_bounds = array<i64: 1, 128>}, {pipeline_mode = #tpu.pipeline_mode<synchronous>, transform_indices = @transform_7, window_bounds = array<i64: 1, 128>}, {pipeline_mode = #tpu.pipeline_mode<synchronous>, transform_indices = @transform_8, window_bounds = array<i64: 1, 128>}, {pipeline_mode = #tpu.pipeline_mode<synchronous>, transform_indices = @transform_9, window_bounds = array<i64: 1, 128>}, {pipeline_mode = #tpu.pipeline_mode<synchronous>, transform_indices = @transform_10, window_bounds = array<i64: 1, 128>}, {pipeline_mode = #tpu.pipeline_mode<synchronous>, transform_indices = @transform_11, window_bounds = array<i64: 1, 128>}, {pipeline_mode = #tpu.pipeline_mode<synchronous>, transform_indices = @transform_12, window_bounds = array<i64: 1, 128>}, {pipeline_mode = #tpu.pipeline_mode<synchronous>, transform_indices = @transform_13, window_bounds = array<i64: 1, 128>}, {pipeline_mode = #tpu.pipeline_mode<synchronous>, transform_indices = @transform_14, window_bounds = array<i64: 1, 128>}, {pipeline_mode = #tpu.pipeline_mode<synchronous>, transform_indices = @transform_15, window_bounds = array<i64: 2, 128>}]} {
    %cst = arith.constant 0.000000e+00 : f32
    %0 = vector.broadcast %cst : f32 to vector<1x128xf32>
    %cst_0 = arith.constant 0.000000e+00 : f32
    %1 = vector.broadcast %cst_0 : f32 to vector<1x128xf32>
    %c1 = arith.constant 1 : index
    %c0 = arith.constant 0 : index
    %2 = vector.load %arg1[%c1, %c0] : memref<192x128xbf16, #tpu.memory_space<vmem>>, vector<80x128xbf16>
    %c0_1 = arith.constant 0 : index
    %c0_2 = arith.constant 0 : index
    %3 = vector.load %arg2[%c0_1, %c0_2] : memref<896x128xbf16, #tpu.memory_space<vmem>>, vector<128x128xbf16>
    %cst_3 = arith.constant dense<0.000000e+00> : vector<80x128xf32>
    %4 = tpu.matmul %2, %3, %cst_3 {dimension_numbers = #tpu.dot_dimension_numbers<[1], [0], [0], [1], [0, 0, 1, 1], [], []>} : vector<80x128xbf16>, vector<128x128xbf16>, vector<80x128xf32> -> vector<80x128xf32>
    %c2 = arith.constant 2 : index
    %c0_4 = arith.constant 0 : index
    %5 = vector.load %arg1[%c2, %c0_4] : memref<192x128xbf16, #tpu.memory_space<vmem>>, vector<80x128xbf16>
    %c128 = arith.constant 128 : index
    %c0_5 = arith.constant 0 : index
    %6 = vector.load %arg2[%c128, %c0_5] : memref<896x128xbf16, #tpu.memory_space<vmem>>, vector<128x128xbf16>
    %cst_6 = arith.constant dense<0.000000e+00> : vector<80x128xf32>
    %7 = tpu.matmul %5, %6, %cst_6 {dimension_numbers = #tpu.dot_dimension_numbers<[1], [0], [0], [1], [0, 0, 1, 1], [], []>} : vector<80x128xbf16>, vector<128x128xbf16>, vector<80x128xf32> -> vector<80x128xf32>
    %8 = arith.addf %4, %7 : vector<80x128xf32>
    %c3 = arith.constant 3 : index
    %c0_7 = arith.constant 0 : index
    %9 = vector.load %arg1[%c3, %c0_7] : memref<192x128xbf16, #tpu.memory_space<vmem>>, vector<80x128xbf16>
    %c256 = arith.constant 256 : index
    %c0_8 = arith.constant 0 : index
    %10 = vector.load %arg2[%c256, %c0_8] : memref<896x128xbf16, #tpu.memory_space<vmem>>, vector<128x128xbf16>
    %cst_9 = arith.constant dense<0.000000e+00> : vector<80x128xf32>
    %11 = tpu.matmul %9, %10, %cst_9 {dimension_numbers = #tpu.dot_dimension_numbers<[1], [0], [0], [1], [0, 0, 1, 1], [], []>} : vector<80x128xbf16>, vector<128x128xbf16>, vector<80x128xf32> -> vector<80x128xf32>
    %12 = arith.addf %8, %11 : vector<80x128xf32>
    %c4 = arith.constant 4 : index
    %c0_10 = arith.constant 0 : index
    %13 = vector.load %arg1[%c4, %c0_10] : memref<192x128xbf16, #tpu.memory_space<vmem>>, vector<80x128xbf16>
    %c384 = arith.constant 384 : index
    %c0_11 = arith.constant 0 : index
    %14 = vector.load %arg2[%c384, %c0_11] : memref<896x128xbf16, #tpu.memory_space<vmem>>, vector<128x128xbf16>
    %cst_12 = arith.constant dense<0.000000e+00> : vector<80x128xf32>
    %15 = tpu.matmul %13, %14, %cst_12 {dimension_numbers = #tpu.dot_dimension_numbers<[1], [0], [0], [1], [0, 0, 1, 1], [], []>} : vector<80x128xbf16>, vector<128x128xbf16>, vector<80x128xf32> -> vector<80x128xf32>
    %16 = arith.addf %12, %15 : vector<80x128xf32>
    %c5 = arith.constant 5 : index
    %c0_13 = arith.constant 0 : index
    %17 = vector.load %arg1[%c5, %c0_13] : memref<192x128xbf16, #tpu.memory_space<vmem>>, vector<80x128xbf16>
    %c512 = arith.constant 512 : index
    %c0_14 = arith.constant 0 : index
    %18 = vector.load %arg2[%c512, %c0_14] : memref<896x128xbf16, #tpu.memory_space<vmem>>, vector<128x128xbf16>
    %cst_15 = arith.constant dense<0.000000e+00> : vector<80x128xf32>
    %19 = tpu.matmul %17, %18, %cst_15 {dimension_numbers = #tpu.dot_dimension_numbers<[1], [0], [0], [1], [0, 0, 1, 1], [], []>} : vector<80x128xbf16>, vector<128x128xbf16>, vector<80x128xf32> -> vector<80x128xf32>
    %20 = arith.addf %16, %19 : vector<80x128xf32>
    %c6 = arith.constant 6 : index
    %c0_16 = arith.constant 0 : index
    %21 = vector.load %arg1[%c6, %c0_16] : memref<192x128xbf16, #tpu.memory_space<vmem>>, vector<80x128xbf16>
    %c640 = arith.constant 640 : index
    %c0_17 = arith.constant 0 : index
    %22 = vector.load %arg2[%c640, %c0_17] : memref<896x128xbf16, #tpu.memory_space<vmem>>, vector<128x128xbf16>
    %cst_18 = arith.constant dense<0.000000e+00> : vector<80x128xf32>
    %23 = tpu.matmul %21, %22, %cst_18 {dimension_numbers = #tpu.dot_dimension_numbers<[1], [0], [0], [1], [0, 0, 1, 1], [], []>} : vector<80x128xbf16>, vector<128x128xbf16>, vector<80x128xf32> -> vector<80x128xf32>
    %24 = arith.addf %20, %23 : vector<80x128xf32>
    %c7 = arith.constant 7 : index
    %c0_19 = arith.constant 0 : index
    %25 = vector.load %arg1[%c7, %c0_19] : memref<192x128xbf16, #tpu.memory_space<vmem>>, vector<80x128xbf16>
    %c768 = arith.constant 768 : index
    %c0_20 = arith.constant 0 : index
    %26 = vector.load %arg2[%c768, %c0_20] : memref<896x128xbf16, #tpu.memory_space<vmem>>, vector<128x128xbf16>
    %cst_21 = arith.constant dense<0.000000e+00> : vector<80x128xf32>
    %27 = tpu.matmul %25, %26, %cst_21 {dimension_numbers = #tpu.dot_dimension_numbers<[1], [0], [0], [1], [0, 0, 1, 1], [], []>} : vector<80x128xbf16>, vector<128x128xbf16>, vector<80x128xf32> -> vector<80x128xf32>
    %28 = arith.addf %24, %27 : vector<80x128xf32>
    %cst_22 = arith.constant dense<0.000000e+00> : vector<128xf32>
    %29 = vector.multi_reduction <add>, %28, %cst_22 [0] : vector<80x128xf32> to vector<128xf32>
    %30 = vector.shape_cast %29 : vector<128xf32> to vector<1x128xf32>
    %31 = arith.addf %0, %30 : vector<1x128xf32>
    %32 = arith.mulf %28, %28 : vector<80x128xf32>
    %cst_23 = arith.constant dense<0.000000e+00> : vector<128xf32>
    %33 = vector.multi_reduction <add>, %32, %cst_23 [0] : vector<80x128xf32> to vector<128xf32>
    %34 = vector.shape_cast %33 : vector<128xf32> to vector<1x128xf32>
    %35 = arith.addf %1, %34 : vector<1x128xf32>
    %c1_24 = arith.constant 1 : index
    %c0_25 = arith.constant 0 : index
    %36 = vector.load %arg17[%c1_24, %c0_25] : memref<176x128xf32, #tpu.memory_space<vmem>>, vector<80x128xf32>
    tpu.vector_store %arg17[%c1_24, %c0_25], %28 {strides = array<i32>} : memref<176x128xf32, #tpu.memory_space<vmem>>, vector<80x128xf32>,
    %cst_26 = arith.constant 0.000000e+00 : f32
    %37 = vector.broadcast %cst_26 : f32 to vector<1x128xf32>
    %c0_27 = arith.constant 0 : index
    %c0_28 = arith.constant 0 : index
    %38 = vector.load %arg17[%c0_27, %c0_28] : memref<176x128xf32, #tpu.memory_space<vmem>>, vector<1x128xf32>
    tpu.vector_store %arg17[%c0_27, %c0_28], %37 {strides = array<i32>} : memref<176x128xf32, #tpu.memory_space<vmem>>, vector<1x128xf32>,
    %cst_29 = arith.constant 0.000000e+00 : f32
    %39 = vector.broadcast %cst_29 : f32 to vector<7x128xf32>
    %c81 = arith.constant 81 : index
    %c0_30 = arith.constant 0 : index
    %40 = vector.load %arg17[%c81, %c0_30] : memref<176x128xf32, #tpu.memory_space<vmem>>, vector<7x128xf32>
    tpu.vector_store %arg17[%c81, %c0_30], %39 {strides = array<i32>} : memref<176x128xf32, #tpu.memory_space<vmem>>, vector<7x128xf32>,
    %c97 = arith.constant 97 : index
    %c0_31 = arith.constant 0 : index
    %41 = vector.load %arg1[%c97, %c0_31] : memref<192x128xbf16, #tpu.memory_space<vmem>>, vector<80x128xbf16>
    %c0_32 = arith.constant 0 : index
    %c0_33 = arith.constant 0 : index
    %42 = vector.load %arg2[%c0_32, %c0_33] : memref<896x128xbf16, #tpu.memory_space<vmem>>, vector<128x128xbf16>
    %cst_34 = arith.constant dense<0.000000e+00> : vector<80x128xf32>
    %43 = tpu.matmul %41, %42, %cst_34 {dimension_numbers = #tpu.dot_dimension_numbers<[1], [0], [0], [1], [0, 0, 1, 1], [], []>} : vector<80x128xbf16>, vector<128x128xbf16>, vector<80x128xf32> -> vector<80x128xf32>
    %c98 = arith.constant 98 : index
    %c0_35 = arith.constant 0 : index
    %44 = vector.load %arg1[%c98, %c0_35] : memref<192x128xbf16, #tpu.memory_space<vmem>>, vector<80x128xbf16>
    %c128_36 = arith.constant 128 : index
    %c0_37 = arith.constant 0 : index
    %45 = vector.load %arg2[%c128_36, %c0_37] : memref<896x128xbf16, #tpu.memory_space<vmem>>, vector<128x128xbf16>
    %cst_38 = arith.constant dense<0.000000e+00> : vector<80x128xf32>
    %46 = tpu.matmul %44, %45, %cst_38 {dimension_numbers = #tpu.dot_dimension_numbers<[1], [0], [0], [1], [0, 0, 1, 1], [], []>} : vector<80x128xbf16>, vector<128x128xbf16>, vector<80x128xf32> -> vector<80x128xf32>
    %47 = arith.addf %43, %46 : vector<80x128xf32>
    %c99 = arith.constant 99 : index
    %c0_39 = arith.constant 0 : index
    %48 = vector.load %arg1[%c99, %c0_39] : memref<192x128xbf16, #tpu.memory_space<vmem>>, vector<80x128xbf16>
    %c256_40 = arith.constant 256 : index
    %c0_41 = arith.constant 0 : index
    %49 = vector.load %arg2[%c256_40, %c0_41] : memref<896x128xbf16, #tpu.memory_space<vmem>>, vector<128x128xbf16>
    %cst_42 = arith.constant dense<0.000000e+00> : vector<80x128xf32>
    %50 = tpu.matmul %48, %49, %cst_42 {dimension_numbers = #tpu.dot_dimension_numbers<[1], [0], [0], [1], [0, 0, 1, 1], [], []>} : vector<80x128xbf16>, vector<128x128xbf16>, vector<80x128xf32> -> vector<80x128xf32>
    %51 = arith.addf %47, %50 : vector<80x128xf32>
    %c100 = arith.constant 100 : index
    %c0_43 = arith.constant 0 : index
    %52 = vector.load %arg1[%c100, %c0_43] : memref<192x128xbf16, #tpu.memory_space<vmem>>, vector<80x128xbf16>
    %c384_44 = arith.constant 384 : index
    %c0_45 = arith.constant 0 : index
    %53 = vector.load %arg2[%c384_44, %c0_45] : memref<896x128xbf16, #tpu.memory_space<vmem>>, vector<128x128xbf16>
    %cst_46 = arith.constant dense<0.000000e+00> : vector<80x128xf32>
    %54 = tpu.matmul %52, %53, %cst_46 {dimension_numbers = #tpu.dot_dimension_numbers<[1], [0], [0], [1], [0, 0, 1, 1], [], []>} : vector<80x128xbf16>, vector<128x128xbf16>, vector<80x128xf32> -> vector<80x128xf32>
    %55 = arith.addf %51, %54 : vector<80x128xf32>
    %c101 = arith.constant 101 : index
    %c0_47 = arith.constant 0 : index
    %56 = vector.load %arg1[%c101, %c0_47] : memref<192x128xbf16, #tpu.memory_space<vmem>>, vector<80x128xbf16>
    %c512_48 = arith.constant 512 : index
    %c0_49 = arith.constant 0 : index
    %57 = vector.load %arg2[%c512_48, %c0_49] : memref<896x128xbf16, #tpu.memory_space<vmem>>, vector<128x128xbf16>
    %cst_50 = arith.constant dense<0.000000e+00> : vector<80x128xf32>
    %58 = tpu.matmul %56, %57, %cst_50 {dimension_numbers = #tpu.dot_dimension_numbers<[1], [0], [0], [1], [0, 0, 1, 1], [], []>} : vector<80x128xbf16>, vector<128x128xbf16>, vector<80x128xf32> -> vector<80x128xf32>
    %59 = arith.addf %55, %58 : vector<80x128xf32>
    %c102 = arith.constant 102 : index
    %c0_51 = arith.constant 0 : index
    %60 = vector.load %arg1[%c102, %c0_51] : memref<192x128xbf16, #tpu.memory_space<vmem>>, vector<80x128xbf16>
    %c640_52 = arith.constant 640 : index
    %c0_53 = arith.constant 0 : index
    %61 = vector.load %arg2[%c640_52, %c0_53] : memref<896x128xbf16, #tpu.memory_space<vmem>>, vector<128x128xbf16>
    %cst_54 = arith.constant dense<0.000000e+00> : vector<80x128xf32>
    %62 = tpu.matmul %60, %61, %cst_54 {dimension_numbers = #tpu.dot_dimension_numbers<[1], [0], [0], [1], [0, 0, 1, 1], [], []>} : vector<80x128xbf16>, vector<128x128xbf16>, vector<80x128xf32> -> vector<80x128xf32>
    %63 = arith.addf %59, %62 : vector<80x128xf32>
    %c103 = arith.constant 103 : index
    %c0_55 = arith.constant 0 : index
    %64 = vector.load %arg1[%c103, %c0_55] : memref<192x128xbf16, #tpu.memory_space<vmem>>, vector<80x128xbf16>
    %c768_56 = arith.constant 768 : index
    %c0_57 = arith.constant 0 : index
    %65 = vector.load %arg2[%c768_56, %c0_57] : memref<896x128xbf16, #tpu.memory_space<vmem>>, vector<128x128xbf16>
    %cst_58 = arith.constant dense<0.000000e+00> : vector<80x128xf32>
    %66 = tpu.matmul %64, %65, %cst_58 {dimension_numbers = #tpu.dot_dimension_numbers<[1], [0], [0], [1], [0, 0, 1, 1], [], []>} : vector<80x128xbf16>, vector<128x128xbf16>, vector<80x128xf32> -> vector<80x128xf32>
    %67 = arith.addf %63, %66 : vector<80x128xf32>
    %cst_59 = arith.constant dense<0.000000e+00> : vector<128xf32>
    %68 = vector.multi_reduction <add>, %67, %cst_59 [0] : vector<80x128xf32> to vector<128xf32>
    %69 = vector.shape_cast %68 : vector<128xf32> to vector<1x128xf32>
    %70 = arith.addf %31, %69 : vector<1x128xf32>
    %71 = arith.mulf %67, %67 : vector<80x128xf32>
    %cst_60 = arith.constant dense<0.000000e+00> : vector<128xf32>
    %72 = vector.multi_reduction <add>, %71, %cst_60 [0] : vector<80x128xf32> to vector<128xf32>
    %73 = vector.shape_cast %72 : vector<128xf32> to vector<1x128xf32>
    %74 = arith.addf %35, %73 : vector<1x128xf32>
    %c89 = arith.constant 89 : index
    %c0_61 = arith.constant 0 : index
    %75 = vector.load %arg17[%c89, %c0_61] : memref<176x128xf32, #tpu.memory_space<vmem>>, vector<80x128xf32>
    tpu.vector_store %arg17[%c89, %c0_61], %67 {strides = array<i32>} : memref<176x128xf32, #tpu.memory_space<vmem>>, vector<80x128xf32>,
    %cst_62 = arith.constant 0.000000e+00 : f32
    %76 = vector.broadcast %cst_62 : f32 to vector<1x128xf32>
    %c88 = arith.constant 88 : index
    %c0_63 = arith.constant 0 : index
    %77 = vector.load %arg17[%c88, %c0_63] : memref<176x128xf32, #tpu.memory_space<vmem>>, vector<1x128xf32>
    tpu.vector_store %arg17[%c88, %c0_63], %76 {strides = array<i32>} : memref<176x128xf32, #tpu.memory_space<vmem>>, vector<1x128xf32>,
    %cst_64 = arith.constant 0.000000e+00 : f32
    %78 = vector.broadcast %cst_64 : f32 to vector<7x128xf32>
    %c169 = arith.constant 169 : index
    %c0_65 = arith.constant 0 : index
    %79 = vector.load %arg17[%c169, %c0_65] : memref<176x128xf32, #tpu.memory_space<vmem>>, vector<7x128xf32>
    tpu.vector_store %arg17[%c169, %c0_65], %78 {strides = array<i32>} : memref<176x128xf32, #tpu.memory_space<vmem>>, vector<7x128xf32>,
    %cst_66 = arith.constant 6.250000e-03 : f32
    %80 = vector.broadcast %cst_66 : f32 to vector<1x128xf32>
    %81 = arith.mulf %70, %80 : vector<1x128xf32>
    %cst_67 = arith.constant 6.250000e-03 : f32
    %82 = vector.broadcast %cst_67 : f32 to vector<1x128xf32>
    %83 = arith.mulf %74, %82 : vector<1x128xf32>
    %84 = arith.mulf %81, %81 : vector<1x128xf32>
    %85 = arith.subf %83, %84 : vector<1x128xf32>
    %cst_68 = arith.constant 0.000000e+00 : f32
    %86 = vector.broadcast %cst_68 : f32 to vector<1x128xf32>
    %87 = arith.maximumf %85, %86 : vector<1x128xf32>
    %c0_69 = arith.constant 0 : index
    %c0_70 = arith.constant 0 : index
    %88 = vector.load %arg7[%c0_69, %c0_70] : memref<1x128xf32, #tpu.memory_space<vmem>>, vector<1x128xf32>
    %cst_71 = arith.constant 9.99999974E-6 : f32
    %89 = vector.broadcast %cst_71 : f32 to vector<1x128xf32>
    %90 = arith.addf %87, %89 : vector<1x128xf32>
    %91 = math.rsqrt %90 : vector<1x128xf32>
    %92 = arith.mulf %88, %91 : vector<1x128xf32>
    %c0_72 = arith.constant 0 : index
    %c0_73 = arith.constant 0 : index
    %93 = vector.load %arg11[%c0_72, %c0_73] : memref<1x128xf32, #tpu.memory_space<vmem>>, vector<1x128xf32>
    %94 = arith.mulf %81, %92 : vector<1x128xf32>
    %95 = arith.subf %93, %94 : vector<1x128xf32>
    %96 = vector.shape_cast %92 : vector<1x128xf32> to vector<1x128xf32>
    %97 = vector.broadcast %96 : vector<1x128xf32> to vector<80x128xf32>
    %98 = vector.shape_cast %95 : vector<1x128xf32> to vector<1x128xf32>
    %99 = vector.broadcast %98 : vector<1x128xf32> to vector<80x128xf32>
    %c1_74 = arith.constant 1 : index
    %c0_75 = arith.constant 0 : index
    %100 = vector.load %arg17[%c1_74, %c0_75] : memref<176x128xf32, #tpu.memory_space<vmem>>, vector<80x128xf32>
    %101 = arith.mulf %100, %97 : vector<80x128xf32>
    %102 = arith.addf %101, %99 : vector<80x128xf32>
    %cst_76 = arith.constant 0.000000e+00 : f32
    %103 = vector.broadcast %cst_76 : f32 to vector<80x128xf32>
    %104 = arith.cmpf ogt, %102, %103 : vector<80x128xf32>
    %cst_77 = arith.constant 0.00999999977 : f32
    %105 = vector.broadcast %cst_77 : f32 to vector<80x128xf32>
    %106 = arith.mulf %102, %105 : vector<80x128xf32>
    %107 = arith.select %104, %102, %106 : vector<80x128xi1>, vector<80x128xf32>
    %c1_78 = arith.constant 1 : index
    %c0_79 = arith.constant 0 : index
    %108 = vector.load %arg17[%c1_78, %c0_79] : memref<176x128xf32, #tpu.memory_space<vmem>>, vector<80x128xf32>
    tpu.vector_store %arg17[%c1_78, %c0_79], %107 {strides = array<i32>} : memref<176x128xf32, #tpu.memory_space<vmem>>, vector<80x128xf32>,
    %c89_80 = arith.constant 89 : index
    %c0_81 = arith.constant 0 : index
    %109 = vector.load %arg17[%c89_80, %c0_81] : memref<176x128xf32, #tpu.memory_space<vmem>>, vector<80x128xf32>
    %110 = arith.mulf %109, %97 : vector<80x128xf32>
    %111 = arith.addf %110, %99 : vector<80x128xf32>
    %cst_82 = arith.constant 0.000000e+00 : f32
    %112 = vector.broadcast %cst_82 : f32 to vector<80x128xf32>
    %113 = arith.cmpf ogt, %111, %112 : vector<80x128xf32>
    %cst_83 = arith.constant 0.00999999977 : f32
    %114 = vector.broadcast %cst_83 : f32 to vector<80x128xf32>
    %115 = arith.mulf %111, %114 : vector<80x128xf32>
    %116 = arith.select %113, %111, %115 : vector<80x128xi1>, vector<80x128xf32>
    %c89_84 = arith.constant 89 : index
    %c0_85 = arith.constant 0 : index
    %117 = vector.load %arg17[%c89_84, %c0_85] : memref<176x128xf32, #tpu.memory_space<vmem>>, vector<80x128xf32>
    tpu.vector_store %arg17[%c89_84, %c0_85], %116 {strides = array<i32>} : memref<176x128xf32, #tpu.memory_space<vmem>>, vector<80x128xf32>,
    %cst_86 = arith.constant 0.000000e+00 : f32
    %118 = vector.broadcast %cst_86 : f32 to vector<1x128xf32>
    %cst_87 = arith.constant 0.000000e+00 : f32
    %119 = vector.broadcast %cst_87 : f32 to vector<1x128xf32>
    %c0_88 = arith.constant 0 : index
    %c0_89 = arith.constant 0 : index
    %120 = tpu.strided_load %arg17[%c0_88, %c0_89] {strides = array<i32: 2, 1>} : memref<176x128xf32, #tpu.memory_space<vmem>>, vector<40x128xf32>
    %121 = arith.truncf %120 : vector<40x128xf32> to vector<40x128xbf16>
    %c0_90 = arith.constant 0 : index
    %c0_91 = arith.constant 0 : index
    %122 = vector.load %arg3[%c0_90, %c0_91] : memref<512x128xbf16, #tpu.memory_space<vmem>>, vector<128x128xbf16>
    %cst_92 = arith.constant dense<0.000000e+00> : vector<40x128xf32>
    %123 = tpu.matmul %121, %122, %cst_92 {dimension_numbers = #tpu.dot_dimension_numbers<[1], [0], [0], [1], [0, 0, 1, 1], [], []>} : vector<40x128xbf16>, vector<128x128xbf16>, vector<40x128xf32> -> vector<40x128xf32>
    %c1_93 = arith.constant 1 : index
    %c0_94 = arith.constant 0 : index
    %124 = tpu.strided_load %arg17[%c1_93, %c0_94] {strides = array<i32: 2, 1>} : memref<176x128xf32, #tpu.memory_space<vmem>>, vector<40x128xf32>
    %125 = arith.truncf %124 : vector<40x128xf32> to vector<40x128xbf16>
    %c128_95 = arith.constant 128 : index
    %c0_96 = arith.constant 0 : index
    %126 = vector.load %arg3[%c128_95, %c0_96] : memref<512x128xbf16, #tpu.memory_space<vmem>>, vector<128x128xbf16>
    %cst_97 = arith.constant dense<0.000000e+00> : vector<40x128xf32>
    %127 = tpu.matmul %125, %126, %cst_97 {dimension_numbers = #tpu.dot_dimension_numbers<[1], [0], [0], [1], [0, 0, 1, 1], [], []>} : vector<40x128xbf16>, vector<128x128xbf16>, vector<40x128xf32> -> vector<40x128xf32>
    %128 = arith.addf %123, %127 : vector<40x128xf32>
    %c2_98 = arith.constant 2 : index
    %c0_99 = arith.constant 0 : index
    %129 = tpu.strided_load %arg17[%c2_98, %c0_99] {strides = array<i32: 2, 1>} : memref<176x128xf32, #tpu.memory_space<vmem>>, vector<40x128xf32>
    %130 = arith.truncf %129 : vector<40x128xf32> to vector<40x128xbf16>
    %c256_100 = arith.constant 256 : index
    %c0_101 = arith.constant 0 : index
    %131 = vector.load %arg3[%c256_100, %c0_101] : memref<512x128xbf16, #tpu.memory_space<vmem>>, vector<128x128xbf16>
    %cst_102 = arith.constant dense<0.000000e+00> : vector<40x128xf32>
    %132 = tpu.matmul %130, %131, %cst_102 {dimension_numbers = #tpu.dot_dimension_numbers<[1], [0], [0], [1], [0, 0, 1, 1], [], []>} : vector<40x128xbf16>, vector<128x128xbf16>, vector<40x128xf32> -> vector<40x128xf32>
    %133 = arith.addf %128, %132 : vector<40x128xf32>
    %c3_103 = arith.constant 3 : index
    %c0_104 = arith.constant 0 : index
    %134 = tpu.strided_load %arg17[%c3_103, %c0_104] {strides = array<i32: 2, 1>} : memref<176x128xf32, #tpu.memory_space<vmem>>, vector<40x128xf32>
    %135 = arith.truncf %134 : vector<40x128xf32> to vector<40x128xbf16>
    %c384_105 = arith.constant 384 : index
    %c0_106 = arith.constant 0 : index
    %136 = vector.load %arg3[%c384_105, %c0_106] : memref<512x128xbf16, #tpu.memory_space<vmem>>, vector<128x128xbf16>
    %cst_107 = arith.constant dense<0.000000e+00> : vector<40x128xf32>
    %137 = tpu.matmul %135, %136, %cst_107 {dimension_numbers = #tpu.dot_dimension_numbers<[1], [0], [0], [1], [0, 0, 1, 1], [], []>} : vector<40x128xbf16>, vector<128x128xbf16>, vector<40x128xf32> -> vector<40x128xf32>
    %138 = arith.addf %133, %137 : vector<40x128xf32>
    %cst_108 = arith.constant dense<0.000000e+00> : vector<128xf32>
    %139 = vector.multi_reduction <add>, %138, %cst_108 [0] : vector<40x128xf32> to vector<128xf32>
    %140 = vector.shape_cast %139 : vector<128xf32> to vector<1x128xf32>
    %141 = arith.addf %118, %140 : vector<1x128xf32>
    %142 = arith.mulf %138, %138 : vector<40x128xf32>
    %cst_109 = arith.constant dense<0.000000e+00> : vector<128xf32>
    %143 = vector.multi_reduction <add>, %142, %cst_109 [0] : vector<40x128xf32> to vector<128xf32>
    %144 = vector.shape_cast %143 : vector<128xf32> to vector<1x128xf32>
    %145 = arith.addf %119, %144 : vector<1x128xf32>
    %c1_110 = arith.constant 1 : index
    %c0_111 = arith.constant 0 : index
    %146 = vector.load %arg18[%c1_110, %c0_111] : memref<96x128xf32, #tpu.memory_space<vmem>>, vector<40x128xf32>
    tpu.vector_store %arg18[%c1_110, %c0_111], %138 {strides = array<i32>} : memref<96x128xf32, #tpu.memory_space<vmem>>, vector<40x128xf32>,
    %cst_112 = arith.constant 0.000000e+00 : f32
    %147 = vector.broadcast %cst_112 : f32 to vector<1x128xf32>
    %c0_113 = arith.constant 0 : index
    %c0_114 = arith.constant 0 : index
    %148 = vector.load %arg18[%c0_113, %c0_114] : memref<96x128xf32, #tpu.memory_space<vmem>>, vector<1x128xf32>
    tpu.vector_store %arg18[%c0_113, %c0_114], %147 {strides = array<i32>} : memref<96x128xf32, #tpu.memory_space<vmem>>, vector<1x128xf32>,
    %cst_115 = arith.constant 0.000000e+00 : f32
    %149 = vector.broadcast %cst_115 : f32 to vector<7x128xf32>
    %c41 = arith.constant 41 : index
    %c0_116 = arith.constant 0 : index
    %150 = vector.load %arg18[%c41, %c0_116] : memref<96x128xf32, #tpu.memory_space<vmem>>, vector<7x128xf32>
    tpu.vector_store %arg18[%c41, %c0_116], %149 {strides = array<i32>} : memref<96x128xf32, #tpu.memory_space<vmem>>, vector<7x128xf32>,
    %c88_117 = arith.constant 88 : index
    %c0_118 = arith.constant 0 : index
    %151 = tpu.strided_load %arg17[%c88_117, %c0_118] {strides = array<i32: 2, 1>} : memref<176x128xf32, #tpu.memory_space<vmem>>, vector<40x128xf32>
    %152 = arith.truncf %151 : vector<40x128xf32> to vector<40x128xbf16>
    %c0_119 = arith.constant 0 : index
    %c0_120 = arith.constant 0 : index
    %153 = vector.load %arg3[%c0_119, %c0_120] : memref<512x128xbf16, #tpu.memory_space<vmem>>, vector<128x128xbf16>
    %cst_121 = arith.constant dense<0.000000e+00> : vector<40x128xf32>
    %154 = tpu.matmul %152, %153, %cst_121 {dimension_numbers = #tpu.dot_dimension_numbers<[1], [0], [0], [1], [0, 0, 1, 1], [], []>} : vector<40x128xbf16>, vector<128x128xbf16>, vector<40x128xf32> -> vector<40x128xf32>
    %c89_122 = arith.constant 89 : index
    %c0_123 = arith.constant 0 : index
    %155 = tpu.strided_load %arg17[%c89_122, %c0_123] {strides = array<i32: 2, 1>} : memref<176x128xf32, #tpu.memory_space<vmem>>, vector<40x128xf32>
    %156 = arith.truncf %155 : vector<40x128xf32> to vector<40x128xbf16>
    %c128_124 = arith.constant 128 : index
    %c0_125 = arith.constant 0 : index
    %157 = vector.load %arg3[%c128_124, %c0_125] : memref<512x128xbf16, #tpu.memory_space<vmem>>, vector<128x128xbf16>
    %cst_126 = arith.constant dense<0.000000e+00> : vector<40x128xf32>
    %158 = tpu.matmul %156, %157, %cst_126 {dimension_numbers = #tpu.dot_dimension_numbers<[1], [0], [0], [1], [0, 0, 1, 1], [], []>} : vector<40x128xbf16>, vector<128x128xbf16>, vector<40x128xf32> -> vector<40x128xf32>
    %159 = arith.addf %154, %158 : vector<40x128xf32>
    %c90 = arith.constant 90 : index
    %c0_127 = arith.constant 0 : index
    %160 = tpu.strided_load %arg17[%c90, %c0_127] {strides = array<i32: 2, 1>} : memref<176x128xf32, #tpu.memory_space<vmem>>, vector<40x128xf32>
    %161 = arith.truncf %160 : vector<40x128xf32> to vector<40x128xbf16>
    %c256_128 = arith.constant 256 : index
    %c0_129 = arith.constant 0 : index
    %162 = vector.load %arg3[%c256_128, %c0_129] : memref<512x128xbf16, #tpu.memory_space<vmem>>, vector<128x128xbf16>
    %cst_130 = arith.constant dense<0.000000e+00> : vector<40x128xf32>
    %163 = tpu.matmul %161, %162, %cst_130 {dimension_numbers = #tpu.dot_dimension_numbers<[1], [0], [0], [1], [0, 0, 1, 1], [], []>} : vector<40x128xbf16>, vector<128x128xbf16>, vector<40x128xf32> -> vector<40x128xf32>
    %164 = arith.addf %159, %163 : vector<40x128xf32>
    %c91 = arith.constant 91 : index
    %c0_131 = arith.constant 0 : index
    %165 = tpu.strided_load %arg17[%c91, %c0_131] {strides = array<i32: 2, 1>} : memref<176x128xf32, #tpu.memory_space<vmem>>, vector<40x128xf32>
    %166 = arith.truncf %165 : vector<40x128xf32> to vector<40x128xbf16>
    %c384_132 = arith.constant 384 : index
    %c0_133 = arith.constant 0 : index
    %167 = vector.load %arg3[%c384_132, %c0_133] : memref<512x128xbf16, #tpu.memory_space<vmem>>, vector<128x128xbf16>
    %cst_134 = arith.constant dense<0.000000e+00> : vector<40x128xf32>
    %168 = tpu.matmul %166, %167, %cst_134 {dimension_numbers = #tpu.dot_dimension_numbers<[1], [0], [0], [1], [0, 0, 1, 1], [], []>} : vector<40x128xbf16>, vector<128x128xbf16>, vector<40x128xf32> -> vector<40x128xf32>
    %169 = arith.addf %164, %168 : vector<40x128xf32>
    %cst_135 = arith.constant dense<0.000000e+00> : vector<128xf32>
    %170 = vector.multi_reduction <add>, %169, %cst_135 [0] : vector<40x128xf32> to vector<128xf32>
    %171 = vector.shape_cast %170 : vector<128xf32> to vector<1x128xf32>
    %172 = arith.addf %141, %171 : vector<1x128xf32>
    %173 = arith.mulf %169, %169 : vector<40x128xf32>
    %cst_136 = arith.constant dense<0.000000e+00> : vector<128xf32>
    %174 = vector.multi_reduction <add>, %173, %cst_136 [0] : vector<40x128xf32> to vector<128xf32>
    %175 = vector.shape_cast %174 : vector<128xf32> to vector<1x128xf32>
    %176 = arith.addf %145, %175 : vector<1x128xf32>
    %c49 = arith.constant 49 : index
    %c0_137 = arith.constant 0 : index
    %177 = vector.load %arg18[%c49, %c0_137] : memref<96x128xf32, #tpu.memory_space<vmem>>, vector<40x128xf32>
    tpu.vector_store %arg18[%c49, %c0_137], %169 {strides = array<i32>} : memref<96x128xf32, #tpu.memory_space<vmem>>, vector<40x128xf32>,
    %cst_138 = arith.constant 0.000000e+00 : f32
    %178 = vector.broadcast %cst_138 : f32 to vector<1x128xf32>
    %c48 = arith.constant 48 : index
    %c0_139 = arith.constant 0 : index
    %179 = vector.load %arg18[%c48, %c0_139] : memref<96x128xf32, #tpu.memory_space<vmem>>, vector<1x128xf32>
    tpu.vector_store %arg18[%c48, %c0_139], %178 {strides = array<i32>} : memref<96x128xf32, #tpu.memory_space<vmem>>, vector<1x128xf32>,
    %cst_140 = arith.constant 0.000000e+00 : f32
    %180 = vector.broadcast %cst_140 : f32 to vector<7x128xf32>
    %c89_141 = arith.constant 89 : index
    %c0_142 = arith.constant 0 : index
    %181 = vector.load %arg18[%c89_141, %c0_142] : memref<96x128xf32, #tpu.memory_space<vmem>>, vector<7x128xf32>
    tpu.vector_store %arg18[%c89_141, %c0_142], %180 {strides = array<i32>} : memref<96x128xf32, #tpu.memory_space<vmem>>, vector<7x128xf32>,
    %cst_143 = arith.constant 1.250000e-02 : f32
    %182 = vector.broadcast %cst_143 : f32 to vector<1x128xf32>
    %183 = arith.mulf %172, %182 : vector<1x128xf32>
    %cst_144 = arith.constant 1.250000e-02 : f32
    %184 = vector.broadcast %cst_144 : f32 to vector<1x128xf32>
    %185 = arith.mulf %176, %184 : vector<1x128xf32>
    %186 = arith.mulf %183, %183 : vector<1x128xf32>
    %187 = arith.subf %185, %186 : vector<1x128xf32>
    %cst_145 = arith.constant 0.000000e+00 : f32
    %188 = vector.broadcast %cst_145 : f32 to vector<1x128xf32>
    %189 = arith.maximumf %187, %188 : vector<1x128xf32>
    %c0_146 = arith.constant 0 : index
    %c0_147 = arith.constant 0 : index
    %190 = vector.load %arg8[%c0_146, %c0_147] : memref<1x128xf32, #tpu.memory_space<vmem>>, vector<1x128xf32>
    %cst_148 = arith.constant 9.99999974E-6 : f32
    %191 = vector.broadcast %cst_148 : f32 to vector<1x128xf32>
    %192 = arith.addf %189, %191 : vector<1x128xf32>
    %193 = math.rsqrt %192 : vector<1x128xf32>
    %194 = arith.mulf %190, %193 : vector<1x128xf32>
    %c0_149 = arith.constant 0 : index
    %c0_150 = arith.constant 0 : index
    %195 = vector.load %arg12[%c0_149, %c0_150] : memref<1x128xf32, #tpu.memory_space<vmem>>, vector<1x128xf32>
    %196 = arith.mulf %183, %194 : vector<1x128xf32>
    %197 = arith.subf %195, %196 : vector<1x128xf32>
    %198 = vector.shape_cast %194 : vector<1x128xf32> to vector<1x128xf32>
    %199 = vector.broadcast %198 : vector<1x128xf32> to vector<40x128xf32>
    %200 = vector.shape_cast %197 : vector<1x128xf32> to vector<1x128xf32>
    %201 = vector.broadcast %200 : vector<1x128xf32> to vector<40x128xf32>
    %c1_151 = arith.constant 1 : index
    %c0_152 = arith.constant 0 : index
    %202 = vector.load %arg18[%c1_151, %c0_152] : memref<96x128xf32, #tpu.memory_space<vmem>>, vector<40x128xf32>
    %203 = arith.mulf %202, %199 : vector<40x128xf32>
    %204 = arith.addf %203, %201 : vector<40x128xf32>
    %cst_153 = arith.constant 0.000000e+00 : f32
    %205 = vector.broadcast %cst_153 : f32 to vector<40x128xf32>
    %206 = arith.cmpf ogt, %204, %205 : vector<40x128xf32>
    %cst_154 = arith.constant 0.00999999977 : f32
    %207 = vector.broadcast %cst_154 : f32 to vector<40x128xf32>
    %208 = arith.mulf %204, %207 : vector<40x128xf32>
    %209 = arith.select %206, %204, %208 : vector<40x128xi1>, vector<40x128xf32>
    %c1_155 = arith.constant 1 : index
    %c0_156 = arith.constant 0 : index
    %210 = vector.load %arg18[%c1_155, %c0_156] : memref<96x128xf32, #tpu.memory_space<vmem>>, vector<40x128xf32>
    tpu.vector_store %arg18[%c1_155, %c0_156], %209 {strides = array<i32>} : memref<96x128xf32, #tpu.memory_space<vmem>>, vector<40x128xf32>,
    %c49_157 = arith.constant 49 : index
    %c0_158 = arith.constant 0 : index
    %211 = vector.load %arg18[%c49_157, %c0_158] : memref<96x128xf32, #tpu.memory_space<vmem>>, vector<40x128xf32>
    %212 = arith.mulf %211, %199 : vector<40x128xf32>
    %213 = arith.addf %212, %201 : vector<40x128xf32>
    %cst_159 = arith.constant 0.000000e+00 : f32
    %214 = vector.broadcast %cst_159 : f32 to vector<40x128xf32>
    %215 = arith.cmpf ogt, %213, %214 : vector<40x128xf32>
    %cst_160 = arith.constant 0.00999999977 : f32
    %216 = vector.broadcast %cst_160 : f32 to vector<40x128xf32>
    %217 = arith.mulf %213, %216 : vector<40x128xf32>
    %218 = arith.select %215, %213, %217 : vector<40x128xi1>, vector<40x128xf32>
    %c49_161 = arith.constant 49 : index
    %c0_162 = arith.constant 0 : index
    %219 = vector.load %arg18[%c49_161, %c0_162] : memref<96x128xf32, #tpu.memory_space<vmem>>, vector<40x128xf32>
    tpu.vector_store %arg18[%c49_161, %c0_162], %218 {strides = array<i32>} : memref<96x128xf32, #tpu.memory_space<vmem>>, vector<40x128xf32>,
    %cst_163 = arith.constant 0.000000e+00 : f32
    %220 = vector.broadcast %cst_163 : f32 to vector<1x128xf32>
    %cst_164 = arith.constant 0.000000e+00 : f32
    %221 = vector.broadcast %cst_164 : f32 to vector<1x128xf32>
    %c0_165 = arith.constant 0 : index
    %c0_166 = arith.constant 0 : index
    %222 = tpu.strided_load %arg18[%c0_165, %c0_166] {strides = array<i32: 2, 1>} : memref<96x128xf32, #tpu.memory_space<vmem>>, vector<20x128xf32>
    %223 = arith.truncf %222 : vector<20x128xf32> to vector<20x128xbf16>
    %c0_167 = arith.constant 0 : index
    %c0_168 = arith.constant 0 : index
    %224 = vector.load %arg4[%c0_167, %c0_168] : memref<512x128xbf16, #tpu.memory_space<vmem>>, vector<128x128xbf16>
    %cst_169 = arith.constant dense<0.000000e+00> : vector<20x128xf32>
    %225 = tpu.matmul %223, %224, %cst_169 {dimension_numbers = #tpu.dot_dimension_numbers<[1], [0], [0], [1], [0, 0, 1, 1], [], []>} : vector<20x128xbf16>, vector<128x128xbf16>, vector<20x128xf32> -> vector<20x128xf32>
    %c1_170 = arith.constant 1 : index
    %c0_171 = arith.constant 0 : index
    %226 = tpu.strided_load %arg18[%c1_170, %c0_171] {strides = array<i32: 2, 1>} : memref<96x128xf32, #tpu.memory_space<vmem>>, vector<20x128xf32>
    %227 = arith.truncf %226 : vector<20x128xf32> to vector<20x128xbf16>
    %c128_172 = arith.constant 128 : index
    %c0_173 = arith.constant 0 : index
    %228 = vector.load %arg4[%c128_172, %c0_173] : memref<512x128xbf16, #tpu.memory_space<vmem>>, vector<128x128xbf16>
    %cst_174 = arith.constant dense<0.000000e+00> : vector<20x128xf32>
    %229 = tpu.matmul %227, %228, %cst_174 {dimension_numbers = #tpu.dot_dimension_numbers<[1], [0], [0], [1], [0, 0, 1, 1], [], []>} : vector<20x128xbf16>, vector<128x128xbf16>, vector<20x128xf32> -> vector<20x128xf32>
    %230 = arith.addf %225, %229 : vector<20x128xf32>
    %c2_175 = arith.constant 2 : index
    %c0_176 = arith.constant 0 : index
    %231 = tpu.strided_load %arg18[%c2_175, %c0_176] {strides = array<i32: 2, 1>} : memref<96x128xf32, #tpu.memory_space<vmem>>, vector<20x128xf32>
    %232 = arith.truncf %231 : vector<20x128xf32> to vector<20x128xbf16>
    %c256_177 = arith.constant 256 : index
    %c0_178 = arith.constant 0 : index
    %233 = vector.load %arg4[%c256_177, %c0_178] : memref<512x128xbf16, #tpu.memory_space<vmem>>, vector<128x128xbf16>
    %cst_179 = arith.constant dense<0.000000e+00> : vector<20x128xf32>
    %234 = tpu.matmul %232, %233, %cst_179 {dimension_numbers = #tpu.dot_dimension_numbers<[1], [0], [0], [1], [0, 0, 1, 1], [], []>} : vector<20x128xbf16>, vector<128x128xbf16>, vector<20x128xf32> -> vector<20x128xf32>
    %235 = arith.addf %230, %234 : vector<20x128xf32>
    %c3_180 = arith.constant 3 : index
    %c0_181 = arith.constant 0 : index
    %236 = tpu.strided_load %arg18[%c3_180, %c0_181] {strides = array<i32: 2, 1>} : memref<96x128xf32, #tpu.memory_space<vmem>>, vector<20x128xf32>
    %237 = arith.truncf %236 : vector<20x128xf32> to vector<20x128xbf16>
    %c384_182 = arith.constant 384 : index
    %c0_183 = arith.constant 0 : index
    %238 = vector.load %arg4[%c384_182, %c0_183] : memref<512x128xbf16, #tpu.memory_space<vmem>>, vector<128x128xbf16>
    %cst_184 = arith.constant dense<0.000000e+00> : vector<20x128xf32>
    %239 = tpu.matmul %237, %238, %cst_184 {dimension_numbers = #tpu.dot_dimension_numbers<[1], [0], [0], [1], [0, 0, 1, 1], [], []>} : vector<20x128xbf16>, vector<128x128xbf16>, vector<20x128xf32> -> vector<20x128xf32>
    %240 = arith.addf %235, %239 : vector<20x128xf32>
    %cst_185 = arith.constant dense<0.000000e+00> : vector<128xf32>
    %241 = vector.multi_reduction <add>, %240, %cst_185 [0] : vector<20x128xf32> to vector<128xf32>
    %242 = vector.shape_cast %241 : vector<128xf32> to vector<1x128xf32>
    %243 = arith.addf %220, %242 : vector<1x128xf32>
    %244 = arith.mulf %240, %240 : vector<20x128xf32>
    %cst_186 = arith.constant dense<0.000000e+00> : vector<128xf32>
    %245 = vector.multi_reduction <add>, %244, %cst_186 [0] : vector<20x128xf32> to vector<128xf32>
    %246 = vector.shape_cast %245 : vector<128xf32> to vector<1x128xf32>
    %247 = arith.addf %221, %246 : vector<1x128xf32>
    %c1_187 = arith.constant 1 : index
    %c0_188 = arith.constant 0 : index
    %248 = vector.load %arg19[%c1_187, %c0_188] : memref<48x128xf32, #tpu.memory_space<vmem>>, vector<20x128xf32>
    tpu.vector_store %arg19[%c1_187, %c0_188], %240 {strides = array<i32>} : memref<48x128xf32, #tpu.memory_space<vmem>>, vector<20x128xf32>,
    %cst_189 = arith.constant 0.000000e+00 : f32
    %249 = vector.broadcast %cst_189 : f32 to vector<1x128xf32>
    %c0_190 = arith.constant 0 : index
    %c0_191 = arith.constant 0 : index
    %250 = vector.load %arg19[%c0_190, %c0_191] : memref<48x128xf32, #tpu.memory_space<vmem>>, vector<1x128xf32>
    tpu.vector_store %arg19[%c0_190, %c0_191], %249 {strides = array<i32>} : memref<48x128xf32, #tpu.memory_space<vmem>>, vector<1x128xf32>,
    %cst_192 = arith.constant 0.000000e+00 : f32
    %251 = vector.broadcast %cst_192 : f32 to vector<3x128xf32>
    %c21 = arith.constant 21 : index
    %c0_193 = arith.constant 0 : index
    %252 = vector.load %arg19[%c21, %c0_193] : memref<48x128xf32, #tpu.memory_space<vmem>>, vector<3x128xf32>
    tpu.vector_store %arg19[%c21, %c0_193], %251 {strides = array<i32>} : memref<48x128xf32, #tpu.memory_space<vmem>>, vector<3x128xf32>,
    %c48_194 = arith.constant 48 : index
    %c0_195 = arith.constant 0 : index
    %253 = tpu.strided_load %arg18[%c48_194, %c0_195] {strides = array<i32: 2, 1>} : memref<96x128xf32, #tpu.memory_space<vmem>>, vector<20x128xf32>
    %254 = arith.truncf %253 : vector<20x128xf32> to vector<20x128xbf16>
    %c0_196 = arith.constant 0 : index
    %c0_197 = arith.constant 0 : index
    %255 = vector.load %arg4[%c0_196, %c0_197] : memref<512x128xbf16, #tpu.memory_space<vmem>>, vector<128x128xbf16>
    %cst_198 = arith.constant dense<0.000000e+00> : vector<20x128xf32>
    %256 = tpu.matmul %254, %255, %cst_198 {dimension_numbers = #tpu.dot_dimension_numbers<[1], [0], [0], [1], [0, 0, 1, 1], [], []>} : vector<20x128xbf16>, vector<128x128xbf16>, vector<20x128xf32> -> vector<20x128xf32>
    %c49_199 = arith.constant 49 : index
    %c0_200 = arith.constant 0 : index
    %257 = tpu.strided_load %arg18[%c49_199, %c0_200] {strides = array<i32: 2, 1>} : memref<96x128xf32, #tpu.memory_space<vmem>>, vector<20x128xf32>
    %258 = arith.truncf %257 : vector<20x128xf32> to vector<20x128xbf16>
    %c128_201 = arith.constant 128 : index
    %c0_202 = arith.constant 0 : index
    %259 = vector.load %arg4[%c128_201, %c0_202] : memref<512x128xbf16, #tpu.memory_space<vmem>>, vector<128x128xbf16>
    %cst_203 = arith.constant dense<0.000000e+00> : vector<20x128xf32>
    %260 = tpu.matmul %258, %259, %cst_203 {dimension_numbers = #tpu.dot_dimension_numbers<[1], [0], [0], [1], [0, 0, 1, 1], [], []>} : vector<20x128xbf16>, vector<128x128xbf16>, vector<20x128xf32> -> vector<20x128xf32>
    %261 = arith.addf %256, %260 : vector<20x128xf32>
    %c50 = arith.constant 50 : index
    %c0_204 = arith.constant 0 : index
    %262 = tpu.strided_load %arg18[%c50, %c0_204] {strides = array<i32: 2, 1>} : memref<96x128xf32, #tpu.memory_space<vmem>>, vector<20x128xf32>
    %263 = arith.truncf %262 : vector<20x128xf32> to vector<20x128xbf16>
    %c256_205 = arith.constant 256 : index
    %c0_206 = arith.constant 0 : index
    %264 = vector.load %arg4[%c256_205, %c0_206] : memref<512x128xbf16, #tpu.memory_space<vmem>>, vector<128x128xbf16>
    %cst_207 = arith.constant dense<0.000000e+00> : vector<20x128xf32>
    %265 = tpu.matmul %263, %264, %cst_207 {dimension_numbers = #tpu.dot_dimension_numbers<[1], [0], [0], [1], [0, 0, 1, 1], [], []>} : vector<20x128xbf16>, vector<128x128xbf16>, vector<20x128xf32> -> vector<20x128xf32>
    %266 = arith.addf %261, %265 : vector<20x128xf32>
    %c51 = arith.constant 51 : index
    %c0_208 = arith.constant 0 : index
    %267 = tpu.strided_load %arg18[%c51, %c0_208] {strides = array<i32: 2, 1>} : memref<96x128xf32, #tpu.memory_space<vmem>>, vector<20x128xf32>
    %268 = arith.truncf %267 : vector<20x128xf32> to vector<20x128xbf16>
    %c384_209 = arith.constant 384 : index
    %c0_210 = arith.constant 0 : index
    %269 = vector.load %arg4[%c384_209, %c0_210] : memref<512x128xbf16, #tpu.memory_space<vmem>>, vector<128x128xbf16>
    %cst_211 = arith.constant dense<0.000000e+00> : vector<20x128xf32>
    %270 = tpu.matmul %268, %269, %cst_211 {dimension_numbers = #tpu.dot_dimension_numbers<[1], [0], [0], [1], [0, 0, 1, 1], [], []>} : vector<20x128xbf16>, vector<128x128xbf16>, vector<20x128xf32> -> vector<20x128xf32>
    %271 = arith.addf %266, %270 : vector<20x128xf32>
    %cst_212 = arith.constant dense<0.000000e+00> : vector<128xf32>
    %272 = vector.multi_reduction <add>, %271, %cst_212 [0] : vector<20x128xf32> to vector<128xf32>
    %273 = vector.shape_cast %272 : vector<128xf32> to vector<1x128xf32>
    %274 = arith.addf %243, %273 : vector<1x128xf32>
    %275 = arith.mulf %271, %271 : vector<20x128xf32>
    %cst_213 = arith.constant dense<0.000000e+00> : vector<128xf32>
    %276 = vector.multi_reduction <add>, %275, %cst_213 [0] : vector<20x128xf32> to vector<128xf32>
    %277 = vector.shape_cast %276 : vector<128xf32> to vector<1x128xf32>
    %278 = arith.addf %247, %277 : vector<1x128xf32>
    %c25 = arith.constant 25 : index
    %c0_214 = arith.constant 0 : index
    %279 = vector.load %arg19[%c25, %c0_214] : memref<48x128xf32, #tpu.memory_space<vmem>>, vector<20x128xf32>
    tpu.vector_store %arg19[%c25, %c0_214], %271 {strides = array<i32>} : memref<48x128xf32, #tpu.memory_space<vmem>>, vector<20x128xf32>,
    %cst_215 = arith.constant 0.000000e+00 : f32
    %280 = vector.broadcast %cst_215 : f32 to vector<1x128xf32>
    %c24 = arith.constant 24 : index
    %c0_216 = arith.constant 0 : index
    %281 = vector.load %arg19[%c24, %c0_216] : memref<48x128xf32, #tpu.memory_space<vmem>>, vector<1x128xf32>
    tpu.vector_store %arg19[%c24, %c0_216], %280 {strides = array<i32>} : memref<48x128xf32, #tpu.memory_space<vmem>>, vector<1x128xf32>,
    %cst_217 = arith.constant 0.000000e+00 : f32
    %282 = vector.broadcast %cst_217 : f32 to vector<3x128xf32>
    %c45 = arith.constant 45 : index
    %c0_218 = arith.constant 0 : index
    %283 = vector.load %arg19[%c45, %c0_218] : memref<48x128xf32, #tpu.memory_space<vmem>>, vector<3x128xf32>
    tpu.vector_store %arg19[%c45, %c0_218], %282 {strides = array<i32>} : memref<48x128xf32, #tpu.memory_space<vmem>>, vector<3x128xf32>,
    %cst_219 = arith.constant 2.500000e-02 : f32
    %284 = vector.broadcast %cst_219 : f32 to vector<1x128xf32>
    %285 = arith.mulf %274, %284 : vector<1x128xf32>
    %cst_220 = arith.constant 2.500000e-02 : f32
    %286 = vector.broadcast %cst_220 : f32 to vector<1x128xf32>
    %287 = arith.mulf %278, %286 : vector<1x128xf32>
    %288 = arith.mulf %285, %285 : vector<1x128xf32>
    %289 = arith.subf %287, %288 : vector<1x128xf32>
    %cst_221 = arith.constant 0.000000e+00 : f32
    %290 = vector.broadcast %cst_221 : f32 to vector<1x128xf32>
    %291 = arith.maximumf %289, %290 : vector<1x128xf32>
    %c0_222 = arith.constant 0 : index
    %c0_223 = arith.constant 0 : index
    %292 = vector.load %arg9[%c0_222, %c0_223] : memref<1x128xf32, #tpu.memory_space<vmem>>, vector<1x128xf32>
    %cst_224 = arith.constant 9.99999974E-6 : f32
    %293 = vector.broadcast %cst_224 : f32 to vector<1x128xf32>
    %294 = arith.addf %291, %293 : vector<1x128xf32>
    %295 = math.rsqrt %294 : vector<1x128xf32>
    %296 = arith.mulf %292, %295 : vector<1x128xf32>
    %c0_225 = arith.constant 0 : index
    %c0_226 = arith.constant 0 : index
    %297 = vector.load %arg13[%c0_225, %c0_226] : memref<1x128xf32, #tpu.memory_space<vmem>>, vector<1x128xf32>
    %298 = arith.mulf %285, %296 : vector<1x128xf32>
    %299 = arith.subf %297, %298 : vector<1x128xf32>
    %300 = vector.shape_cast %296 : vector<1x128xf32> to vector<1x128xf32>
    %301 = vector.broadcast %300 : vector<1x128xf32> to vector<20x128xf32>
    %302 = vector.shape_cast %299 : vector<1x128xf32> to vector<1x128xf32>
    %303 = vector.broadcast %302 : vector<1x128xf32> to vector<20x128xf32>
    %c1_227 = arith.constant 1 : index
    %c0_228 = arith.constant 0 : index
    %304 = vector.load %arg19[%c1_227, %c0_228] : memref<48x128xf32, #tpu.memory_space<vmem>>, vector<20x128xf32>
    %305 = arith.mulf %304, %301 : vector<20x128xf32>
    %306 = arith.addf %305, %303 : vector<20x128xf32>
    %cst_229 = arith.constant 0.000000e+00 : f32
    %307 = vector.broadcast %cst_229 : f32 to vector<20x128xf32>
    %308 = arith.cmpf ogt, %306, %307 : vector<20x128xf32>
    %cst_230 = arith.constant 0.00999999977 : f32
    %309 = vector.broadcast %cst_230 : f32 to vector<20x128xf32>
    %310 = arith.mulf %306, %309 : vector<20x128xf32>
    %311 = arith.select %308, %306, %310 : vector<20x128xi1>, vector<20x128xf32>
    %c1_231 = arith.constant 1 : index
    %c0_232 = arith.constant 0 : index
    %312 = vector.load %arg19[%c1_231, %c0_232] : memref<48x128xf32, #tpu.memory_space<vmem>>, vector<20x128xf32>
    tpu.vector_store %arg19[%c1_231, %c0_232], %311 {strides = array<i32>} : memref<48x128xf32, #tpu.memory_space<vmem>>, vector<20x128xf32>,
    %c25_233 = arith.constant 25 : index
    %c0_234 = arith.constant 0 : index
    %313 = vector.load %arg19[%c25_233, %c0_234] : memref<48x128xf32, #tpu.memory_space<vmem>>, vector<20x128xf32>
    %314 = arith.mulf %313, %301 : vector<20x128xf32>
    %315 = arith.addf %314, %303 : vector<20x128xf32>
    %cst_235 = arith.constant 0.000000e+00 : f32
    %316 = vector.broadcast %cst_235 : f32 to vector<20x128xf32>
    %317 = arith.cmpf ogt, %315, %316 : vector<20x128xf32>
    %cst_236 = arith.constant 0.00999999977 : f32
    %318 = vector.broadcast %cst_236 : f32 to vector<20x128xf32>
    %319 = arith.mulf %315, %318 : vector<20x128xf32>
    %320 = arith.select %317, %315, %319 : vector<20x128xi1>, vector<20x128xf32>
    %c25_237 = arith.constant 25 : index
    %c0_238 = arith.constant 0 : index
    %321 = vector.load %arg19[%c25_237, %c0_238] : memref<48x128xf32, #tpu.memory_space<vmem>>, vector<20x128xf32>
    tpu.vector_store %arg19[%c25_237, %c0_238], %320 {strides = array<i32>} : memref<48x128xf32, #tpu.memory_space<vmem>>, vector<20x128xf32>,
    %cst_239 = arith.constant 0.000000e+00 : f32
    %322 = vector.broadcast %cst_239 : f32 to vector<1x128xf32>
    %cst_240 = arith.constant 0.000000e+00 : f32
    %323 = vector.broadcast %cst_240 : f32 to vector<1x128xf32>
    %c0_241 = arith.constant 0 : index
    %c0_242 = arith.constant 0 : index
    %324 = tpu.strided_load %arg19[%c0_241, %c0_242] {strides = array<i32: 2, 1>} : memref<48x128xf32, #tpu.memory_space<vmem>>, vector<10x128xf32>
    %325 = arith.truncf %324 : vector<10x128xf32> to vector<10x128xbf16>
    %c0_243 = arith.constant 0 : index
    %c0_244 = arith.constant 0 : index
    %326 = vector.load %arg5[%c0_243, %c0_244] : memref<512x128xbf16, #tpu.memory_space<vmem>>, vector<128x128xbf16>
    %cst_245 = arith.constant dense<0.000000e+00> : vector<10x128xf32>
    %327 = tpu.matmul %325, %326, %cst_245 {dimension_numbers = #tpu.dot_dimension_numbers<[1], [0], [0], [1], [0, 0, 1, 1], [], []>} : vector<10x128xbf16>, vector<128x128xbf16>, vector<10x128xf32> -> vector<10x128xf32>
    %c1_246 = arith.constant 1 : index
    %c0_247 = arith.constant 0 : index
    %328 = tpu.strided_load %arg19[%c1_246, %c0_247] {strides = array<i32: 2, 1>} : memref<48x128xf32, #tpu.memory_space<vmem>>, vector<10x128xf32>
    %329 = arith.truncf %328 : vector<10x128xf32> to vector<10x128xbf16>
    %c128_248 = arith.constant 128 : index
    %c0_249 = arith.constant 0 : index
    %330 = vector.load %arg5[%c128_248, %c0_249] : memref<512x128xbf16, #tpu.memory_space<vmem>>, vector<128x128xbf16>
    %cst_250 = arith.constant dense<0.000000e+00> : vector<10x128xf32>
    %331 = tpu.matmul %329, %330, %cst_250 {dimension_numbers = #tpu.dot_dimension_numbers<[1], [0], [0], [1], [0, 0, 1, 1], [], []>} : vector<10x128xbf16>, vector<128x128xbf16>, vector<10x128xf32> -> vector<10x128xf32>
    %332 = arith.addf %327, %331 : vector<10x128xf32>
    %c2_251 = arith.constant 2 : index
    %c0_252 = arith.constant 0 : index
    %333 = tpu.strided_load %arg19[%c2_251, %c0_252] {strides = array<i32: 2, 1>} : memref<48x128xf32, #tpu.memory_space<vmem>>, vector<10x128xf32>
    %334 = arith.truncf %333 : vector<10x128xf32> to vector<10x128xbf16>
    %c256_253 = arith.constant 256 : index
    %c0_254 = arith.constant 0 : index
    %335 = vector.load %arg5[%c256_253, %c0_254] : memref<512x128xbf16, #tpu.memory_space<vmem>>, vector<128x128xbf16>
    %cst_255 = arith.constant dense<0.000000e+00> : vector<10x128xf32>
    %336 = tpu.matmul %334, %335, %cst_255 {dimension_numbers = #tpu.dot_dimension_numbers<[1], [0], [0], [1], [0, 0, 1, 1], [], []>} : vector<10x128xbf16>, vector<128x128xbf16>, vector<10x128xf32> -> vector<10x128xf32>
    %337 = arith.addf %332, %336 : vector<10x128xf32>
    %c3_256 = arith.constant 3 : index
    %c0_257 = arith.constant 0 : index
    %338 = tpu.strided_load %arg19[%c3_256, %c0_257] {strides = array<i32: 2, 1>} : memref<48x128xf32, #tpu.memory_space<vmem>>, vector<10x128xf32>
    %339 = arith.truncf %338 : vector<10x128xf32> to vector<10x128xbf16>
    %c384_258 = arith.constant 384 : index
    %c0_259 = arith.constant 0 : index
    %340 = vector.load %arg5[%c384_258, %c0_259] : memref<512x128xbf16, #tpu.memory_space<vmem>>, vector<128x128xbf16>
    %cst_260 = arith.constant dense<0.000000e+00> : vector<10x128xf32>
    %341 = tpu.matmul %339, %340, %cst_260 {dimension_numbers = #tpu.dot_dimension_numbers<[1], [0], [0], [1], [0, 0, 1, 1], [], []>} : vector<10x128xbf16>, vector<128x128xbf16>, vector<10x128xf32> -> vector<10x128xf32>
    %342 = arith.addf %337, %341 : vector<10x128xf32>
    %cst_261 = arith.constant dense<0.000000e+00> : vector<128xf32>
    %343 = vector.multi_reduction <add>, %342, %cst_261 [0] : vector<10x128xf32> to vector<128xf32>
    %344 = vector.shape_cast %343 : vector<128xf32> to vector<1x128xf32>
    %345 = arith.addf %322, %344 : vector<1x128xf32>
    %346 = arith.mulf %342, %342 : vector<10x128xf32>
    %cst_262 = arith.constant dense<0.000000e+00> : vector<128xf32>
    %347 = vector.multi_reduction <add>, %346, %cst_262 [0] : vector<10x128xf32> to vector<128xf32>
    %348 = vector.shape_cast %347 : vector<128xf32> to vector<1x128xf32>
    %349 = arith.addf %323, %348 : vector<1x128xf32>
    %350 = arith.truncf %342 : vector<10x128xf32> to vector<10x128xbf16>
    %c1_263 = arith.constant 1 : index
    %c0_264 = arith.constant 0 : index
    %351 = vector.load %arg20[%c1_263, %c0_264] : memref<32x128xbf16, #tpu.memory_space<vmem>>, vector<10x128xbf16>
    tpu.vector_store %arg20[%c1_263, %c0_264], %350 {strides = array<i32>} : memref<32x128xbf16, #tpu.memory_space<vmem>>, vector<10x128xbf16>,
    %cst_265 = arith.constant 0.000000e+00 : bf16
    %352 = vector.broadcast %cst_265 : bf16 to vector<1x128xbf16>
    %c0_266 = arith.constant 0 : index
    %c0_267 = arith.constant 0 : index
    %353 = vector.load %arg20[%c0_266, %c0_267] : memref<32x128xbf16, #tpu.memory_space<vmem>>, vector<1x128xbf16>
    tpu.vector_store %arg20[%c0_266, %c0_267], %352 {strides = array<i32>} : memref<32x128xbf16, #tpu.memory_space<vmem>>, vector<1x128xbf16>,
    %cst_268 = arith.constant 0.000000e+00 : bf16
    %354 = vector.broadcast %cst_268 : bf16 to vector<5x128xbf16>
    %c11 = arith.constant 11 : index
    %c0_269 = arith.constant 0 : index
    %355 = vector.load %arg20[%c11, %c0_269] : memref<32x128xbf16, #tpu.memory_space<vmem>>, vector<5x128xbf16>
    tpu.vector_store %arg20[%c11, %c0_269], %354 {strides = array<i32>} : memref<32x128xbf16, #tpu.memory_space<vmem>>, vector<5x128xbf16>,
    %c24_270 = arith.constant 24 : index
    %c0_271 = arith.constant 0 : index
    %356 = tpu.strided_load %arg19[%c24_270, %c0_271] {strides = array<i32: 2, 1>} : memref<48x128xf32, #tpu.memory_space<vmem>>, vector<10x128xf32>
    %357 = arith.truncf %356 : vector<10x128xf32> to vector<10x128xbf16>
    %c0_272 = arith.constant 0 : index
    %c0_273 = arith.constant 0 : index
    %358 = vector.load %arg5[%c0_272, %c0_273] : memref<512x128xbf16, #tpu.memory_space<vmem>>, vector<128x128xbf16>
    %cst_274 = arith.constant dense<0.000000e+00> : vector<10x128xf32>
    %359 = tpu.matmul %357, %358, %cst_274 {dimension_numbers = #tpu.dot_dimension_numbers<[1], [0], [0], [1], [0, 0, 1, 1], [], []>} : vector<10x128xbf16>, vector<128x128xbf16>, vector<10x128xf32> -> vector<10x128xf32>
    %c25_275 = arith.constant 25 : index
    %c0_276 = arith.constant 0 : index
    %360 = tpu.strided_load %arg19[%c25_275, %c0_276] {strides = array<i32: 2, 1>} : memref<48x128xf32, #tpu.memory_space<vmem>>, vector<10x128xf32>
    %361 = arith.truncf %360 : vector<10x128xf32> to vector<10x128xbf16>
    %c128_277 = arith.constant 128 : index
    %c0_278 = arith.constant 0 : index
    %362 = vector.load %arg5[%c128_277, %c0_278] : memref<512x128xbf16, #tpu.memory_space<vmem>>, vector<128x128xbf16>
    %cst_279 = arith.constant dense<0.000000e+00> : vector<10x128xf32>
    %363 = tpu.matmul %361, %362, %cst_279 {dimension_numbers = #tpu.dot_dimension_numbers<[1], [0], [0], [1], [0, 0, 1, 1], [], []>} : vector<10x128xbf16>, vector<128x128xbf16>, vector<10x128xf32> -> vector<10x128xf32>
    %364 = arith.addf %359, %363 : vector<10x128xf32>
    %c26 = arith.constant 26 : index
    %c0_280 = arith.constant 0 : index
    %365 = tpu.strided_load %arg19[%c26, %c0_280] {strides = array<i32: 2, 1>} : memref<48x128xf32, #tpu.memory_space<vmem>>, vector<10x128xf32>
    %366 = arith.truncf %365 : vector<10x128xf32> to vector<10x128xbf16>
    %c256_281 = arith.constant 256 : index
    %c0_282 = arith.constant 0 : index
    %367 = vector.load %arg5[%c256_281, %c0_282] : memref<512x128xbf16, #tpu.memory_space<vmem>>, vector<128x128xbf16>
    %cst_283 = arith.constant dense<0.000000e+00> : vector<10x128xf32>
    %368 = tpu.matmul %366, %367, %cst_283 {dimension_numbers = #tpu.dot_dimension_numbers<[1], [0], [0], [1], [0, 0, 1, 1], [], []>} : vector<10x128xbf16>, vector<128x128xbf16>, vector<10x128xf32> -> vector<10x128xf32>
    %369 = arith.addf %364, %368 : vector<10x128xf32>
    %c27 = arith.constant 27 : index
    %c0_284 = arith.constant 0 : index
    %370 = tpu.strided_load %arg19[%c27, %c0_284] {strides = array<i32: 2, 1>} : memref<48x128xf32, #tpu.memory_space<vmem>>, vector<10x128xf32>
    %371 = arith.truncf %370 : vector<10x128xf32> to vector<10x128xbf16>
    %c384_285 = arith.constant 384 : index
    %c0_286 = arith.constant 0 : index
    %372 = vector.load %arg5[%c384_285, %c0_286] : memref<512x128xbf16, #tpu.memory_space<vmem>>, vector<128x128xbf16>
    %cst_287 = arith.constant dense<0.000000e+00> : vector<10x128xf32>
    %373 = tpu.matmul %371, %372, %cst_287 {dimension_numbers = #tpu.dot_dimension_numbers<[1], [0], [0], [1], [0, 0, 1, 1], [], []>} : vector<10x128xbf16>, vector<128x128xbf16>, vector<10x128xf32> -> vector<10x128xf32>
    %374 = arith.addf %369, %373 : vector<10x128xf32>
    %cst_288 = arith.constant dense<0.000000e+00> : vector<128xf32>
    %375 = vector.multi_reduction <add>, %374, %cst_288 [0] : vector<10x128xf32> to vector<128xf32>
    %376 = vector.shape_cast %375 : vector<128xf32> to vector<1x128xf32>
    %377 = arith.addf %345, %376 : vector<1x128xf32>
    %378 = arith.mulf %374, %374 : vector<10x128xf32>
    %cst_289 = arith.constant dense<0.000000e+00> : vector<128xf32>
    %379 = vector.multi_reduction <add>, %378, %cst_289 [0] : vector<10x128xf32> to vector<128xf32>
    %380 = vector.shape_cast %379 : vector<128xf32> to vector<1x128xf32>
    %381 = arith.addf %349, %380 : vector<1x128xf32>
    %382 = arith.truncf %374 : vector<10x128xf32> to vector<10x128xbf16>
    %c17 = arith.constant 17 : index
    %c0_290 = arith.constant 0 : index
    %383 = vector.load %arg20[%c17, %c0_290] : memref<32x128xbf16, #tpu.memory_space<vmem>>, vector<10x128xbf16>
    tpu.vector_store %arg20[%c17, %c0_290], %382 {strides = array<i32>} : memref<32x128xbf16, #tpu.memory_space<vmem>>, vector<10x128xbf16>,
    %cst_291 = arith.constant 0.000000e+00 : bf16
    %384 = vector.broadcast %cst_291 : bf16 to vector<1x128xbf16>
    %c16 = arith.constant 16 : index
    %c0_292 = arith.constant 0 : index
    %385 = vector.load %arg20[%c16, %c0_292] : memref<32x128xbf16, #tpu.memory_space<vmem>>, vector<1x128xbf16>
    tpu.vector_store %arg20[%c16, %c0_292], %384 {strides = array<i32>} : memref<32x128xbf16, #tpu.memory_space<vmem>>, vector<1x128xbf16>,
    %cst_293 = arith.constant 0.000000e+00 : bf16
    %386 = vector.broadcast %cst_293 : bf16 to vector<5x128xbf16>
    %c27_294 = arith.constant 27 : index
    %c0_295 = arith.constant 0 : index
    %387 = vector.load %arg20[%c27_294, %c0_295] : memref<32x128xbf16, #tpu.memory_space<vmem>>, vector<5x128xbf16>
    tpu.vector_store %arg20[%c27_294, %c0_295], %386 {strides = array<i32>} : memref<32x128xbf16, #tpu.memory_space<vmem>>, vector<5x128xbf16>,
    %cst_296 = arith.constant 5.000000e-02 : f32
    %388 = vector.broadcast %cst_296 : f32 to vector<1x128xf32>
    %389 = arith.mulf %377, %388 : vector<1x128xf32>
    %cst_297 = arith.constant 5.000000e-02 : f32
    %390 = vector.broadcast %cst_297 : f32 to vector<1x128xf32>
    %391 = arith.mulf %381, %390 : vector<1x128xf32>
    %392 = arith.mulf %389, %389 : vector<1x128xf32>
    %393 = arith.subf %391, %392 : vector<1x128xf32>
    %cst_298 = arith.constant 0.000000e+00 : f32
    %394 = vector.broadcast %cst_298 : f32 to vector<1x128xf32>
    %395 = arith.maximumf %393, %394 : vector<1x128xf32>
    %c0_299 = arith.constant 0 : index
    %c0_300 = arith.constant 0 : index
    %396 = vector.load %arg10[%c0_299, %c0_300] : memref<1x128xf32, #tpu.memory_space<vmem>>, vector<1x128xf32>
    %cst_301 = arith.constant 9.99999974E-6 : f32
    %397 = vector.broadcast %cst_301 : f32 to vector<1x128xf32>
    %398 = arith.addf %395, %397 : vector<1x128xf32>
    %399 = math.rsqrt %398 : vector<1x128xf32>
    %400 = arith.mulf %396, %399 : vector<1x128xf32>
    %c0_302 = arith.constant 0 : index
    %c0_303 = arith.constant 0 : index
    %401 = vector.load %arg14[%c0_302, %c0_303] : memref<1x128xf32, #tpu.memory_space<vmem>>, vector<1x128xf32>
    %402 = arith.mulf %389, %400 : vector<1x128xf32>
    %403 = arith.subf %401, %402 : vector<1x128xf32>
    %404 = vector.shape_cast %400 : vector<1x128xf32> to vector<1x128xf32>
    %405 = vector.broadcast %404 : vector<1x128xf32> to vector<10x128xf32>
    %406 = vector.shape_cast %403 : vector<1x128xf32> to vector<1x128xf32>
    %407 = vector.broadcast %406 : vector<1x128xf32> to vector<10x128xf32>
    %c1_304 = arith.constant 1 : index
    %c0_305 = arith.constant 0 : index
    %408 = vector.load %arg20[%c1_304, %c0_305] : memref<32x128xbf16, #tpu.memory_space<vmem>>, vector<10x128xbf16>
    %409 = arith.extf %408 : vector<10x128xbf16> to vector<10x128xf32>
    %410 = arith.mulf %409, %405 : vector<10x128xf32>
    %411 = arith.addf %410, %407 : vector<10x128xf32>
    %cst_306 = arith.constant 0.000000e+00 : f32
    %412 = vector.broadcast %cst_306 : f32 to vector<10x128xf32>
    %413 = arith.cmpf ogt, %411, %412 : vector<10x128xf32>
    %cst_307 = arith.constant 0.00999999977 : f32
    %414 = vector.broadcast %cst_307 : f32 to vector<10x128xf32>
    %415 = arith.mulf %411, %414 : vector<10x128xf32>
    %416 = arith.select %413, %411, %415 : vector<10x128xi1>, vector<10x128xf32>
    %417 = arith.truncf %416 : vector<10x128xf32> to vector<10x128xbf16>
    %c1_308 = arith.constant 1 : index
    %c0_309 = arith.constant 0 : index
    %418 = vector.load %arg20[%c1_308, %c0_309] : memref<32x128xbf16, #tpu.memory_space<vmem>>, vector<10x128xbf16>
    tpu.vector_store %arg20[%c1_308, %c0_309], %417 {strides = array<i32>} : memref<32x128xbf16, #tpu.memory_space<vmem>>, vector<10x128xbf16>,
    %c17_310 = arith.constant 17 : index
    %c0_311 = arith.constant 0 : index
    %419 = vector.load %arg20[%c17_310, %c0_311] : memref<32x128xbf16, #tpu.memory_space<vmem>>, vector<10x128xbf16>
    %420 = arith.extf %419 : vector<10x128xbf16> to vector<10x128xf32>
    %421 = arith.mulf %420, %405 : vector<10x128xf32>
    %422 = arith.addf %421, %407 : vector<10x128xf32>
    %cst_312 = arith.constant 0.000000e+00 : f32
    %423 = vector.broadcast %cst_312 : f32 to vector<10x128xf32>
    %424 = arith.cmpf ogt, %422, %423 : vector<10x128xf32>
    %cst_313 = arith.constant 0.00999999977 : f32
    %425 = vector.broadcast %cst_313 : f32 to vector<10x128xf32>
    %426 = arith.mulf %422, %425 : vector<10x128xf32>
    %427 = arith.select %424, %422, %426 : vector<10x128xi1>, vector<10x128xf32>
    %428 = arith.truncf %427 : vector<10x128xf32> to vector<10x128xbf16>
    %c17_314 = arith.constant 17 : index
    %c0_315 = arith.constant 0 : index
    %429 = vector.load %arg20[%c17_314, %c0_315] : memref<32x128xbf16, #tpu.memory_space<vmem>>, vector<10x128xbf16>
    tpu.vector_store %arg20[%c17_314, %c0_315], %428 {strides = array<i32>} : memref<32x128xbf16, #tpu.memory_space<vmem>>, vector<10x128xbf16>,
    %c0_316 = arith.constant 0 : index
    %c0_317 = arith.constant 0 : index
    %430 = vector.load %arg15[%c0_316, %c0_317] : memref<1x128xf32, #tpu.memory_space<vmem>>, vector<1x128xf32>
    %c1_318 = arith.constant 1 : index
    %c0_319 = arith.constant 0 : index
    %431 = vector.load %arg20[%c1_318, %c0_319] : memref<32x128xbf16, #tpu.memory_space<vmem>>, vector<1x128xbf16>
    %c0_320 = arith.constant 0 : index
    %c0_321 = arith.constant 0 : index
    %432 = vector.load %arg6[%c0_320, %c0_321] : memref<1280x128xbf16, #tpu.memory_space<vmem>>, vector<128x128xbf16>
    %cst_322 = arith.constant dense<0.000000e+00> : vector<1x128xf32>
    %433 = tpu.matmul %431, %432, %cst_322 {dimension_numbers = #tpu.dot_dimension_numbers<[1], [0], [0], [1], [0, 0, 1, 1], [], []>} : vector<1x128xbf16>, vector<128x128xbf16>, vector<1x128xf32> -> vector<1x128xf32>
    %c2_323 = arith.constant 2 : index
    %c0_324 = arith.constant 0 : index
    %434 = vector.load %arg20[%c2_323, %c0_324] : memref<32x128xbf16, #tpu.memory_space<vmem>>, vector<1x128xbf16>
    %c128_325 = arith.constant 128 : index
    %c0_326 = arith.constant 0 : index
    %435 = vector.load %arg6[%c128_325, %c0_326] : memref<1280x128xbf16, #tpu.memory_space<vmem>>, vector<128x128xbf16>
    %cst_327 = arith.constant dense<0.000000e+00> : vector<1x128xf32>
    %436 = tpu.matmul %434, %435, %cst_327 {dimension_numbers = #tpu.dot_dimension_numbers<[1], [0], [0], [1], [0, 0, 1, 1], [], []>} : vector<1x128xbf16>, vector<128x128xbf16>, vector<1x128xf32> -> vector<1x128xf32>
    %437 = arith.addf %433, %436 : vector<1x128xf32>
    %c3_328 = arith.constant 3 : index
    %c0_329 = arith.constant 0 : index
    %438 = vector.load %arg20[%c3_328, %c0_329] : memref<32x128xbf16, #tpu.memory_space<vmem>>, vector<1x128xbf16>
    %c256_330 = arith.constant 256 : index
    %c0_331 = arith.constant 0 : index
    %439 = vector.load %arg6[%c256_330, %c0_331] : memref<1280x128xbf16, #tpu.memory_space<vmem>>, vector<128x128xbf16>
    %cst_332 = arith.constant dense<0.000000e+00> : vector<1x128xf32>
    %440 = tpu.matmul %438, %439, %cst_332 {dimension_numbers = #tpu.dot_dimension_numbers<[1], [0], [0], [1], [0, 0, 1, 1], [], []>} : vector<1x128xbf16>, vector<128x128xbf16>, vector<1x128xf32> -> vector<1x128xf32>
    %441 = arith.addf %437, %440 : vector<1x128xf32>
    %c4_333 = arith.constant 4 : index
    %c0_334 = arith.constant 0 : index
    %442 = vector.load %arg20[%c4_333, %c0_334] : memref<32x128xbf16, #tpu.memory_space<vmem>>, vector<1x128xbf16>
    %c384_335 = arith.constant 384 : index
    %c0_336 = arith.constant 0 : index
    %443 = vector.load %arg6[%c384_335, %c0_336] : memref<1280x128xbf16, #tpu.memory_space<vmem>>, vector<128x128xbf16>
    %cst_337 = arith.constant dense<0.000000e+00> : vector<1x128xf32>
    %444 = tpu.matmul %442, %443, %cst_337 {dimension_numbers = #tpu.dot_dimension_numbers<[1], [0], [0], [1], [0, 0, 1, 1], [], []>} : vector<1x128xbf16>, vector<128x128xbf16>, vector<1x128xf32> -> vector<1x128xf32>
    %445 = arith.addf %441, %444 : vector<1x128xf32>
    %c5_338 = arith.constant 5 : index
    %c0_339 = arith.constant 0 : index
    %446 = vector.load %arg20[%c5_338, %c0_339] : memref<32x128xbf16, #tpu.memory_space<vmem>>, vector<1x128xbf16>
    %c512_340 = arith.constant 512 : index
    %c0_341 = arith.constant 0 : index
    %447 = vector.load %arg6[%c512_340, %c0_341] : memref<1280x128xbf16, #tpu.memory_space<vmem>>, vector<128x128xbf16>
    %cst_342 = arith.constant dense<0.000000e+00> : vector<1x128xf32>
    %448 = tpu.matmul %446, %447, %cst_342 {dimension_numbers = #tpu.dot_dimension_numbers<[1], [0], [0], [1], [0, 0, 1, 1], [], []>} : vector<1x128xbf16>, vector<128x128xbf16>, vector<1x128xf32> -> vector<1x128xf32>
    %449 = arith.addf %445, %448 : vector<1x128xf32>
    %c6_343 = arith.constant 6 : index
    %c0_344 = arith.constant 0 : index
    %450 = vector.load %arg20[%c6_343, %c0_344] : memref<32x128xbf16, #tpu.memory_space<vmem>>, vector<1x128xbf16>
    %c640_345 = arith.constant 640 : index
    %c0_346 = arith.constant 0 : index
    %451 = vector.load %arg6[%c640_345, %c0_346] : memref<1280x128xbf16, #tpu.memory_space<vmem>>, vector<128x128xbf16>
    %cst_347 = arith.constant dense<0.000000e+00> : vector<1x128xf32>
    %452 = tpu.matmul %450, %451, %cst_347 {dimension_numbers = #tpu.dot_dimension_numbers<[1], [0], [0], [1], [0, 0, 1, 1], [], []>} : vector<1x128xbf16>, vector<128x128xbf16>, vector<1x128xf32> -> vector<1x128xf32>
    %453 = arith.addf %449, %452 : vector<1x128xf32>
    %c7_348 = arith.constant 7 : index
    %c0_349 = arith.constant 0 : index
    %454 = vector.load %arg20[%c7_348, %c0_349] : memref<32x128xbf16, #tpu.memory_space<vmem>>, vector<1x128xbf16>
    %c768_350 = arith.constant 768 : index
    %c0_351 = arith.constant 0 : index
    %455 = vector.load %arg6[%c768_350, %c0_351] : memref<1280x128xbf16, #tpu.memory_space<vmem>>, vector<128x128xbf16>
    %cst_352 = arith.constant dense<0.000000e+00> : vector<1x128xf32>
    %456 = tpu.matmul %454, %455, %cst_352 {dimension_numbers = #tpu.dot_dimension_numbers<[1], [0], [0], [1], [0, 0, 1, 1], [], []>} : vector<1x128xbf16>, vector<128x128xbf16>, vector<1x128xf32> -> vector<1x128xf32>
    %457 = arith.addf %453, %456 : vector<1x128xf32>
    %c8 = arith.constant 8 : index
    %c0_353 = arith.constant 0 : index
    %458 = vector.load %arg20[%c8, %c0_353] : memref<32x128xbf16, #tpu.memory_space<vmem>>, vector<1x128xbf16>
    %c896 = arith.constant 896 : index
    %c0_354 = arith.constant 0 : index
    %459 = vector.load %arg6[%c896, %c0_354] : memref<1280x128xbf16, #tpu.memory_space<vmem>>, vector<128x128xbf16>
    %cst_355 = arith.constant dense<0.000000e+00> : vector<1x128xf32>
    %460 = tpu.matmul %458, %459, %cst_355 {dimension_numbers = #tpu.dot_dimension_numbers<[1], [0], [0], [1], [0, 0, 1, 1], [], []>} : vector<1x128xbf16>, vector<128x128xbf16>, vector<1x128xf32> -> vector<1x128xf32>
    %461 = arith.addf %457, %460 : vector<1x128xf32>
    %c9 = arith.constant 9 : index
    %c0_356 = arith.constant 0 : index
    %462 = vector.load %arg20[%c9, %c0_356] : memref<32x128xbf16, #tpu.memory_space<vmem>>, vector<1x128xbf16>
    %c1024 = arith.constant 1024 : index
    %c0_357 = arith.constant 0 : index
    %463 = vector.load %arg6[%c1024, %c0_357] : memref<1280x128xbf16, #tpu.memory_space<vmem>>, vector<128x128xbf16>
    %cst_358 = arith.constant dense<0.000000e+00> : vector<1x128xf32>
    %464 = tpu.matmul %462, %463, %cst_358 {dimension_numbers = #tpu.dot_dimension_numbers<[1], [0], [0], [1], [0, 0, 1, 1], [], []>} : vector<1x128xbf16>, vector<128x128xbf16>, vector<1x128xf32> -> vector<1x128xf32>
    %465 = arith.addf %461, %464 : vector<1x128xf32>
    %c10 = arith.constant 10 : index
    %c0_359 = arith.constant 0 : index
    %466 = vector.load %arg20[%c10, %c0_359] : memref<32x128xbf16, #tpu.memory_space<vmem>>, vector<1x128xbf16>
    %c1152 = arith.constant 1152 : index
    %c0_360 = arith.constant 0 : index
    %467 = vector.load %arg6[%c1152, %c0_360] : memref<1280x128xbf16, #tpu.memory_space<vmem>>, vector<128x128xbf16>
    %cst_361 = arith.constant dense<0.000000e+00> : vector<1x128xf32>
    %468 = tpu.matmul %466, %467, %cst_361 {dimension_numbers = #tpu.dot_dimension_numbers<[1], [0], [0], [1], [0, 0, 1, 1], [], []>} : vector<1x128xbf16>, vector<128x128xbf16>, vector<1x128xf32> -> vector<1x128xf32>
    %469 = arith.addf %465, %468 : vector<1x128xf32>
    %470 = arith.addf %469, %430 : vector<1x128xf32>
    %c0_362 = arith.constant 0 : index
    %c0_363 = arith.constant 0 : index
    %471 = vector.load %arg16[%c0_362, %c0_363] : memref<2x128xf32, #tpu.memory_space<vmem>>, vector<1x128xf32>
    tpu.vector_store %arg16[%c0_362, %c0_363], %470 {strides = array<i32>} : memref<2x128xf32, #tpu.memory_space<vmem>>, vector<1x128xf32>,
    %c17_364 = arith.constant 17 : index
    %c0_365 = arith.constant 0 : index
    %472 = vector.load %arg20[%c17_364, %c0_365] : memref<32x128xbf16, #tpu.memory_space<vmem>>, vector<1x128xbf16>
    %c0_366 = arith.constant 0 : index
    %c0_367 = arith.constant 0 : index
    %473 = vector.load %arg6[%c0_366, %c0_367] : memref<1280x128xbf16, #tpu.memory_space<vmem>>, vector<128x128xbf16>
    %cst_368 = arith.constant dense<0.000000e+00> : vector<1x128xf32>
    %474 = tpu.matmul %472, %473, %cst_368 {dimension_numbers = #tpu.dot_dimension_numbers<[1], [0], [0], [1], [0, 0, 1, 1], [], []>} : vector<1x128xbf16>, vector<128x128xbf16>, vector<1x128xf32> -> vector<1x128xf32>
    %c18 = arith.constant 18 : index
    %c0_369 = arith.constant 0 : index
    %475 = vector.load %arg20[%c18, %c0_369] : memref<32x128xbf16, #tpu.memory_space<vmem>>, vector<1x128xbf16>
    %c128_370 = arith.constant 128 : index
    %c0_371 = arith.constant 0 : index
    %476 = vector.load %arg6[%c128_370, %c0_371] : memref<1280x128xbf16, #tpu.memory_space<vmem>>, vector<128x128xbf16>
    %cst_372 = arith.constant dense<0.000000e+00> : vector<1x128xf32>
    %477 = tpu.matmul %475, %476, %cst_372 {dimension_numbers = #tpu.dot_dimension_numbers<[1], [0], [0], [1], [0, 0, 1, 1], [], []>} : vector<1x128xbf16>, vector<128x128xbf16>, vector<1x128xf32> -> vector<1x128xf32>
    %478 = arith.addf %474, %477 : vector<1x128xf32>
    %c19 = arith.constant 19 : index
    %c0_373 = arith.constant 0 : index
    %479 = vector.load %arg20[%c19, %c0_373] : memref<32x128xbf16, #tpu.memory_space<vmem>>, vector<1x128xbf16>
    %c256_374 = arith.constant 256 : index
    %c0_375 = arith.constant 0 : index
    %480 = vector.load %arg6[%c256_374, %c0_375] : memref<1280x128xbf16, #tpu.memory_space<vmem>>, vector<128x128xbf16>
    %cst_376 = arith.constant dense<0.000000e+00> : vector<1x128xf32>
    %481 = tpu.matmul %479, %480, %cst_376 {dimension_numbers = #tpu.dot_dimension_numbers<[1], [0], [0], [1], [0, 0, 1, 1], [], []>} : vector<1x128xbf16>, vector<128x128xbf16>, vector<1x128xf32> -> vector<1x128xf32>
    %482 = arith.addf %478, %481 : vector<1x128xf32>
    %c20 = arith.constant 20 : index
    %c0_377 = arith.constant 0 : index
    %483 = vector.load %arg20[%c20, %c0_377] : memref<32x128xbf16, #tpu.memory_space<vmem>>, vector<1x128xbf16>
    %c384_378 = arith.constant 384 : index
    %c0_379 = arith.constant 0 : index
    %484 = vector.load %arg6[%c384_378, %c0_379] : memref<1280x128xbf16, #tpu.memory_space<vmem>>, vector<128x128xbf16>
    %cst_380 = arith.constant dense<0.000000e+00> : vector<1x128xf32>
    %485 = tpu.matmul %483, %484, %cst_380 {dimension_numbers = #tpu.dot_dimension_numbers<[1], [0], [0], [1], [0, 0, 1, 1], [], []>} : vector<1x128xbf16>, vector<128x128xbf16>, vector<1x128xf32> -> vector<1x128xf32>
    %486 = arith.addf %482, %485 : vector<1x128xf32>
    %c21_381 = arith.constant 21 : index
    %c0_382 = arith.constant 0 : index
    %487 = vector.load %arg20[%c21_381, %c0_382] : memref<32x128xbf16, #tpu.memory_space<vmem>>, vector<1x128xbf16>
    %c512_383 = arith.constant 512 : index
    %c0_384 = arith.constant 0 : index
    %488 = vector.load %arg6[%c512_383, %c0_384] : memref<1280x128xbf16, #tpu.memory_space<vmem>>, vector<128x128xbf16>
    %cst_385 = arith.constant dense<0.000000e+00> : vector<1x128xf32>
    %489 = tpu.matmul %487, %488, %cst_385 {dimension_numbers = #tpu.dot_dimension_numbers<[1], [0], [0], [1], [0, 0, 1, 1], [], []>} : vector<1x128xbf16>, vector<128x128xbf16>, vector<1x128xf32> -> vector<1x128xf32>
    %490 = arith.addf %486, %489 : vector<1x128xf32>
    %c22 = arith.constant 22 : index
    %c0_386 = arith.constant 0 : index
    %491 = vector.load %arg20[%c22, %c0_386] : memref<32x128xbf16, #tpu.memory_space<vmem>>, vector<1x128xbf16>
    %c640_387 = arith.constant 640 : index
    %c0_388 = arith.constant 0 : index
    %492 = vector.load %arg6[%c640_387, %c0_388] : memref<1280x128xbf16, #tpu.memory_space<vmem>>, vector<128x128xbf16>
    %cst_389 = arith.constant dense<0.000000e+00> : vector<1x128xf32>
    %493 = tpu.matmul %491, %492, %cst_389 {dimension_numbers = #tpu.dot_dimension_numbers<[1], [0], [0], [1], [0, 0, 1, 1], [], []>} : vector<1x128xbf16>, vector<128x128xbf16>, vector<1x128xf32> -> vector<1x128xf32>
    %494 = arith.addf %490, %493 : vector<1x128xf32>
    %c23 = arith.constant 23 : index
    %c0_390 = arith.constant 0 : index
    %495 = vector.load %arg20[%c23, %c0_390] : memref<32x128xbf16, #tpu.memory_space<vmem>>, vector<1x128xbf16>
    %c768_391 = arith.constant 768 : index
    %c0_392 = arith.constant 0 : index
    %496 = vector.load %arg6[%c768_391, %c0_392] : memref<1280x128xbf16, #tpu.memory_space<vmem>>, vector<128x128xbf16>
    %cst_393 = arith.constant dense<0.000000e+00> : vector<1x128xf32>
    %497 = tpu.matmul %495, %496, %cst_393 {dimension_numbers = #tpu.dot_dimension_numbers<[1], [0], [0], [1], [0, 0, 1, 1], [], []>} : vector<1x128xbf16>, vector<128x128xbf16>, vector<1x128xf32> -> vector<1x128xf32>
    %498 = arith.addf %494, %497 : vector<1x128xf32>
    %c24_394 = arith.constant 24 : index
    %c0_395 = arith.constant 0 : index
    %499 = vector.load %arg20[%c24_394, %c0_395] : memref<32x128xbf16, #tpu.memory_space<vmem>>, vector<1x128xbf16>
    %c896_396 = arith.constant 896 : index
    %c0_397 = arith.constant 0 : index
    %500 = vector.load %arg6[%c896_396, %c0_397] : memref<1280x128xbf16, #tpu.memory_space<vmem>>, vector<128x128xbf16>
    %cst_398 = arith.constant dense<0.000000e+00> : vector<1x128xf32>
    %501 = tpu.matmul %499, %500, %cst_398 {dimension_numbers = #tpu.dot_dimension_numbers<[1], [0], [0], [1], [0, 0, 1, 1], [], []>} : vector<1x128xbf16>, vector<128x128xbf16>, vector<1x128xf32> -> vector<1x128xf32>
    %502 = arith.addf %498, %501 : vector<1x128xf32>
    %c25_399 = arith.constant 25 : index
    %c0_400 = arith.constant 0 : index
    %503 = vector.load %arg20[%c25_399, %c0_400] : memref<32x128xbf16, #tpu.memory_space<vmem>>, vector<1x128xbf16>
    %c1024_401 = arith.constant 1024 : index
    %c0_402 = arith.constant 0 : index
    %504 = vector.load %arg6[%c1024_401, %c0_402] : memref<1280x128xbf16, #tpu.memory_space<vmem>>, vector<128x128xbf16>
    %cst_403 = arith.constant dense<0.000000e+00> : vector<1x128xf32>
    %505 = tpu.matmul %503, %504, %cst_403 {dimension_numbers = #tpu.dot_dimension_numbers<[1], [0], [0], [1], [0, 0, 1, 1], [], []>} : vector<1x128xbf16>, vector<128x128xbf16>, vector<1x128xf32> -> vector<1x128xf32>
    %506 = arith.addf %502, %505 : vector<1x128xf32>
    %c26_404 = arith.constant 26 : index
    %c0_405 = arith.constant 0 : index
    %507 = vector.load %arg20[%c26_404, %c0_405] : memref<32x128xbf16, #tpu.memory_space<vmem>>, vector<1x128xbf16>
    %c1152_406 = arith.constant 1152 : index
    %c0_407 = arith.constant 0 : index
    %508 = vector.load %arg6[%c1152_406, %c0_407] : memref<1280x128xbf16, #tpu.memory_space<vmem>>, vector<128x128xbf16>
    %cst_408 = arith.constant dense<0.000000e+00> : vector<1x128xf32>
    %509 = tpu.matmul %507, %508, %cst_408 {dimension_numbers = #tpu.dot_dimension_numbers<[1], [0], [0], [1], [0, 0, 1, 1], [], []>} : vector<1x128xbf16>, vector<128x128xbf16>, vector<1x128xf32> -> vector<1x128xf32>
    %510 = arith.addf %506, %509 : vector<1x128xf32>
    %511 = arith.addf %510, %430 : vector<1x128xf32>
    %c1_409 = arith.constant 1 : index
    %c0_410 = arith.constant 0 : index
    %512 = vector.load %arg16[%c1_409, %c0_410] : memref<2x128xf32, #tpu.memory_space<vmem>>, vector<1x128xf32>
    tpu.vector_store %arg16[%c1_409, %c0_410], %511 {strides = array<i32>} : memref<2x128xf32, #tpu.memory_space<vmem>>, vector<1x128xf32>,
    return
  }
  func.func @transform_0(%arg0: i32) -> (i32, i32) {
    %c0_i32 = arith.constant 0 : i32
    %c0_i32_0 = arith.constant 0 : i32
    %c0_i32_1 = arith.constant 0 : i32
    return %c0_i32, %c0_i32_0 : i32, i32
  }
  func.func @transform_1(%arg0: i32) -> (i32, i32) {
    %c0_i32 = arith.constant 0 : i32
    %c0_i32_0 = arith.constant 0 : i32
    %c0_i32_1 = arith.constant 0 : i32
    return %c0_i32, %c0_i32_0 : i32, i32
  }
  func.func @transform_2(%arg0: i32) -> (i32, i32) {
    %c0_i32 = arith.constant 0 : i32
    %c0_i32_0 = arith.constant 0 : i32
    %c0_i32_1 = arith.constant 0 : i32
    return %c0_i32, %c0_i32_0 : i32, i32
  }
  func.func @transform_3(%arg0: i32) -> (i32, i32) {
    %c0_i32 = arith.constant 0 : i32
    %c0_i32_0 = arith.constant 0 : i32
    %c0_i32_1 = arith.constant 0 : i32
    return %c0_i32, %c0_i32_0 : i32, i32
  }
  func.func @transform_4(%arg0: i32) -> (i32, i32) {
    %c0_i32 = arith.constant 0 : i32
    %c0_i32_0 = arith.constant 0 : i32
    %c0_i32_1 = arith.constant 0 : i32
    return %c0_i32, %c0_i32_0 : i32, i32
  }
  func.func @transform_5(%arg0: i32) -> (i32, i32) {
    %c0_i32 = arith.constant 0 : i32
    %c0_i32_0 = arith.constant 0 : i32
    %c0_i32_1 = arith.constant 0 : i32
    return %c0_i32, %c0_i32_0 : i32, i32
  }
  func.func @transform_6(%arg0: i32) -> (i32, i32) {
    %c0_i32 = arith.constant 0 : i32
    %c0_i32_0 = arith.constant 0 : i32
    %c0_i32_1 = arith.constant 0 : i32
    return %c0_i32, %c0_i32_0 : i32, i32
  }
  func.func @transform_7(%arg0: i32) -> (i32, i32) {
    %c0_i32 = arith.constant 0 : i32
    %c0_i32_0 = arith.constant 0 : i32
    %c0_i32_1 = arith.constant 0 : i32
    return %c0_i32, %c0_i32_0 : i32, i32
  }
  func.func @transform_8(%arg0: i32) -> (i32, i32) {
    %c0_i32 = arith.constant 0 : i32
    %c0_i32_0 = arith.constant 0 : i32
    %c0_i32_1 = arith.constant 0 : i32
    return %c0_i32, %c0_i32_0 : i32, i32
  }
  func.func @transform_9(%arg0: i32) -> (i32, i32) {
    %c0_i32 = arith.constant 0 : i32
    %c0_i32_0 = arith.constant 0 : i32
    %c0_i32_1 = arith.constant 0 : i32
    return %c0_i32, %c0_i32_0 : i32, i32
  }
  func.func @transform_10(%arg0: i32) -> (i32, i32) {
    %c0_i32 = arith.constant 0 : i32
    %c0_i32_0 = arith.constant 0 : i32
    %c0_i32_1 = arith.constant 0 : i32
    return %c0_i32, %c0_i32_0 : i32, i32
  }
  func.func @transform_11(%arg0: i32) -> (i32, i32) {
    %c0_i32 = arith.constant 0 : i32
    %c0_i32_0 = arith.constant 0 : i32
    %c0_i32_1 = arith.constant 0 : i32
    return %c0_i32, %c0_i32_0 : i32, i32
  }
  func.func @transform_12(%arg0: i32) -> (i32, i32) {
    %c0_i32 = arith.constant 0 : i32
    %c0_i32_0 = arith.constant 0 : i32
    %c0_i32_1 = arith.constant 0 : i32
    return %c0_i32, %c0_i32_0 : i32, i32
  }
  func.func @transform_13(%arg0: i32) -> (i32, i32) {
    %c0_i32 = arith.constant 0 : i32
    %c0_i32_0 = arith.constant 0 : i32
    %c0_i32_1 = arith.constant 0 : i32
    return %c0_i32, %c0_i32_0 : i32, i32
  }
  func.func @transform_14(%arg0: i32) -> (i32, i32) {
    %c0_i32 = arith.constant 0 : i32
    %c0_i32_0 = arith.constant 0 : i32
    %c0_i32_1 = arith.constant 0 : i32
    return %c0_i32, %c0_i32_0 : i32, i32
  }
  func.func @transform_15(%arg0: i32) -> (i32, i32) {
    %c0_i32 = arith.constant 0 : i32
    %c0_i32_0 = arith.constant 0 : i32
    %c0_i32_1 = arith.constant 0 : i32
    return %c0_i32, %c0_i32_0 : i32, i32
  }
}

</mosaic_0001>

<bundles_post_ra>
// kernel: tpu_custom_call.1
= control target key start
LH: loop header
LB: loop body
LE: loop exit
PB: predicated region body
PF: predicated region fallthrough
CT: control target
= control target key end

     0   :  { %20 = vsyncpa [#allocation7], 0  ;;  %s10435_s0 = inlined_call_operand.hbm [shape: bf16[192,128], index: 0, kind: input, shape index: {}]   ;;  %s10436_s1 = inlined_call_operand.hbm [shape: bf16[896,128], index: 1, kind: input, shape index: {}]   ;;  %s10437_s2 = inlined_call_operand.hbm [shape: bf16[512,128], index: 2, kind: input, shape index: {}]   ;;  %s10438_s3 = inlined_call_operand.hbm [shape: bf16[512,128], index: 3, kind: input, shape index: {}]   ;;  %s10439_s4 = inlined_call_operand.hbm [shape: bf16[512,128], index: 4, kind: input, shape index: {}]   ;;  %s10440_s5 = inlined_call_operand.hbm [shape: bf16[1280,128], index: 5, kind: input, shape index: {}]   ;;  %s10441_s6 = inlined_call_operand.vmem [shape: f32[1,128], index: 6, kind: input, shape index: {}]   ;;  %s10442_s7 = inlined_call_operand.vmem [shape: f32[1,128], index: 7, kind: input, shape index: {}]   ;;  %s10443_s8 = inlined_call_operand.vmem [shape: f32[1,128], index: 8, kind: input, shape index: {}]   ;;  %s10444_s9 = inlined_call_operand.vmem [shape: f32[1,128], index: 9, kind: input, shape index: {}]   ;;  %s10445_s10 = inlined_call_operand.vmem [shape: f32[1,128], index: 10, kind: input, shape index: {}]   ;;  %s10446_s11 = inlined_call_operand.vmem [shape: f32[1,128], index: 11, kind: input, shape index: {}]   ;;  %s10447_s12 = inlined_call_operand.vmem [shape: f32[1,128], index: 12, kind: input, shape index: {}]   ;;  %s10448_s13 = inlined_call_operand.vmem [shape: f32[1,128], index: 13, kind: input, shape index: {}]   ;;  %s10449_s14 = inlined_call_operand.vmem [shape: f32[1,128], index: 14, kind: input, shape index: {}]   ;;  %s10450_s15 = inlined_call_operand.hbm [shape: f32[2,128], index: 15, kind: output, shape index: {}]  }
   0x1   :  { %21 = vsyncpa [#allocation10], 0 }
   0x2   :  { %22 = vsyncpa [#allocation13], 0 }
   0x3   :  { %23 = vsyncpa [#allocation16], 0 }
   0x4   :  { %24 = vsyncpa [#allocation8], 0  ;;  %s42_s20 = sshll.u32 %s10436_s1, 4  ;;  %s9404_s21 = smov [#allocation9]   ;;  %s43_s20 = int_to_ptr.hbm [resolvable:$true] %s42_s20 }
   0x5   :  { %s44_s22 = sshll.u32 %s9404_s21, 4  ;;  %s68_s25 = sshll.u32 %s10438_s3, 4  ;;  %s45_s22 = int_to_ptr.vmem [resolvable:$true] %s44_s22  ;;  %s69_s25 = int_to_ptr.hbm [resolvable:$true] %s68_s25 }
   0x6   :  { %s9405_s26 = smov 64   ;;  %s9406_s27 = smov 4  }
   0x7   :  { %50 = dma.hbm_to_vmem [thread:$0]  %s43_s20, 7168, %s45_s22, [#allocation10], %s9405_s26, %s9405_s26, %s9406_s27  }
   0x8   :  { %s9407_s28 = smov [#allocation12]   ;;  %s29_s1 = sshll.u32 %s10435_s0, 4  ;;  %s30_s1 = int_to_ptr.hbm [resolvable:$true] %s29_s1 }
   0x9   :  { %s70_s29 = sshll.u32 %s9407_s28, 4  ;;  %s55_s18 = sshll.u32 %s10437_s2, 4  ;;  %s71_s29 = int_to_ptr.vmem [resolvable:$true] %s70_s29  ;;  %s56_s18 = int_to_ptr.hbm [resolvable:$true] %s55_s18 }
   0xa   :  { %76 = dma.hbm_to_vmem [thread:$0]  %s69_s25, 4096, %s71_s29, [#allocation13], %s9405_s26, %s9405_s26, %s9406_s27  }
   0xb   :  { %s9408_s19 = smov [#allocation6]   ;;  %s9409_s20 = smov [#allocation11]  }
   0xc   :  { %s31_s21 = sshll.u32 %s9408_s19, 4  ;;  %s57_s0 = sshll.u32 %s9409_s20, 4  ;;  %s32_s21 = int_to_ptr.vmem [resolvable:$true] %s31_s21  ;;  %s58_s0 = int_to_ptr.vmem [resolvable:$true] %s57_s0 }
   0xd   :  { %37 = dma.hbm_to_vmem [thread:$0]  %s30_s1, 1536, %s32_s21, [#allocation7], %s9405_s26, %s9405_s26, %s9406_s27  }
   0xe   :  { %s81_s24 = sshll.u32 %s10439_s4, 4  ;;  %s94_s28 = sshll.u32 %s10440_s5, 4  ;;  %s82_s24 = int_to_ptr.hbm [resolvable:$true] %s81_s24  ;;  %s95_s28 = int_to_ptr.hbm [resolvable:$true] %s94_s28 }
   0xf   :  { %63 = dma.hbm_to_vmem [thread:$0]  %s56_s18, 4096, %s58_s0, [#allocation10], %s9405_s26, %s9405_s26, %s9406_s27  }
  0x10   :  { %s9410_s29 = smov [#allocation14]   ;;  %s9411_s16 = smov [#allocation15]  }
  0x11   :  { %s83_s30 = sshll.u32 %s9410_s29, 4  ;;  %s96_s4 = sshll.u32 %s9411_s16, 4  ;;  %s84_s30 = int_to_ptr.vmem [resolvable:$true] %s83_s30  ;;  %s97_s4 = int_to_ptr.vmem [resolvable:$true] %s96_s4 }
  0x12   :  { %89 = dma.hbm_to_vmem [thread:$0]  %s82_s24, 4096, %s84_s30, [#allocation13], %s9405_s26, %s9405_s26, %s9406_s27  }
  0x13   :  { %102 = dma.hbm_to_vmem [thread:$0]  %s95_s28, 10240, %s97_s4, [#allocation16], %s9405_s26, %s9405_s26, %s9406_s27  }
  0x14   :  { %9394 = dma.done.wait [#allocation7], 1536  }
  0x15   :  { %9395 = vsyncadd [#allocation7], 4294965760 }
  0x16   :  { %9396 = dma.done.wait [#allocation10], 11264  }
  0x17   :  { %9397 = vsyncadd [#allocation10], 4294956032 }
  0x18   :  { %9398 = dma.done.wait [#allocation13], 8192  }
  0x19   :  { %9399 = vsyncadd [#allocation13], 4294959104 }
  0x1a   :  { %9400 = dma.done.wait [#allocation16], 10240  }
  0x1b   :  { %9401 = vsyncadd [#allocation16], 4294957056  ;;  %v8746_v0 = vld [vmem:[#allocation9 + $0x78] sm:$0xff]  ;;  %v8745_v4 = vld [vmem:[#allocation9 + $0x70] sm:$0xff]  ;;  %vm218_vm0 = vcmask 1046528   ;;  %vm623_vm3 = vcmask 1045504  }
  0x1c   :  { %v8738_v1 = vld [vmem:[#allocation9 + $0x38] sm:$0xff]  ;;  %283 = vmatpush.bf16.msra.mxu0 %v8746_v0  ;;  %v8737_v5 = vld [vmem:[#allocation9 + $0x30] sm:$0xff]  ;;  %v8744_v8 = vld [vmem:[#allocation9 + $0x68] sm:$0xff]  ;;  %vm320_vm1 = vsmask.f32 7424  ;;  %vm903_vm6 = vcmask 1044480  }
  0x1d   :  { %v8754_v2 = vld [vmem:[#allocation9 + $0xb8] sm:$0xff]  ;;  %418 = vmatpush.bf16.msra.mxu1 %v8738_v1  ;;  %v8753_v6 = vld [vmem:[#allocation9 + $0xb0] sm:$0xff]  ;;  %v8736_v9 = vld [vmem:[#allocation9 + $0x28] sm:$0xff]  ;;  %vm472_vm2 = vsmask.f32 6400  ;;  %s6826_s24 = sshll.u32 %s10450_s15, 4  ;;  %s6827_s24 = int_to_ptr.hbm [resolvable:$true] %s6826_s24 }
  0x1e   :  { %v8762_v3 = vld [vmem:[#allocation9 + $0xf8] sm:$0xff]  ;;  %559 = vmatpush.bf16.msra.mxu2 %v8754_v2  ;;  %v8761_v7 = vld [vmem:[#allocation9 + $0xf0] sm:$0xff]  ;;  %v8752_v10 = vld [vmem:[#allocation9 + $0xa8] sm:$0xff]  ;;  %vm752_vm4 = vsmask.f32 5376 }
  0x1f   :  { %688 = vmatpush.bf16.msra.mxu3 %v8762_v3  ;;  %v8760_v11 = vld [vmem:[#allocation9 + $0xe8] sm:$0xff]  ;;  %v8743_v12 = vld [vmem:[#allocation9 + $0x60] sm:$0xff]  ;;  %v8742_v20 = vld [vmem:[#allocation9 + $0x58] sm:$0xff]  ;;  %vm1032_vm5 = vsmask.f32 4352 }
  0x20   :  { %284 = vmatpush.bf16.msra.mxu0 %v8745_v4  ;;  %v8735_v13 = vld [vmem:[#allocation9 + $0x20] sm:$0xff]  ;;  %v8734_v21 = vld [vmem:[#allocation9 + $0x18] sm:$0xff]  ;;  %v9532_v22 = vld [vmem:[#allocation6 + $0x8] sm:$0xff] }
  0x21   :  { %419 = vmatpush.bf16.msra.mxu1 %v8737_v5  ;;  %v9200_v14 = vld [vmem:[#allocation6] sm:$0xff]   ;;  %v8750_v23 = vld [vmem:[#allocation9 + $0x98] sm:$0xff]  ;;  %v8741_v27 = vld [vmem:[#allocation9 + $0x50] sm:$0xff]  ;;  %v9536_v30 = vshrl.u32 %v9532_v22, 16  ;;  %v9539_v33 = vshll.u32 %v9532_v22, 16  ;;  %v220_v51 = vrot.slane %v9532_v22, 1 }
  0x22   :  { %560 = vmatpush.bf16.msra.mxu2 %v8753_v6  ;;  %v8751_v15 = vld [vmem:[#allocation9 + $0xa0] sm:$0xff]  ;;  %v9530_v17 = vunpack.c.h.b16 %v9200_v14  ;;  %v8758_v24 = vld [vmem:[#allocation9 + $0xd8] sm:$0xff]  ;;  %v8733_v28 = vld [vmem:[#allocation9 + $0x10] sm:$0xff]  ;;  %v324_v29 = vshll.u32 %v9200_v14, 16  ;;  %v322_v39 = vshrl.u32 %v9200_v14, 16  ;;  %v625_v59 = vrot.slane %v9532_v22, 2 }
  0x23   :  { %689 = vmatpush.bf16.msra.mxu3 %v8761_v7  ;;  %v8759_v16 = vld [vmem:[#allocation9 + $0xe0] sm:$0xff]  ;;  %v8749_v31 = vld [vmem:[#allocation9 + $0x90] sm:$0xff]  ;;  %v8740_v37 = vld [vmem:[#allocation9 + $0x48] sm:$0xff]  ;;  %v481_v41 = vrot.slane %v9536_v30, 1  ;;  %v482_v46 = vrot.slane %v9539_v33, 2  ;;  %v331_v53 = vrot.slane %v9539_v33, 1 }
  0x24   :  { %285 = vmatpush.bf16.msra.mxu0 %v8744_v8  ;;  %v173_v18 = vld [vmem:[#allocation6] sm:$0xe]  ;;  %v8757_v32 = vld [vmem:[#allocation9 + $0xd0] sm:$0xff]  ;;  %v8732_v38 = vld [vmem:[#allocation9 + $0x8] sm:$0xff]  ;;  %v326_v40 = vrot.slane %v324_v29, 1 }
  0x25   :  { %420 = vmatpush.bf16.msra.mxu1 %v8736_v9  ;;  %v201_v19 = vunpack.c.l.b16 %v173_v18  ;;  %v603_v26 = vld [vmem:[#allocation6] sm:$0xc]  ;;  %v8748_v42 = vld [vmem:[#allocation9 + $0x88] sm:$0xff]  ;;  %v483_v57 = vor.u32 %v482_v46, %v481_v41  ;;  %v8770_v60 = vld [vmem:[#allocation9 + $0x138] sm:$0xff] }
  0x26   :  { %561 = vmatpush.bf16.msra.mxu2 %v8752_v10  ;;  %v621_v36 = vunpack.c.l.b16 %v603_v26  ;;  %v8756_v43 = vld [vmem:[#allocation9 + $0xc8] sm:$0xff]  ;;  %v8739_v48 = vld [vmem:[#allocation9 + $0x40] sm:$0xff]  ;;  %v327_v52 = vor.u32 %v326_v40, %v322_v39  ;;  %v8778_v61 = vld [vmem:[#allocation9 + $0x178] sm:$0xff] }
  0x27   :  { %690 = vmatpush.bf16.msra.mxu3 %v8760_v11  ;;  %v212_v25 = vpack.c.b16 %v9530_v17, %v201_v19  ;;  %v8731_v49 = vld [vmem:[#allocation9] sm:$0xff]  ;;  %v9554_v2 = vld [vmem:[#allocation6 + $0x10] sm:$0xff]  ;;  %v8768_v7 = vld [vmem:[#allocation9 + $0x128] sm:$0xff] }
  0x28   :  { %286 = vmatpush.bf16.msra.mxu0 %v8743_v12  ;;  %v9544_v47 = vpack.c.b16 %v9530_v17, %v621_v36  ;;  %v8747_v54 = vld [vmem:[#allocation9 + $0x80] sm:$0xff]  ;;  %v332_v63 = vsel %vm320_vm1, %v327_v52, %v331_v53  ;;  %v8769_v3 = vld [vmem:[#allocation9 + $0x130] sm:$0xff]  ;;  %v9557_v5 = vshll.u32 %v9554_v2, 16  ;;  %v9560_v6 = vshrl.u32 %v9554_v2, 16  ;;  %v8776_v8 = vld [vmem:[#allocation9 + $0x168] sm:$0xff] }
  0x29   :  { %421 = vmatpush.bf16.msra.mxu1 %v8735_v13  ;;  %v474_v34 = vshrl.u32 %v212_v25, 16  ;;  %v477_v35 = vshll.u32 %v212_v25, 16  ;;  %v219_v50 = vrot.slane %v212_v25, 1  ;;  %v8755_v55 = vld [vmem:[#allocation9 + $0xc0] sm:$0xff]  ;;  %v8777_v4 = vld [vmem:[#allocation9 + $0x170] sm:$0xff]  ;;  %v222_v11 = vrot.slane %v9554_v2, 1 }
  0x2a   :  { %562 = vmatpush.bf16.msra.mxu2 %v8751_v15  ;;  %v624_v58 = vrot.slane %v9544_v47, 2  ;;  %v485_v9 = vrot.slane %v9560_v6, 1  ;;  %v486_v10 = vrot.slane %v9557_v5, 2  ;;  %v335_v12 = vor.u32 %v9536_v30, %v331_v53  ;;  %v8767_v25 = vld [vmem:[#allocation9 + $0x120] sm:$0xff]  ;;  %v8804_v36 = vld [vmem:[#allocation9 + $0x68] sm:$0xff]  ;;  %v8782_v52 = vld [vmem:[#allocation9 + $0x198] sm:$0xff] }
  0x2b   :  { %691 = vmatpush.bf16.msra.mxu3 %v8759_v16  ;;  %v476_v44 = vrot.slane %v474_v34, 1  ;;  %v479_v45 = vrot.slane %v477_v35, 2  ;;  %v221_v62 = vsel %vm218_vm0, %v219_v50, %v220_v51  ;;  %v339_v13 = vrot.slane %v9557_v5, 1  ;;  %v8775_v29 = vld [vmem:[#allocation9 + $0x160] sm:$0xff]  ;;  %v8784_v35 = vld [vmem:[#allocation9 + $0x1a8] sm:$0xff]  ;;  %v8766_v50 = vld [vmem:[#allocation9 + $0x118] sm:$0xff] }
  0x2c   :  { %287 = vmatpush.bf16.msra.mxu0 %v8742_v20  ;;  %v626_v1 = vsel %vm623_vm3, %v624_v58, %v625_v59  ;;  %v487_v14 = vor.u32 %v486_v10, %v485_v9  ;;  %v627_v15 = vrot.slane %v9554_v2, 2  ;;  %v223_v16 = vsel %vm218_vm0, %v220_v51, %v222_v11  ;;  %v9592_v46 = vld [vmem:[#allocation6 + $0x20] sm:$0xff]  ;;  %v8774_v51 = vld [vmem:[#allocation9 + $0x158] sm:$0xff]  ;;  %v8773_v58 = vld [vmem:[#allocation9 + $0x150] sm:$0xff] }
  0x2d   :  { %422 = vmatpush.bf16.msra.mxu1 %v8734_v21  ;;  %v480_v56 = vor.u32 %v479_v45, %v476_v44  ;;  %v340_v18 = vsel %vm320_vm1, %v335_v12, %v339_v13  ;;  %v9572_v21 = vld [vmem:[#allocation6 + $0x18] sm:$0xff]  ;;  %v9600_v53 = vshll.u32 %v9592_v46, 16  ;;  %v8772_v9 = vld [vmem:[#allocation9 + $0x148] sm:$0xff]  ;;  %v226_v12 = vrot.slane %v9592_v46, 1 }
  0x2e   :  { %563 = vmatpush.bf16.msra.mxu2 %v8750_v23  ;;  %v488_v19 = vsel %vm472_vm2, %v483_v57, %v487_v14  ;;  %v628_v20 = vsel %vm623_vm3, %v625_v59, %v627_v15  ;;  %v8786_v23 = vld [vmem:[#allocation9 + $0x1b8] sm:$0xff]  ;;  %v9575_v26 = vshll.u32 %v9572_v21, 16  ;;  %v629_v41 = vrot.slane %v9572_v21, 2 }
  0x2f   :  { %692 = vmatpush.bf16.msra.mxu3 %v8758_v24  ;;  %v484_v0 = vsel %vm472_vm2, %v480_v56, %v483_v57  ;;  %v8806_v24 = vld [vmem:[#allocation9 + $0x78] sm:$0xff]  ;;  %v754_v56 = vshrl.u32 %v9544_v47, 16  ;;  %v8765_v57 = vld [vmem:[#allocation9 + $0x110] sm:$0xff]  ;;  %v757_v59 = vshll.u32 %v9544_v47, 16  ;;  %v8764_v47 = vld [vmem:[#allocation9 + $0x108] sm:$0xff] }
  0x30   :  { %288 = vmatpush.bf16.msra.mxu0 %v8741_v27  ;;  %v9578_v27 = vshrl.u32 %v9572_v21, 16  ;;  %v490_v34 = vrot.slane %v9575_v26, 2  ;;  %v347_v39 = vrot.slane %v9575_v26, 1 }
  0x31   :  { %423 = vmatpush.bf16.msra.mxu1 %v8733_v28  ;;  %v8785_v28 = vld [vmem:[#allocation9 + $0x1b0] sm:$0xff] }
  0x32   :  { %564 = vmatpush.bf16.msra.mxu2 %v8749_v31  ;;  %v8805_v31 = vld [vmem:[#allocation9 + $0x70] sm:$0xff] }
  0x33   :  { %693 = vmatpush.bf16.msra.mxu3 %v8757_v32  ;;  %v489_v32 = vrot.slane %v9578_v27, 1 }
  0x34   :  { %289 = vmatpush.bf16.msra.mxu0 %v8740_v37  ;;  %v224_v37 = vrot.slane %v9572_v21, 1 }
  0x35   :  { %424 = vmatpush.bf16.msra.mxu1 %v8732_v38  ;;  %v343_v38 = vor.u32 %v9560_v6, %v339_v13  ;;  %v9585_v40 = vor.u32 %v490_v34, %v489_v32  ;;  %v452_v13 = vld [vmem:[#allocation6 + $0x28] sm:$0x3] }
  0x36   :  { %565 = vmatpush.bf16.msra.mxu2 %v8748_v42  ;;  %v8783_v42 = vld [vmem:[#allocation9 + $0x1a0] sm:$0xff]  ;;  %v225_v44 = vsel %vm218_vm0, %v222_v11, %v224_v37 }
  0x37   :  { %694 = vmatpush.bf16.msra.mxu3 %v8756_v43  ;;  %v8803_v43 = vld [vmem:[#allocation9 + $0x60] sm:$0xff]  ;;  %v348_v45 = vsel %vm320_vm1, %v343_v38, %v347_v39 }
  0x38   :  { %290 = vmatpush.bf16.msra.mxu0 %v8739_v48  ;;  %v492_v48 = vsel %vm472_vm2, %v487_v14, %v9585_v40  ;;  %v8780_v14 = vld [vmem:[#allocation9 + $0x188] sm:$0xff] }
  0x39   :  { %425 = vmatpush.bf16.msra.mxu1 %v8731_v49  ;;  %v630_v49 = vsel %vm623_vm3, %v627_v15, %v629_v41  ;;  %v8800_v15 = vld [vmem:[#allocation9 + $0x48] sm:$0xff] }
  0x3a   :  { %566 = vmatpush.bf16.msra.mxu2 %v8747_v54  ;;  %v9603_v54 = vshrl.u32 %v9592_v46, 16 }
  0x3b   :  { %695 = vmatpush.bf16.msra.mxu3 %v8755_v55  ;;  %291 = vmatmul.bf16.vlgmr.msra.gmra.mxu0 %v221_v62  ;;  %v8802_v55 = vld [vmem:[#allocation9 + $0x58] sm:$0xff]  ;;  %v8781_v62 = vld [vmem:[#allocation9 + $0x190] sm:$0xff] }
  0x3c   :  { %839 = vmatpush.bf16.msrb.mxu0 %v8770_v60  ;;  %426 = vmatmul.bf16.vlgmr.msra.gmra.mxu1 %v332_v63  ;;  %v761_v60 = vrot.slane %v9536_v30, 2  ;;  %v8801_v63 = vld [vmem:[#allocation9 + $0x50] sm:$0xff] }
  0x3d   :  { %968 = vmatpush.bf16.msrb.mxu1 %v8778_v61  ;;  %567 = vmatmul.bf16.vlgmr.msra.gmra.mxu2 %v484_v0  ;;  %v762_v61 = vrot.slane %v9539_v33, 3  ;;  %v756_v0 = vrot.slane %v754_v56, 2 }
  0x3e   :  { %696 = vmatmul.bf16.vlgmr.msra.gmra.mxu3 %v626_v1  ;;  %1119 = vmatpush.bf16.msrb.mxu2 %v8786_v23  ;;  %v759_v1 = vrot.slane %v757_v59, 3 }
  0x3f   :  { %1353 = vmatpush.bf16.msrb.mxu3 %v8806_v24  ;;  %v631_v24 = vrot.slane %v9592_v46, 2 }
  0x40   :  { %840 = vmatpush.bf16.msrb.mxu0 %v8769_v3  ;;  %v9609_v3 = vor.u32 %v762_v61, %v761_v60  ;;  %v760_v10 = vor.u32 %v759_v1, %v756_v0 }
  0x41   :  { %969 = vmatpush.bf16.msrb.mxu1 %v8777_v4  ;;  %v493_v4 = vrot.slane %v9603_v54, 1 }
  0x42   :  { %1120 = vmatpush.bf16.msrb.mxu2 %v8785_v28  ;;  %v470_v28 = vunpack.c.l.b16 %v452_v13 }
  0x43   :  { %1354 = vmatpush.bf16.msrb.mxu3 %v8805_v31  ;;  %v8771_v31 = vld [vmem:[#allocation9 + $0x140] sm:$0xff] }
  0x44   :  { %841 = vmatpush.bf16.msrb.mxu0 %v8768_v7  ;;  %v494_v7 = vrot.slane %v9600_v53, 2 }
  0x45   :  { %970 = vmatpush.bf16.msrb.mxu1 %v8776_v8  ;;  %v883_v8 = vld [vmem:[#allocation6] sm:$0x8] }
  0x46   :  { %1121 = vmatpush.bf16.msrb.mxu2 %v8784_v35  ;;  %v901_v11 = vunpack.c.l.b16 %v883_v8  ;;  %v495_v23 = vor.u32 %v494_v7, %v493_v4  ;;  %v8779_v35 = vld [vmem:[#allocation9 + $0x180] sm:$0xff]  ;;  %v9646_v4 = vld [vmem:[#allocation6 + $0x30] sm:$0xff]   ;;  %v8798_v8 = vld [vmem:[#allocation9 + $0x38] sm:$0xff] }
  0x47   :  { %1355 = vmatpush.bf16.msrb.mxu3 %v8804_v36  ;;  %v8799_v36 = vld [vmem:[#allocation9 + $0x40] sm:$0xff]  ;;  %v1244_v7 = vld [vmem:[#allocation6 + $0x30] sm:$0xe] }
  0x48   :  { %842 = vmatpush.bf16.msrb.mxu0 %v8767_v25  ;;  %v156_v25 = vld [vmem:[#allocation6 + $0x28] sm:$0x1] }
  0x49   :  { %971 = vmatpush.bf16.msrb.mxu1 %v8775_v29  ;;  %v8763_v29 = vld [vmem:[#allocation9 + $0x100] sm:$0xff] }
  0x4a   :  { %1122 = vmatpush.bf16.msrb.mxu2 %v8783_v42  ;;  %v1041_v42 = vrot.slane %v9536_v30, 3 }
  0x4b   :  { %296 = vmatmul.bf16.gmra.mxu0 %v223_v16  ;;  %1356 = vmatpush.bf16.msrb.mxu3 %v8803_v43  ;;  %v9616_v16 = vsel %vm752_vm4, %v760_v10, %v9609_v3  ;;  %v1042_v43 = vrot.slane %v9539_v33, 4  ;;  %v1272_v10 = vunpack.c.l.b16 %v1244_v7  ;;  %v8817_v7 = vld [vmem:[#allocation9 + $0xd0] sm:$0xff] }
  0x4c   :  { %431 = vmatmul.bf16.gmra.mxu1 %v340_v18  ;;  %843 = vmatpush.bf16.msrb.mxu0 %v8766_v50  ;;  %v9619_v18 = vpack.c.b16 %v9530_v17, %v901_v11  ;;  %v227_v17 = vsel %vm218_vm0, %v224_v37, %v226_v12  ;;  %v211_v37 = vunpack.c.l.b16 %v156_v25  ;;  %v9651_v11 = vld [vmem:[#allocation6 + $0x38] sm:$0xff]  ;;  %v8813_v25 = vld [vmem:[#allocation9 + $0xb0] sm:$0xff] }
  0x4d   :  { %572 = vmatmul.bf16.gmra.mxu2 %v488_v19  ;;  %972 = vmatpush.bf16.msrb.mxu1 %v8774_v51  ;;  %v351_v19 = vor.u32 %v9578_v27, %v347_v39  ;;  %v9637_v51 = vor.u32 %v1042_v43, %v1041_v42  ;;  %v8822_v42 = vld [vmem:[#allocation9 + $0xf8] sm:$0xff]  ;;  %v769_v43 = vrot.slane %v9578_v27, 2 }
  0x4e   :  { %701 = vmatmul.bf16.gmra.mxu3 %v628_v20  ;;  %1123 = vmatpush.bf16.msrb.mxu2 %v8782_v52  ;;  %v355_v20 = vrot.slane %v9600_v53, 1  ;;  %v1034_v32 = vshrl.u32 %v9619_v18, 16  ;;  %v1037_v34 = vshll.u32 %v9619_v18, 16  ;;  %v217_v33 = vpack.c.b16 %v211_v37, %v211_v37  ;;  %v9681_v37 = vld [vmem:[#allocation6 + $0x48] sm:$0xff] }
  0x4f   :  { %1357 = vmatpush.bf16.msrb.mxu3 %v8802_v55  ;;  %v904_v13 = vrot.slane %v9619_v18, 3  ;;  %v766_v18 = vrot.slane %v9557_v5, 3 }
  0x50   :  { %844 = vmatpush.bf16.msrb.mxu0 %v8765_v57  ;;  %v1036_v38 = vrot.slane %v1034_v32, 3  ;;  %v1039_v39 = vrot.slane %v1037_v34, 4  ;;  %v361_v52 = vshll.u32 %v217_v33, 16  ;;  %v228_v57 = vrot.slane %v217_v33, 1 }
  0x51   :  { %973 = vmatpush.bf16.msrb.mxu1 %v8773_v58  ;;  %v359_v58 = vor.u32 %v9603_v54, %v355_v20 }
  0x52   :  { %1124 = vmatpush.bf16.msrb.mxu2 %v8781_v62  ;;  %v1040_v50 = vor.u32 %v1039_v39, %v1036_v38  ;;  %v363_v59 = vrot.slane %v361_v52, 1  ;;  %v229_v62 = vsel %vm218_vm0, %v226_v12, %v228_v57  ;;  %v8796_v39 = vld [vmem:[#allocation9 + $0x28] sm:$0xff]  ;;  %v1294_v52 = vrot.slane %v9681_v37, 1 }
  0x53   :  { %1358 = vmatpush.bf16.msrb.mxu3 %v8801_v63 }
  0x54   :  { %845 = vmatpush.bf16.msrb.mxu0 %v8764_v47  ;;  %v1044_v30 = vsel %vm1032_vm5, %v1040_v50, %v9637_v51  ;;  %v364_v63 = vsel %vm320_vm1, %v359_v58, %v363_v59  ;;  %v8814_v47 = vld [vmem:[#allocation9 + $0xb8] sm:$0xff]  ;;  %v8795_v50 = vld [vmem:[#allocation9 + $0x20] sm:$0xff] }
  0x55   :  { %974 = vmatpush.bf16.msrb.mxu1 %v8772_v9  ;;  %v9649_v9 = vunpack.c.h.b16 %v9646_v4  ;;  %v8827_v59 = vld [vmem:[#allocation9 + $0x120] sm:$0xff] }
  0x56   :  { %1125 = vmatpush.bf16.msrb.mxu2 %v8780_v14  ;;  %v905_v14 = vrot.slane %v9532_v22, 3  ;;  %v765_v22 = vrot.slane %v9560_v6, 2 }
  0x57   :  { %1359 = vmatpush.bf16.msrb.mxu3 %v8800_v15  ;;  %v9654_v12 = vpack.c.b16 %v9649_v9, %v1272_v10  ;;  %v1053_v10 = vrot.slane %v9603_v54, 3 }
  0x58   :  { %846 = vmatpush.bf16.msrb.mxu0 %v8763_v29  ;;  %v1046_v29 = vrot.slane %v9557_v5, 4  ;;  %v767_v32 = vor.u32 %v766_v18, %v765_v22  ;;  %v8812_v5 = vld [vmem:[#allocation9 + $0xa8] sm:$0xff]  ;;  %v911_v18 = vrot.slane %v9592_v46, 3 }
  0x59   :  { %975 = vmatpush.bf16.msrb.mxu1 %v8771_v31  ;;  %v1289_v15 = vrot.slane %v9654_v12, 1  ;;  %v9667_v31 = vld [vmem:[#allocation6 + $0x40] sm:$0xff]  ;;  %v1542_v46 = vshrl.u32 %v9654_v12, 16 }
  0x5a   :  { %1126 = vmatpush.bf16.msrb.mxu2 %v8779_v35  ;;  %v768_v35 = vsel %vm752_vm4, %v9609_v3, %v767_v32  ;;  %v8821_v3 = vld [vmem:[#allocation9 + $0xf0] sm:$0xff] }
  0x5b   :  { %301 = vmatmul.bf16.gmra.mxu0 %v225_v44  ;;  %v356_v44 = vsel %vm320_vm1, %v351_v19, %v355_v20  ;;  %1360 = vmatpush.bf16.msrb.mxu3 %v8799_v36  ;;  %v1290_v19 = vrot.slane %v9651_v11, 1  ;;  %v906_v20 = vsel %vm903_vm6, %v904_v13, %v905_v14  ;;  %v1054_v13 = vrot.slane %v9600_v53, 4 }
  0x5c   :  { %436 = vmatmul.bf16.gmra.mxu1 %v348_v45  ;;  %v496_v45 = vsel %vm472_vm2, %v9585_v40, %v495_v23  ;;  %1487 = vmatpush.bf16.msra.mxu0 %v8798_v8  ;;  %v773_v8 = vrot.slane %v9603_v54, 2 }
  0x5d   :  { %577 = vmatmul.bf16.gmra.mxu2 %v492_v48  ;;  %v632_v48 = vsel %vm623_vm3, %v629_v41, %v631_v24  ;;  %1627 = vmatpush.bf16.msra.mxu1 %v8814_v47  ;;  %v774_v47 = vrot.slane %v9600_v53, 3 }
  0x5e   :  { %706 = vmatmul.bf16.gmra.mxu3 %v630_v49  ;;  %v471_v49 = vpack.c.b16 %v470_v28, %v470_v28  ;;  %v1045_v28 = vrot.slane %v9560_v6, 3  ;;  %1755 = vmatpush.bf16.msra.mxu2 %v8822_v42 }
  0x5f   :  { %v9702_v22 = vor.u32 %v774_v47, %v773_v8 }
  0x60   :  { %v498_v40 = vshrl.u32 %v471_v49, 16  ;;  %v501_v41 = vshll.u32 %v471_v49, 16  ;;  %v633_v61 = vrot.slane %v471_v49, 2  ;;  %v1047_v34 = vor.u32 %v1046_v29, %v1045_v28  ;;  %v8829_v49 = vld [vmem:[#allocation9 + $0x130] sm:$0xff] }
  0x61   :  { %1628 = vmatpush.bf16.msra.mxu1 %v8813_v25  ;;  %v8816_v25 = vld [vmem:[#allocation9 + $0xc8] sm:$0xff]  ;;  %v9705_v28 = vor.u32 %v1054_v13, %v1053_v10 }
  0x62   :  { %v500_v55 = vrot.slane %v498_v40, 1  ;;  %v503_v56 = vrot.slane %v501_v41, 2  ;;  %v634_v1 = vsel %vm623_vm3, %v631_v24, %v633_v61  ;;  %v8797_v24 = vld [vmem:[#allocation9 + $0x30] sm:$0xff]  ;;  %v1048_v38 = vsel %vm1032_vm5, %v9637_v51, %v1047_v34  ;;  %1756 = vmatpush.bf16.msra.mxu2 %v8821_v3  ;;  %v8811_v51 = vld [vmem:[#allocation9 + $0xa0] sm:$0xff]  ;;  %v8810_v61 = vld [vmem:[#allocation9 + $0x98] sm:$0xff] }
  0x63   :  { %1488 = vmatpush.bf16.msra.mxu0 %v8797_v24  ;;  %v909_v40 = vrot.slane %v9572_v21, 3  ;;  %v8808_v24 = vld [vmem:[#allocation9 + $0x88] sm:$0xff] }
  0x64   :  { %v504_v60 = vor.u32 %v503_v56, %v500_v55 }
  0x65   :  { %1629 = vmatpush.bf16.msra.mxu1 %v8812_v5 }
  0x66   :  { %v505_v0 = vsel %vm472_vm2, %v495_v23, %v504_v60  ;;  %v1291_v23 = vsel %vm218_vm0, %v1289_v15, %v1290_v19  ;;  %v8794_v60 = vld [vmem:[#allocation9 + $0x18] sm:$0xff]  ;;  %v732_v15 = vld [vmem:[#allocation6 + $0x28] sm:$0x7] }
  0x67   :  { %1489 = vmatpush.bf16.msra.mxu0 %v8796_v39  ;;  %v750_v54 = vunpack.c.l.b16 %v732_v15 }
  0x69   :  { %1630 = vmatpush.bf16.msra.mxu1 %v8811_v51  ;;  %v751_v5 = vpack.c.b16 %v750_v54, %v750_v54  ;;  %v9745_v54 = vshll.u32 %v9651_v11, 16 }
  0x6b   :  { %306 = vmatmul.bf16.gmra.mxu0 %v227_v17  ;;  %v1292_v17 = vrot.slane %v9667_v31, 1  ;;  %v778_v21 = vshrl.u32 %v751_v5, 16 }
  0x6c   :  { %441 = vmatmul.bf16.gmra.mxu1 %v356_v44  ;;  %v770_v44 = vrot.slane %v9575_v26, 3  ;;  %1490 = vmatpush.bf16.msra.mxu0 %v8795_v50 }
  0x6d   :  { %582 = vmatmul.bf16.gmra.mxu2 %v496_v45  ;;  %v1293_v6 = vsel %vm218_vm0, %v1290_v19, %v1292_v17  ;;  %v1049_v45 = vrot.slane %v9578_v27, 3  ;;  %v8828_v27 = vld [vmem:[#allocation9 + $0x128] sm:$0xff]  ;;  %v1295_v58 = vsel %vm218_vm0, %v1292_v17, %v1294_v52  ;;  %1631 = vmatpush.bf16.msra.mxu1 %v8810_v61  ;;  %v8815_v17 = vld [vmem:[#allocation9 + $0xc0] sm:$0xff]  ;;  %v913_v61 = vrot.slane %v751_v5, 3 }
  0x6e   :  { %711 = vmatmul.bf16.gmra.mxu3 %v632_v48  ;;  %v1050_v48 = vrot.slane %v9575_v26, 4  ;;  %v9683_v33 = vor.u32 %v770_v44, %v769_v43  ;;  %v8819_v26 = vld [vmem:[#allocation9 + $0xe0] sm:$0xff]  ;;  %v1012_v19 = vld [vmem:[#allocation6 + $0x28] sm:$0xf]  ;;  %v1227_v44 = vld [vmem:[#allocation6 + $0x58] sm:$0x1] }
  0x6f   :  { %v1030_v29 = vunpack.c.l.b16 %v1012_v19  ;;  %v8823_v43 = vld [vmem:[#allocation9 + $0x100] sm:$0xff]  ;;  %v1282_v50 = vunpack.c.l.b16 %v1227_v44  ;;  %v914_v15 = vsel %vm903_vm6, %v911_v18, %v913_v61  ;;  %v1828_v44 = vrot.slane %v9745_v54, 3 }
  0x70   :  { %v1051_v41 = vor.u32 %v1050_v48, %v1049_v45  ;;  %v772_v55 = vsel %vm752_vm4, %v767_v32, %v9683_v33  ;;  %1491 = vmatpush.bf16.msra.mxu0 %v8794_v60  ;;  %v8824_v32 = vld [vmem:[#allocation9 + $0x108] sm:$0xff]  ;;  %v781_v45 = vshll.u32 %v751_v5, 16  ;;  %v1550_v5 = vrot.slane %v9745_v54, 2 }
  0x71   :  { %v1031_v3 = vpack.c.b16 %v1030_v29, %v1030_v29 }
  0x72   :  { %v1052_v57 = vsel %vm1032_vm5, %v1047_v34, %v1051_v41  ;;  %v8807_v34 = vld [vmem:[#allocation9 + $0x80] sm:$0xff]  ;;  %v1056_v39 = vsel %vm1032_vm5, %v1051_v41, %v9705_v28 }
  0x73   :  { %v1058_v48 = vshrl.u32 %v1031_v3, 16 }
  0x7b   :  { %311 = vmatmul.bf16.gmra.mxu0 %v229_v62  ;;  %v8818_v62 = vld [vmem:[#allocation9 + $0xd8] sm:$0xff] }
  0x7c   :  { %446 = vmatmul.bf16.gmra.mxu1 %v364_v63  ;;  %v8826_v63 = vld [vmem:[#allocation9 + $0x118] sm:$0xff] }
  0x7d   :  { %587 = vmatmul.bf16.gmra.mxu2 %v505_v0  ;;  %v8793_v0 = vld [vmem:[#allocation9 + $0x10] sm:$0xff] }
  0x7e   :  { %716 = vmatmul.bf16.gmra.mxu3 %v634_v1  ;;  %v8809_v1 = vld [vmem:[#allocation9 + $0x90] sm:$0xff]  ;;  %1492 = vmatpush.bf16.msra.mxu0 %v8793_v0 }
  0x7f   :  { %1632 = vmatpush.bf16.msra.mxu1 %v8809_v1 }
  0x83   :  { %1633 = vmatpush.bf16.msra.mxu1 %v8808_v24 }
  0x87   :  { %1634 = vmatpush.bf16.msra.mxu1 %v8807_v34  ;;  %v1391_v34 = vshrl.u32 %v9646_v4, 16 }
  0x8b   :  { %847 = vmatmul.bf16.vlgmr.msrb.gmra.mxu0 %v9616_v16  ;;  %v907_v16 = vrot.slane %v9554_v2, 3  ;;  %v8830_v2 = vld [vmem:[#allocation9 + $0x138] sm:$0xff] }
  0x8c   :  { %976 = vmatmul.bf16.vlgmr.msrb.gmra.mxu1 %v906_v20  ;;  %1905 = vmatpush.bf16.msra.mxu3 %v8830_v2  ;;  %v8825_v20 = vld [vmem:[#allocation9 + $0x110] sm:$0xff] }
  0x8d   :  { %1127 = vmatmul.bf16.vlgmr.msrb.gmra.mxu2 %v1044_v30  ;;  %v908_v36 = vsel %vm903_vm6, %v905_v14, %v907_v16  ;;  %v8820_v30 = vld [vmem:[#allocation9 + $0xe8] sm:$0xff]  ;;  %v910_v56 = vsel %vm903_vm6, %v907_v16, %v909_v40  ;;  %v9700_v14 = vld [vmem:[#allocation6 + $0x50] sm:$0xff]  ;;  %v8791_v16 = vld [vmem:[#allocation9] sm:$0xff] }
  0x8e   :  { %1361 = vmatmul.bf16.vlgmr.msrb.gmra.mxu3 %v1291_v23  ;;  %1757 = vmatpush.bf16.msra.mxu2 %v8820_v30  ;;  %v8792_v23 = vld [vmem:[#allocation9 + $0x8] sm:$0xff]  ;;  %v1296_v53 = vrot.slane %v9700_v14, 1 }
  0x8f   :  { %1493 = vmatpush.bf16.msra.mxu0 %v8792_v23 }
  0x90   :  { %1906 = vmatpush.bf16.msra.mxu3 %v8829_v49  ;;  %v1297_v2 = vsel %vm218_vm0, %v1294_v52, %v1296_v53  ;;  %v1061_v49 = vshll.u32 %v1031_v3, 16  ;;  %v780_v52 = vrot.slane %v778_v21, 2 }
  0x92   :  { %1758 = vmatpush.bf16.msra.mxu2 %v8819_v26 }
  0x93   :  { %1494 = vmatpush.bf16.msra.mxu0 %v8791_v16 }
  0x94   :  { %1907 = vmatpush.bf16.msra.mxu3 %v8828_v27  ;;  %v783_v27 = vrot.slane %v781_v45, 3 }
  0x96   :  { %1759 = vmatpush.bf16.msra.mxu2 %v8818_v62  ;;  %v784_v60 = vor.u32 %v783_v27, %v780_v52 }
  0x98   :  { %1908 = vmatpush.bf16.msra.mxu3 %v8827_v59  ;;  %v785_v13 = vsel %vm752_vm4, %v9702_v22, %v784_v60  ;;  %v8846_v60 = vld [vmem:[#allocation9 + $0x1b8] sm:$0xff] }
  0x99   :  { %2183 = vmatpush.bf16.msrb.mxu1 %v8846_v60 }
  0x9a   :  { %1760 = vmatpush.bf16.msra.mxu2 %v8817_v7 }
  0x9b   :  { %852 = vmatmul.bf16.gmra.mxu0 %v768_v35 }
  0x9c   :  { %981 = vmatmul.bf16.gmra.mxu1 %v908_v36  ;;  %1909 = vmatpush.bf16.msra.mxu3 %v8826_v63 }
  0x9d   :  { %1132 = vmatmul.bf16.gmra.mxu2 %v1048_v38  ;;  %v776_v38 = vsel %vm752_vm4, %v9683_v33, %v9702_v22  ;;  %v1393_v22 = vshll.u32 %v9646_v4, 16  ;;  %v8838_v4 = vld [vmem:[#allocation9 + $0x178] sm:$0xff] }
  0x9e   :  { %1366 = vmatmul.bf16.gmra.mxu3 %v1293_v6  ;;  %1761 = vmatpush.bf16.msra.mxu2 %v8816_v25  ;;  %v912_v6 = vsel %vm903_vm6, %v909_v40, %v911_v18  ;;  %v1545_v18 = vshll.u32 %v9654_v12, 16 }
  0x9f   :  { %2033 = vmatpush.bf16.msrb.mxu0 %v8838_v4  ;;  %v8844_v4 = vld [vmem:[#allocation9 + $0x1a8] sm:$0xff] }
  0xa0   :  { %1910 = vmatpush.bf16.msra.mxu3 %v8825_v20 }
  0xa2   :  { %1762 = vmatpush.bf16.msra.mxu2 %v8815_v17  ;;  %v1395_v17 = vrot.slane %v1393_v22, 1 }
  0xa4   :  { %1911 = vmatpush.bf16.msra.mxu3 %v8824_v32  ;;  %v1396_v45 = vor.u32 %v1395_v17, %v1391_v34  ;;  %v1694_v34 = vrot.slane %v9667_v31, 2 }
  0xa8   :  { %1912 = vmatpush.bf16.msra.mxu3 %v8823_v43 }
  0xab   :  { %857 = vmatmul.bf16.gmra.mxu0 %v772_v55  ;;  %v1060_v55 = vrot.slane %v1058_v48, 3  ;;  %v1400_v48 = vrot.slane %v9745_v54, 1 }
  0xac   :  { %986 = vmatmul.bf16.gmra.mxu1 %v910_v56  ;;  %v1063_v56 = vrot.slane %v1061_v49, 4 }
  0xad   :  { %1137 = vmatmul.bf16.gmra.mxu2 %v1052_v57  ;;  %v9723_v57 = vpack.c.b16 %v1282_v50, %v1282_v50 }
  0xae   :  { %1371 = vmatmul.bf16.gmra.mxu3 %v1295_v58  ;;  %v1671_v58 = vld [vmem:[#allocation6 + $0x30] sm:$0xc]  ;;  %v1064_v63 = vor.u32 %v1063_v56, %v1060_v55  ;;  %v1401_v56 = vsel %vm320_vm1, %v1396_v45, %v1400_v48  ;;  %v9787_v45 = vshll.u32 %v9681_v37, 16 }
  0xaf   :  { %v1689_v62 = vunpack.c.l.b16 %v1671_v58  ;;  %v1298_v0 = vrot.slane %v9723_v57, 1 }
  0xb0   :  { %v1065_v23 = vsel %vm1032_vm5, %v9705_v28, %v1064_v63  ;;  %v9748_v28 = vshrl.u32 %v9651_v11, 16 }
  0xb1   :  { %v1690_v19 = vpack.c.b16 %v9649_v9, %v1689_v62  ;;  %v1299_v24 = vsel %vm218_vm0, %v1296_v53, %v1298_v0 }
  0xb2   :  { %v1827_v43 = vrot.slane %v9748_v28, 2 }
  0xb3   :  { %v1820_v29 = vshrl.u32 %v1690_v19, 16  ;;  %v1823_v53 = vshll.u32 %v1690_v19, 16 }
  0xb5   :  { %v1825_v3 = vrot.slane %v1823_v53, 3  ;;  %v1404_v53 = vor.u32 %v9748_v28, %v1400_v48  ;;  %v9790_v48 = vshrl.u32 %v9681_v37, 16 }
  0xb8   :  { %v292_v35 = vpop.f32.mrf.mxu0 }
  0xb9   :  { %v427_v36 = vpop.f32.mrf.mxu1 }
  0xba   :  { %v428_v42 = vadd.f32 %v427_v36, %v292_v35  ;;  %v1544_v35 = vrot.slane %v1542_v46, 1  ;;  %v1547_v36 = vrot.slane %v1545_v18, 2 }
  0xbb   :  { %862 = vmatmul.bf16.gmra.mxu0 %v776_v38 }
  0xbc   :  { %991 = vmatmul.bf16.gmra.mxu1 %v912_v6  ;;  %v1548_v49 = vor.u32 %v1547_v36, %v1544_v35 }
  0xbd   :  { %1142 = vmatmul.bf16.gmra.mxu2 %v1056_v39  ;;  %v1549_v39 = vrot.slane %v9748_v28, 1 }
  0xbe   :  { %1376 = vmatmul.bf16.gmra.mxu3 %v1297_v2 }
  0xbf   :  { %v1551_v50 = vor.u32 %v1550_v5, %v1549_v39 }
  0xc0   :  { %v568_v51 = vpop.f32.mrf.mxu2  ;;  %v294_v40 = vpop.f32.mrf.mxu0 }
  0xc1   :  { %v697_v30 = vpop.f32.mrf.mxu3  ;;  %v593_v33 = vadd.f32 %v568_v51, %v428_v42  ;;  %v429_v41 = vpop.f32.mrf.mxu1  ;;  %v1822_v42 = vrot.slane %v1820_v29, 2  ;;  %v1691_v51 = vrot.slane %v1690_v19, 2  ;;  %v1552_v58 = vsel %vm472_vm2, %v1548_v49, %v1551_v50  ;;  %v8845_v29 = vld [vmem:[#allocation9 + $0x1b0] sm:$0xff] }
  0xc2   :  { %v430_v26 = vadd.f32 %v429_v41, %v294_v40  ;;  %v1829_v40 = vor.u32 %v1828_v44, %v1827_v43  ;;  %2184 = vmatpush.bf16.msrb.mxu1 %v8845_v29  ;;  %v8836_v44 = vld [vmem:[#allocation9 + $0x168] sm:$0xff]  ;;  %v8842_v29 = vld [vmem:[#allocation9 + $0x198] sm:$0xff] }
  0xc3   :  { %v9725_v59 = vadd.f32 %v697_v30, %v593_v33  ;;  %v1692_v30 = vrot.slane %v9651_v11, 2  ;;  %v1826_v33 = vor.u32 %v1825_v3, %v1822_v42 }
  0xc5   :  { %v1693_v62 = vsel %vm623_vm3, %v1691_v51, %v1692_v30  ;;  %v1830_v63 = vsel %vm752_vm4, %v1826_v33, %v1829_v40 }
  0xc6   :  { %2185 = vmatpush.bf16.msrb.mxu1 %v8844_v4  ;;  %v1799_v4 = vld [vmem:[#allocation6 + $0x58] sm:$0x7] }
  0xc8   :  { %v570_v1 = vpop.f32.mrf.mxu2  ;;  %v297_v47 = vpop.f32.mrf.mxu0 }
  0xc9   :  { %v699_v7 = vpop.f32.mrf.mxu3  ;;  %v594_v8 = vadd.f32 %v570_v1, %v430_v26  ;;  %v432_v10 = vpop.f32.mrf.mxu1  ;;  %v9766_v1 = vshll.u32 %v9667_v31, 16 }
  0xca   :  { %v433_v20 = vadd.f32 %v432_v10, %v297_v47 }
  0xcb   :  { %v9739_v25 = vadd.f32 %v699_v7, %v594_v8  ;;  %867 = vmatmul.bf16.gmra.mxu0 %v785_v13  ;;  %v9769_v7 = vshrl.u32 %v9667_v31, 16  ;;  %v1832_v46 = vrot.slane %v9766_v1, 3 }
  0xcc   :  { %996 = vmatmul.bf16.gmra.mxu1 %v914_v15 }
  0xcd   :  { %1147 = vmatmul.bf16.gmra.mxu2 %v1065_v23  ;;  %v1553_v19 = vrot.slane %v9769_v7, 1  ;;  %v8837_v23 = vld [vmem:[#allocation9 + $0x170] sm:$0xff]  ;;  %v1831_v22 = vrot.slane %v9769_v7, 2 }
  0xce   :  { %1381 = vmatmul.bf16.gmra.mxu3 %v1299_v24  ;;  %2034 = vmatpush.bf16.msrb.mxu0 %v8837_v23 }
  0xcf   :  { %v1833_v17 = vor.u32 %v1832_v46, %v1831_v22  ;;  %v8834_v46 = vld [vmem:[#allocation9 + $0x158] sm:$0xff] }
  0xd0   :  { %v573_v32 = vpop.f32.mrf.mxu2  ;;  %v299_v6 = vpop.f32.mrf.mxu0 }
  0xd1   :  { %v702_v16 = vpop.f32.mrf.mxu3  ;;  %v595_v38 = vadd.f32 %v573_v32, %v433_v20  ;;  %v434_v12 = vpop.f32.mrf.mxu1  ;;  %v1554_v20 = vrot.slane %v9766_v1, 2  ;;  %v1408_v32 = vrot.slane %v9766_v1, 1  ;;  %v1834_v3 = vsel %vm752_vm4, %v1829_v40, %v1833_v17 }
  0xd2   :  { %v435_v2 = vadd.f32 %v434_v12, %v299_v6  ;;  %2035 = vmatpush.bf16.msrb.mxu0 %v8836_v44  ;;  %v1557_v40 = vrot.slane %v9790_v48, 1 }
  0xd3   :  { %v9755_v21 = vadd.f32 %v702_v16, %v595_v38  ;;  %v1555_v16 = vor.u32 %v1554_v20, %v1553_v19  ;;  %v1409_v39 = vsel %vm320_vm1, %v1404_v53, %v1408_v32  ;;  %v1412_v60 = vor.u32 %v9769_v7, %v1408_v32 }
  0xd4   :  { %v9812_v53 = vshll.u32 %v9700_v14, 16  ;;  %v9815_v32 = vshrl.u32 %v9700_v14, 16 }
  0xd5   :  { %v1556_v5 = vsel %vm472_vm2, %v1551_v50, %v1555_v16 }
  0xd8   :  { %v575_v41 = vpop.f32.mrf.mxu2  ;;  %v302_v26 = vpop.f32.mrf.mxu0 }
  0xd9   :  { %v704_v52 = vpop.f32.mrf.mxu3  ;;  %v596_v27 = vadd.f32 %v575_v41, %v435_v2  ;;  %v437_v55 = vpop.f32.mrf.mxu1  ;;  %v1695_v2 = vsel %vm623_vm3, %v1692_v30, %v1694_v34  ;;  %v1558_v41 = vrot.slane %v9787_v45, 2 }
  0xda   :  { %v438_v61 = vadd.f32 %v437_v55, %v302_v26  ;;  %v1836_v26 = vrot.slane %v9787_v45, 3 }
  0xdb   :  { %v9763_v0 = vadd.f32 %v704_v52, %v596_v27  ;;  %1495 = vmatmul.bf16.vlgmr.msra.gmra.mxu0 %v1401_v56  ;;  %v1835_v27 = vrot.slane %v9790_v48, 2  ;;  %v8835_v56 = vld [vmem:[#allocation9 + $0x160] sm:$0xff] }
  0xdc   :  { %1635 = vmatmul.bf16.vlgmr.msra.gmra.mxu1 %v1552_v58  ;;  %v8843_v58 = vld [vmem:[#allocation9 + $0x1a0] sm:$0xff]  ;;  %2036 = vmatpush.bf16.msrb.mxu0 %v8835_v56 }
  0xdd   :  { %1763 = vmatmul.bf16.vlgmr.msra.gmra.mxu2 %v1693_v62  ;;  %v1559_v62 = vor.u32 %v1558_v41, %v1557_v40  ;;  %2186 = vmatpush.bf16.msrb.mxu1 %v8843_v58  ;;  %v1698_v40 = vrot.slane %v9700_v14, 2  ;;  %v8831_v58 = vld [vmem:[#allocation9 + $0x140] sm:$0xff] }
  0xde   :  { %1913 = vmatmul.bf16.vlgmr.msra.gmra.mxu3 %v1830_v63  ;;  %v1696_v63 = vrot.slane %v9681_v37, 2 }
  0xdf   :  { %v1560_v20 = vsel %vm472_vm2, %v1555_v16, %v1559_v62 }
  0xe0   :  { %v578_v8 = vpop.f32.mrf.mxu2  ;;  %v304_v13 = vpop.f32.mrf.mxu0  ;;  %2037 = vmatpush.bf16.msrb.mxu0 %v8834_v46 }
  0xe1   :  { %v707_v47 = vpop.f32.mrf.mxu3  ;;  %v597_v10 = vadd.f32 %v578_v8, %v438_v61  ;;  %v439_v15 = vpop.f32.mrf.mxu1  ;;  %v1416_v61 = vrot.slane %v9787_v45, 1  ;;  %v1837_v8 = vor.u32 %v1836_v26, %v1835_v27  ;;  %2187 = vmatpush.bf16.msrb.mxu1 %v8842_v29  ;;  %v1817_v26 = vunpack.c.l.b16 %v1799_v4 }
  0xe2   :  { %v440_v24 = vadd.f32 %v439_v15, %v304_v13 }
  0xe3   :  { %v9775_v18 = vadd.f32 %v707_v47, %v597_v10  ;;  %v1417_v19 = vsel %vm320_vm1, %v1412_v60, %v1416_v61  ;;  %v1838_v22 = vsel %vm752_vm4, %v1833_v17, %v1837_v8  ;;  %v8839_v60 = vld [vmem:[#allocation9 + $0x180] sm:$0xff]  ;;  %v9835_v46 = vpack.c.b16 %v1817_v26, %v1817_v26 }
  0xe8   :  { %v580_v35 = vpop.f32.mrf.mxu2  ;;  %v307_v6 = vpop.f32.mrf.mxu0 }
  0xe9   :  { %v709_v36 = vpop.f32.mrf.mxu3  ;;  %v598_v38 = vadd.f32 %v580_v35, %v440_v24  ;;  %v442_v12 = vpop.f32.mrf.mxu1  ;;  %v1697_v24 = vsel %vm623_vm3, %v1694_v34, %v1696_v63  ;;  %v8841_v34 = vld [vmem:[#allocation9 + $0x190] sm:$0xff] }
  0xea   :  { %v443_v42 = vadd.f32 %v442_v12, %v307_v6  ;;  %v1561_v12 = vrot.slane %v9815_v32, 1  ;;  %2188 = vmatpush.bf16.msrb.mxu1 %v8841_v34 }
  0xeb   :  { %v9784_v43 = vadd.f32 %v709_v36, %v598_v38  ;;  %1500 = vmatmul.bf16.gmra.mxu0 %v1409_v39  ;;  %v8833_v36 = vld [vmem:[#allocation9 + $0x150] sm:$0xff]  ;;  %v1562_v39 = vrot.slane %v9812_v53, 2 }
  0xec   :  { %1640 = vmatmul.bf16.gmra.mxu1 %v1556_v5  ;;  %2038 = vmatpush.bf16.msrb.mxu0 %v8833_v36 }
  0xed   :  { %1768 = vmatmul.bf16.gmra.mxu2 %v1695_v2  ;;  %v1840_v2 = vrot.slane %v9812_v53, 3 }
  0xee   :  { %1918 = vmatmul.bf16.gmra.mxu3 %v1834_v3  ;;  %v1521_v3 = vld [vmem:[#allocation6 + $0x58] sm:$0x3] }
  0xef   :  { %v1539_v41 = vunpack.c.l.b16 %v1521_v3 }
  0xf0   :  { %v583_v49 = vpop.f32.mrf.mxu2  ;;  %v309_v30 = vpop.f32.mrf.mxu0 }
  0xf1   :  { %v712_v50 = vpop.f32.mrf.mxu3  ;;  %v599_v51 = vadd.f32 %v583_v49, %v443_v42  ;;  %v444_v33 = vpop.f32.mrf.mxu1  ;;  %v1839_v42 = vrot.slane %v9815_v32, 2  ;;  %v1420_v49 = vor.u32 %v9790_v48, %v1416_v61 }
  0xf2   :  { %v9794_v52 = vadd.f32 %v444_v33, %v309_v30  ;;  %v1424_v30 = vrot.slane %v9812_v53, 1  ;;  %v1563_v33 = vor.u32 %v1562_v39, %v1561_v12  ;;  %v1949_v12 = vld [vmem:[#allocation6 + $0x30] sm:$0x8] }
  0xf3   :  { %v9798_v55 = vadd.f32 %v712_v50, %v599_v51  ;;  %v8832_v50 = vld [vmem:[#allocation9 + $0x148] sm:$0xff]  ;;  %v1841_v27 = vor.u32 %v1840_v2, %v1839_v42  ;;  %v1967_v4 = vunpack.c.l.b16 %v1949_v12 }
  0xf4   :  { %v8840_v51 = vld [vmem:[#allocation9 + $0x188] sm:$0xff]  ;;  %2039 = vmatpush.bf16.msrb.mxu0 %v8832_v50  ;;  %v1425_v61 = vsel %vm320_vm1, %v1420_v49, %v1424_v30  ;;  %v1428_v49 = vor.u32 %v9815_v32, %v1424_v30 }
  0xf5   :  { %2189 = vmatpush.bf16.msrb.mxu1 %v8840_v51 }
  0xf8   :  { %v9803_v47 = vpop.f32.mrf.mxu2  ;;  %v312_v13 = vpop.f32.mrf.mxu0  ;;  %2040 = vmatpush.bf16.msrb.mxu0 %v8831_v58 }
  0xf9   :  { %v9805_v10 = vpop.f32.mrf.mxu3  ;;  %v447_v15 = vpop.f32.mrf.mxu1  ;;  %2190 = vmatpush.bf16.msrb.mxu1 %v8839_v60 }
  0xfa   :  { %v448_v23 = vadd.f32 %v447_v15, %v312_v13 }
  0xfb   :  { %1505 = vmatmul.bf16.gmra.mxu0 %v1417_v19  ;;  %v1564_v19 = vsel %vm472_vm2, %v1559_v62, %v1563_v33  ;;  %v1844_v62 = vshrl.u32 %v9835_v46, 16 }
  0xfc   :  { %1645 = vmatmul.bf16.gmra.mxu1 %v1560_v20  ;;  %v1699_v20 = vsel %vm623_vm3, %v1696_v63, %v1698_v40  ;;  %v1847_v63 = vshll.u32 %v9835_v46, 16 }
  0xfd   :  { %1773 = vmatmul.bf16.gmra.mxu2 %v1697_v24  ;;  %v1846_v42 = vrot.slane %v1844_v62, 2 }
  0xfe   :  { %1923 = vmatmul.bf16.gmra.mxu3 %v1838_v22  ;;  %v1842_v22 = vsel %vm752_vm4, %v1837_v8, %v1841_v27  ;;  %v1849_v2 = vrot.slane %v1847_v63, 3 }
 0x100   :  { %v588_v16 = vpop.f32.mrf.mxu2  ;;  %v314_v17 = vpop.f32.mrf.mxu0  ;;  %v1850_v26 = vor.u32 %v1849_v2, %v1846_v42 }
 0x101   :  { %v717_v35 = vpop.f32.mrf.mxu3  ;;  %v601_v38 = vadd.f32 %v588_v16, %v448_v23  ;;  %v449_v6 = vpop.f32.mrf.mxu1  ;;  %v1540_v23 = vpack.c.b16 %v1539_v41, %v1539_v41 }
 0x102   :  { %v9819_v5 = vadd.f32 %v449_v6, %v314_v17  ;;  %v1851_v30 = vsel %vm752_vm4, %v1841_v27, %v1850_v26 }
 0x103   :  { %v9823_v44 = vadd.f32 %v717_v35, %v601_v38  ;;  %v1566_v16 = vshrl.u32 %v1540_v23, 16  ;;  %v1569_v35 = vshll.u32 %v1540_v23, 16  ;;  %v1430_v38 = vshll.u32 %v9723_v57, 16 }
 0x104   :  { %v1700_v41 = vrot.slane %v1540_v23, 2  ;;  %v1968_v57 = vpack.c.b16 %v9649_v9, %v1967_v4 }
 0x105   :  { %v1568_v17 = vrot.slane %v1566_v16, 1  ;;  %v1571_v6 = vrot.slane %v1569_v35, 2  ;;  %v1432_v50 = vrot.slane %v1430_v38, 1 }
 0x106   :  { %v2098_v23 = vshrl.u32 %v1968_v57, 16 }
 0x107   :  { %v1572_v51 = vor.u32 %v1571_v6, %v1568_v17 }
 0x108   :  { %v9828_v56 = vpop.f32.mrf.mxu2  ;;  %v848_v13 = vpop.f32.mrf.mxu0 }
 0x109   :  { %v977_v15 = vpop.f32.mrf.mxu1  ;;  %v873_v24 = vadd.f32 %v848_v13, %v9725_v59  ;;  %v9859_v62 = vpop.f32.mrf.mxu3 }
 0x10b   :  { %v1002_v29 = vadd.f32 %v977_v15, %v873_v24  ;;  %1510 = vmatmul.bf16.gmra.mxu0 %v1425_v61  ;;  %v1433_v15 = vsel %vm320_vm1, %v1428_v49, %v1432_v50  ;;  %v2101_v24 = vshll.u32 %v1968_v57, 16  ;;  %v2109_v50 = vrot.slane %v9769_v7, 3 }
 0x10c   :  { %1650 = vmatmul.bf16.gmra.mxu1 %v1564_v19  ;;  %v1701_v19 = vsel %vm623_vm3, %v1698_v40, %v1700_v41  ;;  %v2106_v40 = vrot.slane %v9745_v54, 4 }
 0x10d   :  { %1778 = vmatmul.bf16.gmra.mxu2 %v1699_v20 }
 0x10e   :  { %1928 = vmatmul.bf16.gmra.mxu3 %v1842_v22  ;;  %v2100_v22 = vrot.slane %v2098_v23, 3  ;;  %v2113_v23 = vrot.slane %v9790_v48, 3 }
 0x110   :  { %v1128_v36 = vpop.f32.mrf.mxu2  ;;  %v850_v59 = vpop.f32.mrf.mxu0 }
 0x111   :  { %v9839_v34 = vadd.f32 %v1128_v36, %v1002_v29  ;;  %v979_v8 = vpop.f32.mrf.mxu1  ;;  %v874_v39 = vadd.f32 %v850_v59, %v9739_v25  ;;  %v1573_v25 = vsel %vm472_vm2, %v1563_v33, %v1572_v51  ;;  %v2103_v33 = vrot.slane %v2101_v24, 4  ;;  %v1362_v42 = vpop.f32.mrf.mxu3 }
 0x112   :  { %v1969_v36 = vrot.slane %v1968_v57, 3  ;;  %v1970_v59 = vrot.slane %v9651_v11, 3  ;;  %v2110_v51 = vrot.slane %v9766_v1, 4  ;;  %v1972_v57 = vrot.slane %v9667_v31, 3 }
 0x113   :  { %v9843_v3 = vadd.f32 %v979_v8, %v874_v39  ;;  %v2104_v8 = vor.u32 %v2103_v33, %v2100_v22  ;;  %v2114_v24 = vrot.slane %v9787_v45, 4  ;;  %v1974_v22 = vrot.slane %v9681_v37, 3 }
 0x114   :  { %v1971_v39 = vsel %vm903_vm6, %v1969_v36, %v1970_v59 }
 0x118   :  { %v9846_v58 = vpop.f32.mrf.mxu2  ;;  %v853_v60 = vpop.f32.mrf.mxu0 }
 0x119   :  { %v982_v13 = vpop.f32.mrf.mxu1  ;;  %v875_v61 = vadd.f32 %v853_v60, %v9755_v21  ;;  %v2105_v21 = vrot.slane %v9748_v28, 3  ;;  %v9877_v60 = vpop.f32.mrf.mxu3 }
 0x11b   :  { %v1004_v20 = vadd.f32 %v982_v13, %v875_v61  ;;  %1515 = vmatmul.bf16.gmra.mxu0 %v1433_v15  ;;  %v2107_v38 = vor.u32 %v2106_v40, %v2105_v21  ;;  %v1973_v61 = vsel %vm903_vm6, %v1970_v59, %v1972_v57  ;;  %v1975_v21 = vsel %vm903_vm6, %v1972_v57, %v1974_v22 }
 0x11c   :  { %1655 = vmatmul.bf16.gmra.mxu1 %v1573_v25 }
 0x11d   :  { %1783 = vmatmul.bf16.gmra.mxu2 %v1701_v19  ;;  %v2108_v28 = vsel %vm1032_vm5, %v2104_v8, %v2107_v38 }
 0x11e   :  { %1933 = vmatmul.bf16.gmra.mxu3 %v1851_v30 }
 0x120   :  { %v1133_v9 = vpop.f32.mrf.mxu2  ;;  %v855_v16 = vpop.f32.mrf.mxu0 }
 0x121   :  { %v9854_v29 = vadd.f32 %v1133_v9, %v1004_v20  ;;  %v984_v35 = vpop.f32.mrf.mxu1  ;;  %v876_v27 = vadd.f32 %v855_v16, %v9763_v0  ;;  %v1367_v9 = vpop.f32.mrf.mxu3  ;;  %v2115_v16 = vor.u32 %v2114_v24, %v2113_v23 }
 0x123   :  { %v9861_v63 = vadd.f32 %v984_v35, %v876_v27 }
 0x128   :  { %v9864_v17 = vpop.f32.mrf.mxu2  ;;  %v858_v6 = vpop.f32.mrf.mxu0 }
 0x129   :  { %v987_v12 = vpop.f32.mrf.mxu1  ;;  %v877_v54 = vadd.f32 %v858_v6, %v9775_v18  ;;  %v2111_v18 = vor.u32 %v2110_v51, %v2109_v50  ;;  %v9898_v36 = vpop.f32.mrf.mxu3  ;;  %v2118_v6 = vrot.slane %v9812_v53, 4 }
 0x12b   :  { %v1006_v0 = vadd.f32 %v987_v12, %v877_v54  ;;  %2041 = vmatmul.bf16.vlgmr.msrb.gmra.mxu0 %v1971_v39  ;;  %v2112_v19 = vsel %vm1032_vm5, %v2107_v38, %v2111_v18  ;;  %v2116_v40 = vsel %vm1032_vm5, %v2111_v18, %v2115_v16  ;;  %v2117_v38 = vrot.slane %v9815_v32, 3  ;;  %v2077_v12 = vld [vmem:[#allocation6 + $0x58] sm:$0xf] }
 0x12c   :  { %2191 = vmatmul.bf16.vlgmr.msrb.gmra.mxu1 %v2108_v28  ;;  %v1976_v39 = vrot.slane %v9700_v14, 3  ;;  %v2095_v28 = vunpack.c.l.b16 %v2077_v12 }
 0x12e   :  { %v2096_v50 = vpack.c.b16 %v2095_v28, %v2095_v28 }
 0x130   :  { %v1138_v2 = vpop.f32.mrf.mxu2  ;;  %v860_v11 = vpop.f32.mrf.mxu0  ;;  %v2122_v32 = vshrl.u32 %v2096_v50, 16  ;;  %v2125_v53 = vshll.u32 %v2096_v50, 16 }
 0x131   :  { %v9869_v4 = vadd.f32 %v1138_v2, %v1006_v0  ;;  %v989_v49 = vpop.f32.mrf.mxu1  ;;  %v878_v41 = vadd.f32 %v860_v11, %v9784_v43  ;;  %v1372_v54 = vpop.f32.mrf.mxu3  ;;  %v1977_v11 = vsel %vm903_vm6, %v1974_v22, %v1976_v39 }
 0x133   :  { %v9874_v26 = vadd.f32 %v989_v49, %v878_v41 }
 0x138   :  { %v9879_v13 = vpop.f32.mrf.mxu2  ;;  %v863_v15 = vpop.f32.mrf.mxu0 }
 0x139   :  { %v992_v25 = vpop.f32.mrf.mxu1  ;;  %v879_v7 = vadd.f32 %v863_v15, %v9798_v55  ;;  %v9913_v57 = vpop.f32.mrf.mxu3  ;;  %v2124_v15 = vrot.slane %v2122_v32, 3 }
 0x13b   :  { %v1008_v1 = vadd.f32 %v992_v25, %v879_v7  ;;  %2046 = vmatmul.bf16.gmra.mxu0 %v1973_v61  ;;  %v2127_v25 = vrot.slane %v2125_v53, 4  ;;  %v1978_v61 = vrot.slane %v9835_v46, 3 }
 0x13c   :  { %2196 = vmatmul.bf16.gmra.mxu1 %v2112_v19 }
 0x13d   :  { %v2128_v19 = vor.u32 %v2127_v25, %v2124_v15 }
 0x140   :  { %v1143_v43 = vpop.f32.mrf.mxu2  ;;  %v9886_v31 = vpop.f32.mrf.mxu0 }
 0x141   :  { %v9884_v30 = vadd.f32 %v1143_v43, %v1008_v1  ;;  %v9888_v20 = vpop.f32.mrf.mxu1  ;;  %v1377_v23 = vpop.f32.mrf.mxu3 }
 0x148   :  { %v9893_v35 = vpop.f32.mrf.mxu2  ;;  %v868_v55 = vpop.f32.mrf.mxu0 }
 0x149   :  { %v997_v33 = vpop.f32.mrf.mxu1  ;;  %v881_v27 = vadd.f32 %v868_v55, %v9823_v44  ;;  %v2119_v44 = vor.u32 %v2118_v6, %v2117_v38 }
 0x14b   :  { %v1010_v59 = vadd.f32 %v997_v33, %v881_v27  ;;  %2051 = vmatmul.bf16.gmra.mxu0 %v1975_v21  ;;  %v2120_v49 = vsel %vm1032_vm5, %v2115_v16, %v2119_v44  ;;  %v2129_v43 = vsel %vm1032_vm5, %v2119_v44, %v2128_v19  ;;  %v9926_v33 = vpop.f32.mrf.mxu3 }
 0x14c   :  { %2201 = vmatmul.bf16.gmra.mxu1 %v2116_v40 }
 0x150   :  { %v1148_v45 = vpop.f32.mrf.mxu2  ;;  %v9902_v37 = vpop.f32.mrf.mxu0 }
 0x151   :  { %v9900_v48 = vadd.f32 %v1148_v45, %v1010_v59  ;;  %v9904_v8 = vpop.f32.mrf.mxu1 }
 0x153   :  { %10452 = vst [vmem:[#allocation23_spill] sm:$0xff] %v9900_v48  ;;  %v1382_v59 = vpop.f32.mrf.mxu3 }
 0x158   :  { %v1496_v0 = vpop.f32.mrf.mxu0 }
 0x159   :  { %v1636_v2 = vpop.f32.mrf.mxu1  ;;  %v1497_v51 = vadd.f32 %v1496_v0, %v1362_v42  ;;  %v1979_v42 = vsel %vm903_vm6, %v1976_v39, %v1978_v61 }
 0x15b   :  { %v9911_v41 = vadd.f32 %v1636_v2, %v1497_v51  ;;  %2056 = vmatmul.bf16.gmra.mxu0 %v1977_v11  ;;  %v9936_v6 = vpop.f32.mrf.mxu3 }
 0x15c   :  { %2206 = vmatmul.bf16.gmra.mxu1 %v2120_v49  ;;  %10454 = vst [vmem:[#allocation25_spill] sm:$0xff] %v9936_v6  ;;  %v9976_v6 = vadd.f32 %v9846_v58, %v9843_v3 }
 0x160   :  { %v9915_v14 = vpop.f32.mrf.mxu0 }
 0x161   :  { %v9917_v18 = vpop.f32.mrf.mxu1 }
 0x163   :  { %v9944_v11 = vpop.f32.mrf.mxu3 }
 0x168   :  { %v1501_v7 = vpop.f32.mrf.mxu0 }
 0x169   :  { %v1641_v1 = vpop.f32.mrf.mxu1  ;;  %v1502_v24 = vadd.f32 %v1501_v7, %v1367_v9  ;;  %v9934_v9 = vpop.f32.mrf.mxu2 }
 0x16a   :  { %10453 = vst [vmem:[#allocation24_spill] sm:$0xff] %v9934_v9  ;;  %v1499_v9 = vadd.f32 %v9915_v14, %v9877_v60 }
 0x16b   :  { %v9922_v22 = vadd.f32 %v1641_v1, %v1502_v24  ;;  %2061 = vmatmul.bf16.gmra.mxu0 %v1979_v42  ;;  %v1916_v53 = vpop.f32.mrf.mxu3 }
 0x16c   :  { %2211 = vmatmul.bf16.gmra.mxu1 %v2129_v43  ;;  %v1662_v58 = vadd.f32 %v9917_v18, %v1499_v9  ;;  %v10010_v9 = vadd.f32 %v9879_v13, %v9874_v26 }
 0x170   :  { %v1503_v16 = vpop.f32.mrf.mxu0 }
 0x171   :  { %v9924_v55 = vpop.f32.mrf.mxu1  ;;  %v1764_v0 = vpop.f32.mrf.mxu2  ;;  %v1504_v60 = vadd.f32 %v1503_v16, %v9898_v36 }
 0x172   :  { %v1789_v36 = vadd.f32 %v1764_v0, %v9911_v41 }
 0x173   :  { %v1919_v7 = vpop.f32.mrf.mxu3 }
 0x178   :  { %v1506_v21 = vpop.f32.mrf.mxu0 }
 0x179   :  { %v1646_v46 = vpop.f32.mrf.mxu1  ;;  %v1507_v40 = vadd.f32 %v1506_v21, %v1372_v54  ;;  %v1766_v49 = vpop.f32.mrf.mxu2 }
 0x17b   :  { %v9928_v27 = vadd.f32 %v1646_v46, %v1507_v40 }
 0x180   :  { %v9930_v45 = vpop.f32.mrf.mxu0 }
 0x181   :  { %v9932_v38 = vpop.f32.mrf.mxu1  ;;  %v1769_v19 = vpop.f32.mrf.mxu2 }
 0x182   :  { %v1791_v16 = vadd.f32 %v1769_v19, %v9922_v22 }
 0x188   :  { %v1511_v12 = vpop.f32.mrf.mxu0 }
 0x189   :  { %v1651_v39 = vpop.f32.mrf.mxu1  ;;  %v1512_v44 = vadd.f32 %v1511_v12, %v1377_v23  ;;  %v1771_v43 = vpop.f32.mrf.mxu2 }
 0x18a   :  { %v9956_v23 = vpop.f32.mrf.mxu3 }
 0x18b   :  { %v9938_v28 = vadd.f32 %v1651_v39, %v1512_v44 }
 0x190   :  { %v9940_v2 = vpop.f32.mrf.mxu0 }
 0x191   :  { %v9942_v54 = vpop.f32.mrf.mxu1  ;;  %v1774_v46 = vpop.f32.mrf.mxu2 }
 0x192   :  { %v9962_v12 = vpop.f32.mrf.mxu3 }
 0x198   :  { %v1516_v50 = vpop.f32.mrf.mxu0 }
 0x199   :  { %v1656_v51 = vpop.f32.mrf.mxu1  ;;  %v1517_v32 = vadd.f32 %v1516_v50, %v1382_v59  ;;  %v1776_v39 = vpop.f32.mrf.mxu2 }
 0x19b   :  { %v9946_v15 = vadd.f32 %v1656_v51, %v1517_v32  ;;  %v9968_v51 = vpop.f32.mrf.mxu3 }
 0x19c   :  { %10459 = vst [vmem:[#allocation30_spill] sm:$0xff] %v9968_v51 }
 0x19d   :  { %10455 = vst [vmem:[#allocation26_spill] sm:$0xff] %v9946_v15  ;;  %v600_v15 = vadd.f32 %v9803_v47, %v9794_v52  ;;  %v1179_v52 = vmul.f32 %v9839_v34, %v9839_v34  ;;  %v1181_v47 = vmul.f32 %v9854_v29, %v9854_v29 }
 0x19f   :  { %v729_v3 = vadd.f32 %v9805_v10, %v600_v15  ;;  %v1163_v10 = vadd.f32 %v9976_v6, %v9839_v34 }
 0x1a0   :  { %v9948_v25 = vpop.f32.mrf.mxu0 }
 0x1a1   :  { %10456 = vst [vmem:[#allocation27_spill] sm:$0xff] %v9948_v25  ;;  %v9950_v61 = vpop.f32.mrf.mxu1  ;;  %v1779_v25 = vpop.f32.mrf.mxu2 }
 0x1a2   :  { %10457 = vst [vmem:[#allocation28_spill] sm:$0xff] %v9950_v61 }
 0x1a3   :  { %v9978_v48 = vpop.f32.mrf.mxu3 }
 0x1a8   :  { %v9952_v1 = vpop.f32.mrf.mxu0 }
 0x1a9   :  { %v9954_v42 = vpop.f32.mrf.mxu1  ;;  %v1781_v14 = vpop.f32.mrf.mxu2 }
 0x1ab   :  { %v1931_v15 = vpop.f32.mrf.mxu3 }
 0x1b0   :  { %v2044_v24 = vpop.f32.mrf.mxu0 }
 0x1b1   :  { %v9958_v21 = vpop.f32.mrf.mxu1 }
 0x1b8   :  { %v2047_v40 = vpop.f32.mrf.mxu0 }
 0x1b9   :  { %v9960_v59 = vpop.f32.mrf.mxu1 }
 0x1c0   :  { %v9964_v44 = vpop.f32.mrf.mxu0 }
 0x1c1   :  { %v9966_v50 = vpop.f32.mrf.mxu1 }
 0x1c2   :  { %10458 = vst [vmem:[#allocation29_spill] sm:$0xff] %v9966_v50 }
 0x1c8   :  { %v9970_v32 = vpop.f32.mrf.mxu0 }
 0x1c9   :  { %10460 = vst [vmem:[#allocation31_spill] sm:$0xff] %v9970_v32  ;;  %v9972_v61 = vpop.f32.mrf.mxu1  ;;  %v9992_v32 = vadd.f32 %v9864_v17, %v9861_v63  ;;  %v1790_v63 = vadd.f32 %v1766_v49, %v1662_v58  ;;  %v1509_v49 = vadd.f32 %v9930_v45, %v9913_v57  ;;  %v1941_v45 = vadd.f32 %v1919_v7, %v1791_v16 }
 0x1ca   :  { %10461 = vst [vmem:[#allocation32_spill] sm:$0xff] %v9972_v61  ;;  %v1180_v61 = vmul.f32 %v9976_v6, %v9976_v6 }
 0x1cb   :  { %v1182_v18 = vmul.f32 %v9992_v32, %v9992_v32  ;;  %v1940_v13 = vadd.f32 %v1916_v53, %v1790_v63  ;;  %v1793_v53 = vadd.f32 %v1774_v46, %v9928_v27  ;;  %v1784_v63 = vpop.f32.mrf.mxu2 }
 0x1cc   :  { %v1189_v17 = vadd.f32 %v1180_v61, %v1179_v52  ;;  %v1514_v52 = vadd.f32 %v9940_v2, %v9926_v33  ;;  %v1795_v2 = vadd.f32 %v1779_v25, %v9938_v28 }
 0x1d0   :  { %v9984_v50 = vpop.f32.mrf.mxu0  ;;  %v10465_v25 = vld [vmem:[#allocation31_spill] sm:$0xff] }
 0x1d1   :  { %10462 = vst [vmem:[#allocation33_spill] sm:$0xff] %v9984_v50  ;;  %v9986_v51 = vpop.f32.mrf.mxu1  ;;  %v880_v50 = vadd.f32 %v9886_v31, %v729_v3  ;;  %v1664_v31 = vadd.f32 %v9924_v55, %v1504_v60  ;;  %v1183_v3 = vmul.f32 %v9869_v4, %v9869_v4  ;;  %v1184_v55 = vmul.f32 %v10010_v9, %v10010_v9 }
 0x1d2   :  { %10463 = vst [vmem:[#allocation34_spill] sm:$0xff] %v9986_v51  ;;  %v602_v51 = vadd.f32 %v9828_v56, %v9819_v5  ;;  %v1164_v5 = vadd.f32 %v1163_v10, %v9854_v29  ;;  %v1190_v56 = vadd.f32 %v1189_v17, %v1181_v47 }
 0x1d3   :  { %v1009_v26 = vadd.f32 %v9888_v20, %v880_v50  ;;  %v1792_v58 = vadd.f32 %v1771_v43, %v1664_v31  ;;  %v1666_v50 = vadd.f32 %v9932_v38, %v1509_v49 }
 0x1d4   :  { %v731_v61 = vadd.f32 %v9859_v62, %v602_v51  ;;  %v1165_v22 = vadd.f32 %v1164_v5, %v9992_v32  ;;  %v1191_v19 = vadd.f32 %v1190_v56, %v1182_v18  ;;  %v1939_v62 = vadd.f32 %v9944_v11, %v1789_v36  ;;  %v10466_v5 = vld [vmem:[#allocation24_spill] sm:$0xff] }
 0x1d5   :  { %v10028_v57 = vadd.f32 %v9893_v35, %v1009_v26  ;;  %v2068_v51 = vadd.f32 %v2044_v24, %v1940_v13  ;;  %v2069_v35 = vadd.f32 %v2047_v40, %v1941_v45  ;;  %v1185_v11 = vmul.f32 %v9884_v30, %v9884_v30 }
 0x1d6   :  { %v1166_v20 = vadd.f32 %v1165_v22, %v9869_v4  ;;  %v1192_v47 = vadd.f32 %v1191_v19, %v1183_v3  ;;  %v882_v60 = vadd.f32 %v9902_v37, %v731_v61  ;;  %v2067_v43 = vadd.f32 %v9952_v1, %v1939_v62  ;;  %v10468_v3 = vld [vmem:[#allocation29_spill] sm:$0xff]  ;;  %v10470_v22 = vld [vmem:[#allocation23_spill] sm:$0xff] }
 0x1d7   :  { %v1942_v7 = vadd.f32 %v9956_v23, %v1792_v58  ;;  %v1794_v24 = vadd.f32 %v1776_v39, %v1666_v50  ;;  %v1186_v38 = vmul.f32 %v10028_v57, %v10028_v57  ;;  %v10045_v33 = vadd.f32 %v9958_v21, %v2068_v51  ;;  %v10472_v58 = vld [vmem:[#allocation27_spill] sm:$0xff] }
 0x1d8   :  { %v2057_v41 = vpop.f32.mrf.mxu0  ;;  %v1167_v27 = vadd.f32 %v1166_v20, %v10010_v9  ;;  %v1193_v46 = vadd.f32 %v1192_v47, %v1184_v55  ;;  %v1943_v37 = vadd.f32 %v9962_v12, %v1793_v53  ;;  %v1668_v1 = vadd.f32 %v9942_v54, %v1514_v52  ;;  %v10464_v12 = vld [vmem:[#allocation30_spill] sm:$0xff]  ;;  %v10471_v55 = vld [vmem:[#allocation25_spill] sm:$0xff]  ;;  %v10473_v53 = vld [vmem:[#allocation32_spill] sm:$0xff] }
 0x1d9   :  { %v10022_v0 = vpop.f32.mrf.mxu1  ;;  %v2070_v40 = vadd.f32 %v9964_v44, %v1942_v7  ;;  %v1011_v39 = vadd.f32 %v9904_v8, %v882_v60  ;;  %v10054_v10 = vadd.f32 %v9954_v42, %v2067_v43  ;;  %v10057_v17 = vadd.f32 %v9960_v59, %v2069_v35  ;;  %v10467_v8 = vld [vmem:[#allocation26_spill] sm:$0xff]  ;;  %v1934_v42 = vpop.f32.mrf.mxu3 }
 0x1da   :  { %v1168_v23 = vadd.f32 %v1167_v27, %v9884_v30  ;;  %v1194_v36 = vadd.f32 %v1193_v46, %v1185_v11  ;;  %v1944_v16 = vadd.f32 %v10464_v12, %v1794_v24  ;;  %v1796_v28 = vadd.f32 %v1781_v14, %v1668_v1  ;;  %v10469_v14 = vld [vmem:[#allocation33_spill] sm:$0xff]  ;;  %v1786_v11 = vpop.f32.mrf.mxu2  ;;  %v10474_v24 = vld [vmem:[#allocation34_spill] sm:$0xff] }
 0x1db   :  { %v2071_v54 = vadd.f32 %v10465_v25, %v1943_v37  ;;  %v10063_v56 = vadd.f32 %v10466_v5, %v1011_v39  ;;  %v1797_v31 = vadd.f32 %v1784_v63, %v10467_v8  ;;  %v2244_v59 = vmul.f32 %v10045_v33, %v10045_v33 }
 0x1dc   :  { %v1169_v44 = vadd.f32 %v1168_v23, %v10028_v57  ;;  %v1195_v49 = vadd.f32 %v1194_v36, %v1186_v38  ;;  %v1945_v61 = vadd.f32 %v9978_v48, %v1795_v2  ;;  %v10070_v26 = vadd.f32 %v10468_v3, %v2070_v40  ;;  %v10475_v38 = vld [vmem:[#allocation28_spill] sm:$0xff] }
 0x1dd   :  { %v2072_v13 = vadd.f32 %v10469_v14, %v1944_v16  ;;  %v1187_v19 = vmul.f32 %v10470_v22, %v10470_v22  ;;  %v1519_v62 = vadd.f32 %v10472_v58, %v10471_v55  ;;  %v2243_v45 = vmul.f32 %v10054_v10, %v10054_v10 }
 0x1de   :  { %v2245_v51 = vmul.f32 %v10057_v17, %v10057_v17  ;;  %v1946_v20 = vadd.f32 %v1931_v15, %v1796_v28  ;;  %v2227_v48 = vadd.f32 %v10045_v33, %v10054_v10  ;;  %v10084_v50 = vadd.f32 %v10473_v53, %v2071_v54 }
 0x1df   :  { %v2073_v52 = vadd.f32 %v2057_v41, %v1945_v61  ;;  %v1170_v47 = vadd.f32 %v1169_v44, %v10470_v22  ;;  %v1188_v60 = vmul.f32 %v10063_v56, %v10063_v56  ;;  %v1947_v43 = vadd.f32 %v1934_v42, %v1797_v31 }
 0x1e0   :  { %v2059_v21 = vpop.f32.mrf.mxu0  ;;  %v2253_v35 = vadd.f32 %v2244_v59, %v2243_v45  ;;  %v2228_v7 = vadd.f32 %v2227_v48, %v10057_v17  ;;  %v2246_v15 = vmul.f32 %v10070_v26, %v10070_v26  ;;  %v10093_v63 = vadd.f32 %v10474_v24, %v2072_v13  ;;  %v8862_v24 = vld [vmem:[#allocation11 + $0x78] sm:$0xff] }
 0x1e1   :  { %v2209_v18 = vpop.f32.mrf.mxu1  ;;  %v2074_v27 = vadd.f32 %v2059_v21, %v1946_v20  ;;  %v1196_v46 = vadd.f32 %v1195_v49, %v1187_v19  ;;  %v1171_v41 = vadd.f32 %v1170_v47, %v10063_v56  ;;  %v1670_v37 = vadd.f32 %v10475_v38, %v1519_v62  ;;  %v1936_v8 = vpop.f32.mrf.mxu3  ;;  %2553 = vmatpush.bf16.msrb.mxu2 %v8862_v24  ;;  %v8857_v24 = vld [vmem:[#allocation11 + $0x50] sm:$0xff] }
 0x1e2   :  { %v2254_v2 = vadd.f32 %v2253_v35, %v2245_v51  ;;  %v2229_v23 = vadd.f32 %v2228_v7, %v10070_v26  ;;  %v2247_v39 = vmul.f32 %v10084_v50, %v10084_v50  ;;  %v10101_v36 = vadd.f32 %v10022_v0, %v2073_v52 }
 0x1e3   :  { %v1197_v16 = vadd.f32 %v1196_v46, %v1188_v60  ;;  %v1798_v28 = vadd.f32 %v1786_v11, %v1670_v37  ;;  %v2248_v54 = vmul.f32 %v10093_v63, %v10093_v63  ;;  %v10106_v44 = vadd.f32 %v2209_v18, %v2074_v27  ;;  %v8854_v27 = vld [vmem:[#allocation11 + $0x38] sm:$0xff] }
 0x1e4   :  { %v2255_v21 = vadd.f32 %v2254_v2, %v2246_v15  ;;  %v2230_v25 = vadd.f32 %v2229_v23, %v10084_v50  ;;  %v1172_v5 = vrot.slane %v1171_v41, 4  ;;  %v2249_v0 = vmul.f32 %v10101_v36, %v10101_v36  ;;  %v8894_v46 = vld [vmem:[#allocation11 + $0x78] sm:$0xff]  ;;  %2624 = vmatpush.bf16.msrb.mxu3 %v8854_v27  ;;  %v8849_v27 = vld [vmem:[#allocation11 + $0x10] sm:$0xff] }
 0x1e5   :  { %v1198_v49 = vrot.slane %v1197_v16, 4  ;;  %v1948_v61 = vadd.f32 %v1936_v8, %v1798_v28  ;;  %v2250_v13 = vmul.f32 %v10106_v44, %v10106_v44  ;;  %v8886_v2 = vld [vmem:[#allocation11 + $0x38] sm:$0xff]  ;;  %2997 = vmatpush.bf16.msra.mxu0 %v8894_v46  ;;  %v8889_v46 = vld [vmem:[#allocation11 + $0x50] sm:$0xff] }
 0x1e6   :  { %v2256_v31 = vadd.f32 %v2255_v21, %v2247_v39  ;;  %v2231_v42 = vadd.f32 %v2230_v25, %v10093_v63  ;;  %v1173_v18 = vadd.f32 %v1172_v5, %v1171_v41  ;;  %3068 = vmatpush.bf16.msra.mxu1 %v8886_v2  ;;  %v8861_v39 = vld [vmem:[#allocation11 + $0x70] sm:$0xff]  ;;  %v8848_v2 = vld [vmem:[#allocation11 + $0x8] sm:$0xff] }
 0x1e7   :  { %v1199_v20 = vadd.f32 %v1198_v49, %v1197_v16  ;;  %v8893_v16 = vld [vmem:[#allocation11 + $0x70] sm:$0xff]  ;;  %2554 = vmatpush.bf16.msrb.mxu2 %v8861_v39  ;;  %v8892_v49 = vld [vmem:[#allocation11 + $0x68] sm:$0xff]  ;;  %v8847_v39 = vld [vmem:[#allocation11] sm:$0xff] }
 0x1e8   :  { %v2062_v1 = vpop.f32.mrf.mxu0  ;;  %v2257_v3 = vadd.f32 %v2256_v31, %v2248_v54  ;;  %v2232_v14 = vadd.f32 %v2231_v42, %v10101_v36  ;;  %v1174_v47 = vrot.slane %v1173_v18, 2  ;;  %v8885_v54 = vld [vmem:[#allocation11 + $0x30] sm:$0xff]  ;;  %v8860_v42 = vld [vmem:[#allocation11 + $0x68] sm:$0xff] }
 0x1e9   :  { %v2212_v40 = vpop.f32.mrf.mxu1  ;;  %v2075_v12 = vadd.f32 %v2062_v1, %v1947_v43  ;;  %v1200_v11 = vrot.slane %v1199_v20, 2  ;;  %2998 = vmatpush.bf16.msra.mxu0 %v8893_v16  ;;  %v8887_v16 = vld [vmem:[#allocation11 + $0x40] sm:$0xff] }
 0x1ea   :  { %v2258_v55 = vadd.f32 %v2257_v3, %v2249_v0  ;;  %v2233_v58 = vadd.f32 %v2232_v14, %v10106_v44  ;;  %v1175_v41 = vadd.f32 %v1174_v47, %v1173_v18  ;;  %3069 = vmatpush.bf16.msra.mxu1 %v8885_v54  ;;  %v8852_v0 = vld [vmem:[#allocation11 + $0x28] sm:$0xff] }
 0x1eb   :  { %v10111_v59 = vadd.f32 %v2212_v40, %v2075_v12  ;;  %v1201_v1 = vadd.f32 %v1200_v11, %v1199_v20  ;;  %v8853_v12 = vld [vmem:[#allocation11 + $0x30] sm:$0xff]  ;;  %2555 = vmatpush.bf16.msrb.mxu2 %v8860_v42 }
 0x1ec   :  { %v2259_v48 = vadd.f32 %v2258_v55, %v2250_v13  ;;  %v1176_v28 = vrot.slane %v1175_v41, 1  ;;  %2625 = vmatpush.bf16.msrb.mxu3 %v8853_v12  ;;  %v8884_v13 = vld [vmem:[#allocation11 + $0x28] sm:$0xff]  ;;  %v9412_v12 = vmov 0.0  }
 0x1ed   :  { %v2251_v62 = vmul.f32 %v10111_v59, %v10111_v59  ;;  %v2234_v53 = vadd.f32 %v2233_v58, %v10111_v59  ;;  %v1202_v5 = vrot.slane %v1201_v1, 1  ;;  %2999 = vmatpush.bf16.msra.mxu0 %v8892_v49  ;;  %v8859_v58 = vld [vmem:[#allocation11 + $0x60] sm:$0xff]  ;;  %1215 = vst [vmem:[#allocation2] sm:$0x1] %v9412_v12 }
 0x1ee   :  { %3070 = vmatpush.bf16.msra.mxu1 %v8884_v13  ;;  %1216 = vst [vmem:[#allocation2 + $0x51] sm:$0x7f] %v9412_v12 }
 0x1ef   :  { %v2260_v60 = vadd.f32 %v2259_v48, %v2251_v62  ;;  %v1203_v18 = vadd.f32 %v1202_v5, %v1201_v1  ;;  %v8851_v62 = vld [vmem:[#allocation11 + $0x20] sm:$0xff]  ;;  %2556 = vmatpush.bf16.msrb.mxu2 %v8859_v58  ;;  %v8888_v1 = vld [vmem:[#allocation11 + $0x48] sm:$0xff]  ;;  %2279 = vst [vmem:[#allocation2 + $0x58] sm:$0x1] %v9412_v12 }
 0x1f0   :  { %v2064_v19 = vpop.f32.mrf.mxu0  ;;  %2626 = vmatpush.bf16.msrb.mxu3 %v8852_v0  ;;  %v8883_v48 = vld [vmem:[#allocation11 + $0x20] sm:$0xff]  ;;  %2280 = vst [vmem:[#allocation2 + $0xa9] sm:$0x7f] %v9412_v12 }
 0x1f1   :  { %v2076_v45 = vadd.f32 %v2064_v19, %v1948_v61  ;;  %v2214_v51 = vpop.f32.mrf.mxu1  ;;  %v1177_v61 = vadd.f32 %v1176_v28, %v1175_v41  ;;  %v8879_v28 = vld [vmem:[#allocation11] sm:$0xff]  ;;  %2889 = vst [vmem:[#allocation3] sm:$0x1] %v9412_v12 }
 0x1f2   :  { %3071 = vmatpush.bf16.msra.mxu1 %v8883_v48  ;;  %2890 = vst [vmem:[#allocation3 + $0x29] sm:$0x7f] %v9412_v12 }
 0x1f3   :  { %v10120_v52 = vadd.f32 %v2214_v51, %v2076_v45  ;;  %v8891_v45 = vld [vmem:[#allocation11 + $0x60] sm:$0xff]  ;;  %3333 = vst [vmem:[#allocation3 + $0x30] sm:$0x1] %v9412_v12 }
 0x1f4   :  { %2627 = vmatpush.bf16.msrb.mxu3 %v8851_v62  ;;  %3000 = vmatpush.bf16.msra.mxu0 %v8891_v45  ;;  %3334 = vst [vmem:[#allocation3 + $0x59] sm:$0x7f] %v9412_v12 }
 0x1f5   :  { %v2235_v43 = vadd.f32 %v2234_v53, %v10120_v52  ;;  %v2252_v35 = vmul.f32 %v10120_v52, %v10120_v52  ;;  %3824 = vst [vmem:[#allocation4] sm:$0x1] %v9412_v12 }
 0x1f6   :  { %3825 = vst [vmem:[#allocation4 + $0x15] sm:$0x7] %v9412_v12 }
 0x1f7   :  { %v2236_v7 = vrot.slane %v2235_v43, 4  ;;  %v2261_v15 = vadd.f32 %v2260_v60, %v2252_v35  ;;  %v8858_v60 = vld [vmem:[#allocation11 + $0x58] sm:$0xff]  ;;  %4218 = vst [vmem:[#allocation4 + $0x18] sm:$0x1] %v9412_v12 }
 0x1f8   :  { %v8890_v35 = vld [vmem:[#allocation11 + $0x58] sm:$0xff]  ;;  %2557 = vmatpush.bf16.msrb.mxu2 %v8858_v60  ;;  %4219 = vst [vmem:[#allocation4 + $0x2d] sm:$0x7] %v9412_v12 }
 0x1f9   :  { %v2237_v38 = vadd.f32 %v2236_v7, %v2235_v43  ;;  %v2262_v37 = vrot.slane %v2261_v15, 4  ;;  %v8850_v43 = vld [vmem:[#allocation11 + $0x18] sm:$0xff]  ;;  %3001 = vmatpush.bf16.msra.mxu0 %v8890_v35 }
 0x1fa   :  { %v8882_v7 = vld [vmem:[#allocation11 + $0x18] sm:$0xff]  ;;  %2628 = vmatpush.bf16.msrb.mxu3 %v8850_v43 }
 0x1fb   :  { %v2238_v40 = vrot.slane %v2237_v38, 2  ;;  %v2263_v23 = vadd.f32 %v2262_v37, %v2261_v15  ;;  %3072 = vmatpush.bf16.msra.mxu1 %v8882_v7  ;;  %v8856_v37 = vld [vmem:[#allocation11 + $0x48] sm:$0xff] }
 0x1fc   :  { %2558 = vmatpush.bf16.msrb.mxu2 %v8857_v24 }
 0x1fd   :  { %v2239_v21 = vadd.f32 %v2238_v40, %v2237_v38  ;;  %v2264_v25 = vrot.slane %v2263_v23, 2  ;;  %v8881_v38 = vld [vmem:[#allocation11 + $0x10] sm:$0xff]  ;;  %3002 = vmatpush.bf16.msra.mxu0 %v8889_v46  ;;  %v8880_v40 = vld [vmem:[#allocation11 + $0x8] sm:$0xff] }
 0x1fe   :  { %2629 = vmatpush.bf16.msrb.mxu3 %v8849_v27 }
 0x1ff   :  { %v2240_v8 = vrot.slane %v2239_v21, 1  ;;  %v2265_v31 = vadd.f32 %v2264_v25, %v2263_v23  ;;  %3073 = vmatpush.bf16.msra.mxu1 %v8881_v38  ;;  %v8855_v23 = vld [vmem:[#allocation11 + $0x40] sm:$0xff] }
 0x200   :  { %2559 = vmatpush.bf16.msrb.mxu2 %v8856_v37 }
 0x201   :  { %v2241_v3 = vadd.f32 %v2240_v8, %v2239_v21  ;;  %v2266_v14 = vrot.slane %v2265_v31, 1  ;;  %3003 = vmatpush.bf16.msra.mxu0 %v8888_v1  ;;  %v8870_v1 = vld [vmem:[#allocation11 + $0xb8] sm:$0xff] }
 0x202   :  { %2630 = vmatpush.bf16.msrb.mxu3 %v8848_v2 }
 0x203   :  { %v2242_v19 = vadd.f32 %v2241_v3, %v1177_v61  ;;  %v2267_v55 = vadd.f32 %v2266_v14, %v2265_v31  ;;  %3074 = vmatpush.bf16.msra.mxu1 %v8880_v40  ;;  %v2286_v31 = vld [vmem:[%s10441_s6] sm:$0x1] }
 0x204   :  { %2560 = vmatpush.bf16.msrb.mxu2 %v8855_v23  ;;  %v2299_v61 = vld [vmem:[%s10445_s10] sm:$0x1] }
 0x205   :  { %v2268_v51 = vadd.f32 %v2267_v55, %v1203_v18  ;;  %v10125_v20 = vmul.f32 0.00625, %v2242_v19  ;;  %3004 = vmatpush.bf16.msra.mxu0 %v8887_v16  ;;  %v8878_v16 = vld [vmem:[#allocation11 + $0xf8] sm:$0xff] }
 0x206   :  { %2631 = vmatpush.bf16.msrb.mxu3 %v8847_v39 }
 0x207   :  { %v2282_v53 = vmul.f32 0.00625, %v2268_v51  ;;  %v2283_v47 = vmul.f32 %v10125_v20, %v10125_v20  ;;  %3075 = vmatpush.bf16.msra.mxu1 %v8879_v28 }
 0x208   :  { %2724 = vmatpush.bf16.msra.mxu2 %v8870_v1 }
 0x209   :  { %v2284_v11 = vsub.f32 %v2282_v53, %v2283_v47 }
 0x20a   :  { %2829 = vmatpush.bf16.msra.mxu3 %v8878_v16 }
 0x20b   :  { %v2285_v15 = vmax.f32 %v2284_v11, 0.0 }
 0x20d   :  { %v2287_v41 = vadd.f32 1e-05, %v2285_v15 }
 0x20f   :  { %9218 = vrsqrt.f32 %v2287_v41  ;;  %vm2294_vm8 = vweird.f32 %v2287_v41 }
 0x215   :  { %v9219_v21 = vpop.eup %9218 }
 0x216   :  { %v2289_v25 = vmul.f32 %v9219_v21, %v2287_v41  ;;  %vm2295_vm7 = vweird.f32 %v9219_v21 }
 0x217   :  { %vm2296_vm9 = vmor %vm2294_vm8, %vm2295_vm7 }
 0x218   :  { %v2290_v54 = vmul.f32 %v9219_v21, %v2289_v25 }
 0x21a   :  { %v2291_v5 = vmul.f32 0.5, %v2290_v54 }
 0x21c   :  { %v2292_v8 = vsub.f32 1.5, %v2291_v5  ;;  %v8869_v5 = vld [vmem:[#allocation11 + $0xb0] sm:$0xff] }
 0x21d   :  { %2725 = vmatpush.bf16.msra.mxu2 %v8869_v5 }
 0x21e   :  { %v2293_v42 = vmul.f32 %v9219_v21, %v2292_v8 }
 0x220   :  { %v2297_v0 = vsel %vm2296_vm9, %v9219_v21, %v2293_v42 }
 0x221   :  { %v2298_v49 = vmul.f32 %v2297_v0, %v2286_v31 }
 0x223   :  { %v2300_v3 = vmul.f32 %v2298_v49, %v10125_v20  ;;  %v10136_v14 = vperm.slane %v2298_v49, 0  ;;  %v8877_v49 = vld [vmem:[#allocation11 + $0xf0] sm:$0xff] }
 0x224   :  { %2830 = vmatpush.bf16.msra.mxu3 %v8877_v49 }
 0x225   :  { %v2301_v13 = vsub.f32 %v2299_v61, %v2300_v3  ;;  %v2397_v18 = vmul.f32 %v10136_v14, %v10120_v52  ;;  %v2318_v19 = vmul.f32 %v10136_v14, %v9839_v34  ;;  %v2319_v55 = vmul.f32 %v10136_v14, %v9976_v6 }
 0x226   :  { %v2320_v58 = vmul.f32 %v10136_v14, %v9854_v29  ;;  %v2321_v62 = vmul.f32 %v10136_v14, %v9992_v32  ;;  %v2388_v45 = vmul.f32 %v10136_v14, %v10054_v10  ;;  %v2389_v51 = vmul.f32 %v10136_v14, %v10045_v33 }
 0x227   :  { %v10152_v20 = vperm.slane %v2301_v13, 0  ;;  %v2390_v34 = vmul.f32 %v10136_v14, %v10057_v17  ;;  %v2391_v6 = vmul.f32 %v10136_v14, %v10070_v26  ;;  %v2322_v29 = vmul.f32 %v10136_v14, %v9869_v4 }
 0x228   :  { %v2323_v32 = vmul.f32 %v10136_v14, %v10010_v9  ;;  %v2324_v10 = vmul.f32 %v10136_v14, %v9884_v30  ;;  %v2325_v33 = vmul.f32 %v10136_v14, %v10028_v57  ;;  %v10168_v52 = vmul.f32 %v10136_v14, %v10084_v50 }
 0x229   :  { %v2407_v17 = vadd.f32 %v2397_v18, %v10152_v20  ;;  %v2328_v26 = vadd.f32 %v2318_v19, %v10152_v20  ;;  %v2329_v48 = vadd.f32 %v2319_v55, %v10152_v20  ;;  %v2330_v4 = vadd.f32 %v2320_v58, %v10152_v20 }
 0x22a   :  { %v2331_v9 = vadd.f32 %v2321_v62, %v10152_v20  ;;  %v2398_v53 = vadd.f32 %v2388_v45, %v10152_v20  ;;  %v2399_v30 = vadd.f32 %v2389_v51, %v10152_v20  ;;  %v2400_v57 = vadd.f32 %v2390_v34, %v10152_v20 }
 0x22b   :  { %vm2417_vm10 = vcmp.gt.f32.partialorder %v2407_v17, 0.0  ;;  %v2427_v47 = vmul.f32 0.01, %v2407_v17  ;;  %vm2338_vm11 = vcmp.gt.f32.partialorder %v2328_v26, 0.0  ;;  %vm2339_vm12 = vcmp.gt.f32.partialorder %v2329_v48, 0.0 }
 0x22c   :  { %vm2340_vm13 = vcmp.gt.f32.partialorder %v2330_v4, 0.0  ;;  %vm2341_vm14 = vcmp.gt.f32.partialorder %v2331_v9, 0.0  ;;  %v2348_v50 = vmul.f32 0.01, %v2328_v26  ;;  %v2349_v60 = vmul.f32 0.01, %v2329_v48 }
 0x22d   :  { %v2437_v43 = vsel %vm2417_vm10, %v2407_v17, %v2427_v47  ;;  %v2350_v35 = vmul.f32 0.01, %v2330_v4  ;;  %v2351_v11 = vmul.f32 0.01, %v2331_v9  ;;  %v2401_v7 = vadd.f32 %v2391_v6, %v10152_v20  ;;  %v8876_v6 = vld [vmem:[#allocation11 + $0xe8] sm:$0xff] }
 0x22e   :  { %2447 = vst [vmem:[#allocation2 + $0xa1] sm:$0xff] %v2437_v43  ;;  %v2358_v15 = vsel %vm2338_vm11, %v2328_v26, %v2348_v50  ;;  %v2359_v24 = vsel %vm2339_vm12, %v2329_v48, %v2349_v60  ;;  %vm2408_vm15 = vcmp.gt.f32.partialorder %v2398_v53, 0.0  ;;  %vm2409_vm0 = vcmp.gt.f32.partialorder %v2399_v30, 0.0  ;;  %2831 = vmatpush.bf16.msra.mxu3 %v8876_v6  ;;  %v8909_v6 = vld [vmem:[#allocation11 + $0xf0] sm:$0xff] }
 0x22f   :  { %v2360_v27 = vsel %vm2340_vm13, %v2330_v4, %v2350_v35  ;;  %v2361_v46 = vsel %vm2341_vm14, %v2331_v9, %v2351_v11  ;;  %2368 = vst [vmem:[#allocation2 + $0x1] sm:$0xff] %v2358_v15  ;;  %vm2410_vm1 = vcmp.gt.f32.partialorder %v2400_v57, 0.0  ;;  %vm2411_vm2 = vcmp.gt.f32.partialorder %v2401_v7, 0.0 }
 0x230   :  { %2369 = vst [vmem:[#allocation2 + $0x9] sm:$0xff] %v2359_v24  ;;  %v2418_v41 = vmul.f32 0.01, %v2398_v53  ;;  %v2419_v38 = vmul.f32 0.01, %v2399_v30  ;;  %v2332_v37 = vadd.f32 %v2322_v29, %v10152_v20  ;;  %v2333_v2 = vadd.f32 %v2323_v32, %v10152_v20 }
 0x231   :  { %2370 = vst [vmem:[#allocation2 + $0x11] sm:$0xff] %v2360_v27  ;;  %v2420_v40 = vmul.f32 0.01, %v2400_v57  ;;  %v2421_v23 = vmul.f32 0.01, %v2401_v7  ;;  %v2334_v39 = vadd.f32 %v2324_v10, %v10152_v20  ;;  %v2335_v12 = vadd.f32 %v2325_v33, %v10152_v20 }
 0x232   :  { %2371 = vst [vmem:[#allocation2 + $0x19] sm:$0xff] %v2361_v46  ;;  %v2428_v28 = vsel %vm2408_vm15, %v2398_v53, %v2418_v41  ;;  %v2429_v21 = vsel %vm2409_vm0, %v2399_v30, %v2419_v38  ;;  %vm2342_vm3 = vcmp.gt.f32.partialorder %v2332_v37, 0.0  ;;  %vm2343_vm4 = vcmp.gt.f32.partialorder %v2333_v2, 0.0  ;;  %v8867_v53 = vld [vmem:[#allocation11 + $0xa0] sm:$0xff]  ;;  %v8866_v38 = vld [vmem:[#allocation11 + $0x98] sm:$0xff] }
 0x233   :  { %v2430_v25 = vsel %vm2410_vm1, %v2400_v57, %v2420_v40  ;;  %v2431_v54 = vsel %vm2411_vm2, %v2401_v7, %v2421_v23  ;;  %2438 = vst [vmem:[#allocation2 + $0x59] sm:$0xff] %v2428_v28  ;;  %vm2344_vm5 = vcmp.gt.f32.partialorder %v2334_v39, 0.0  ;;  %vm2345_vm6 = vcmp.gt.f32.partialorder %v2335_v12, 0.0  ;;  %v8865_v40 = vld [vmem:[#allocation11 + $0x90] sm:$0xff] }
 0x234   :  { %2439 = vst [vmem:[#allocation2 + $0x61] sm:$0xff] %v2429_v21  ;;  %v2352_v8 = vmul.f32 0.01, %v2332_v37  ;;  %v2353_v31 = vmul.f32 0.01, %v2333_v2  ;;  %v2393_v42 = vmul.f32 %v10136_v14, %v10093_v63  ;;  %v2394_v0 = vmul.f32 %v10136_v14, %v10101_v36  ;;  %v8868_v36 = vld [vmem:[#allocation11 + $0xa8] sm:$0xff] }
 0x235   :  { %2440 = vst [vmem:[#allocation2 + $0x69] sm:$0xff] %v2430_v25  ;;  %v2354_v61 = vmul.f32 0.01, %v2334_v39  ;;  %v2355_v3 = vmul.f32 0.01, %v2335_v12  ;;  %v2395_v13 = vmul.f32 %v10136_v14, %v10106_v44  ;;  %v2402_v18 = vadd.f32 %v10168_v52, %v10152_v20  ;;  %2726 = vmatpush.bf16.msra.mxu2 %v8868_v36  ;;  %v8873_v23 = vld [vmem:[#allocation11 + $0xd0] sm:$0xff] }
 0x236   :  { %2441 = vst [vmem:[#allocation2 + $0x71] sm:$0xff] %v2431_v54  ;;  %v2362_v19 = vsel %vm2342_vm3, %v2332_v37, %v2352_v8  ;;  %v2363_v55 = vsel %vm2343_vm4, %v2333_v2, %v2353_v31  ;;  %v2403_v63 = vadd.f32 %v2393_v42, %v10152_v20  ;;  %v2404_v58 = vadd.f32 %v2394_v0, %v10152_v20  ;;  %v8874_v37 = vld [vmem:[#allocation11 + $0xd8] sm:$0xff]  ;;  %v8864_v21 = vld [vmem:[#allocation11 + $0x88] sm:$0xff]  ;;  %v8863_v31 = vld [vmem:[#allocation11 + $0x80] sm:$0xff] }
 0x237   :  { %v2477_v62 = vld [vmem:[#allocation2 + $0x1] ss:$2 sm:$0xff]  ;;  %v2448_v45 = vld [vmem:[#allocation2] ss:$2 sm:$0xff]  ;;  %v2364_v51 = vsel %vm2344_vm5, %v2334_v39, %v2354_v61  ;;  %v2365_v34 = vsel %vm2345_vm6, %v2335_v12, %v2355_v3  ;;  %2372 = vst [vmem:[#allocation2 + $0x21] sm:$0xff] %v2362_v19  ;;  %v2405_v44 = vadd.f32 %v2395_v13, %v10152_v20  ;;  %vm2412_vm7 = vcmp.gt.f32.partialorder %v2402_v18, 0.0 }
 0x238   :  { %2373 = vst [vmem:[#allocation2 + $0x29] sm:$0xff] %v2363_v55  ;;  %vm2413_vm8 = vcmp.gt.f32.partialorder %v2403_v63, 0.0  ;;  %vm2414_vm9 = vcmp.gt.f32.partialorder %v2404_v58, 0.0  ;;  %v2422_v29 = vmul.f32 0.01, %v2402_v18  ;;  %v2326_v33 = vmul.f32 %v10136_v14, %v10470_v22  ;;  %v8872_v25 = vld [vmem:[#allocation11 + $0xc8] sm:$0xff] }
 0x239   :  { %v2479_v32 = vld [vmem:[#allocation2 + $0x11] ss:$2 sm:$0xff]  ;;  %v2450_v10 = vld [vmem:[#allocation2 + $0x10] ss:$2 sm:$0xff]  ;;  %2374 = vst [vmem:[#allocation2 + $0x31] sm:$0xff] %v2364_v51  ;;  %vm2415_vm10 = vcmp.gt.f32.partialorder %v2405_v44, 0.0  ;;  %v2327_v52 = vmul.f32 %v10136_v14, %v10063_v56  ;;  %v2396_v17 = vmul.f32 %v10136_v14, %v10111_v59  ;;  %2727 = vmatpush.bf16.msra.mxu2 %v8867_v53 }
 0x23a   :  { %v2486_v26 = vpack.c.bf16 %v2479_v32, %v2477_v62  ;;  %v2457_v48 = vpack.c.bf16 %v2450_v10, %v2448_v45  ;;  %2375 = vst [vmem:[#allocation2 + $0x39] sm:$0xff] %v2365_v34  ;;  %v2423_v4 = vmul.f32 0.01, %v2403_v63  ;;  %v2424_v9 = vmul.f32 0.01, %v2404_v58  ;;  %v8875_v14 = vld [vmem:[#allocation11 + $0xe0] sm:$0xff] }
 0x23b   :  { %v2921_v30 = vld [vmem:[#allocation2 + $0x59] ss:$2 sm:$0xff]  ;;  %v2892_v57 = vld [vmem:[#allocation2 + $0x58] ss:$2 sm:$0xff]  ;;  %v2425_v47 = vmul.f32 0.01, %v2405_v44  ;;  %v2432_v50 = vsel %vm2412_vm7, %v2402_v18, %v2422_v29  ;;  %v2336_v22 = vadd.f32 %v2326_v33, %v10152_v20  ;;  %v2337_v60 = vadd.f32 %v2327_v52, %v10152_v20  ;;  %2832 = vmatpush.bf16.msra.mxu3 %v8875_v14 }
 0x23c   :  { %2561 = vmatmul.bf16.vlgmr.msrb.gmra.mxu2 %v2486_v26  ;;  %2632 = vmatmul.bf16.vlgmr.msrb.gmra.mxu3 %v2457_v48  ;;  %v2433_v56 = vsel %vm2413_vm8, %v2403_v63, %v2423_v4  ;;  %v2434_v59 = vsel %vm2414_vm9, %v2404_v58, %v2424_v9  ;;  %2442 = vst [vmem:[#allocation2 + $0x79] sm:$0xff] %v2432_v50  ;;  %v8871_v61 = vld [vmem:[#allocation11 + $0xc0] sm:$0xff]  ;;  %v8902_v62 = vld [vmem:[#allocation11 + $0xb8] sm:$0xff]  ;;  %v8900_v29 = vld [vmem:[#allocation11 + $0xa8] sm:$0xff] }
 0x23d   :  { %v2406_v43 = vadd.f32 %v2396_v17, %v10152_v20  ;;  %v2923_v35 = vld [vmem:[#allocation2 + $0x69] ss:$2 sm:$0xff]  ;;  %v2894_v11 = vld [vmem:[#allocation2 + $0x68] ss:$2 sm:$0xff]  ;;  %v2435_v7 = vsel %vm2415_vm10, %v2405_v44, %v2425_v47  ;;  %2443 = vst [vmem:[#allocation2 + $0x81] sm:$0xff] %v2433_v56  ;;  %vm2346_vm11 = vcmp.gt.f32.partialorder %v2336_v22, 0.0  ;;  %2728 = vmatpush.bf16.msra.mxu2 %v8866_v38 }
 0x23e   :  { %v2930_v15 = vpack.c.bf16 %v2923_v35, %v2921_v30  ;;  %v2901_v24 = vpack.c.bf16 %v2894_v11, %v2892_v57  ;;  %2444 = vst [vmem:[#allocation2 + $0x89] sm:$0xff] %v2434_v59  ;;  %v2356_v27 = vmul.f32 0.01, %v2336_v22  ;;  %vm2347_vm12 = vcmp.gt.f32.partialorder %v2337_v60, 0.0  ;;  %v8910_v45 = vld [vmem:[#allocation11 + $0xf8] sm:$0xff]  ;;  %v8901_v44 = vld [vmem:[#allocation11 + $0xb0] sm:$0xff] }
 0x23f   :  { %2445 = vst [vmem:[#allocation2 + $0x91] sm:$0xff] %v2435_v7  ;;  %vm2416_vm13 = vcmp.gt.f32.partialorder %v2406_v43, 0.0  ;;  %v2357_v46 = vmul.f32 0.01, %v2337_v60  ;;  %v2426_v20 = vmul.f32 0.01, %v2406_v43  ;;  %2833 = vmatpush.bf16.msra.mxu3 %v8874_v37 }
 0x240   :  { %3005 = vmatmul.bf16.vlgmr.msra.gmra.mxu0 %v2930_v15  ;;  %3076 = vmatmul.bf16.vlgmr.msra.gmra.mxu1 %v2901_v24  ;;  %v2366_v41 = vsel %vm2346_vm11, %v2336_v22, %v2356_v27  ;;  %v2481_v39 = vld [vmem:[#allocation2 + $0x21] ss:$2 sm:$0xff]  ;;  %v2452_v12 = vld [vmem:[#allocation2 + $0x20] ss:$2 sm:$0xff]  ;;  %v8908_v32 = vld [vmem:[#allocation11 + $0xe8] sm:$0xff]  ;;  %vm3798_vm11 = vcmask 1043456  }
 0x241   :  { %2376 = vst [vmem:[#allocation2 + $0x41] sm:$0xff] %v2366_v41  ;;  %v2367_v2 = vsel %vm2347_vm12, %v2337_v60, %v2357_v46  ;;  %v2436_v1 = vsel %vm2416_vm13, %v2406_v43, %v2426_v20  ;;  %v2483_v16 = vld [vmem:[#allocation2 + $0x31] ss:$2 sm:$0xff]  ;;  %v2454_v28 = vld [vmem:[#allocation2 + $0x30] ss:$2 sm:$0xff]  ;;  %2729 = vmatpush.bf16.msra.mxu2 %v8865_v40  ;;  %v8898_v53 = vld [vmem:[#allocation11 + $0x98] sm:$0xff] }
 0x242   :  { %2377 = vst [vmem:[#allocation2 + $0x49] sm:$0xff] %v2367_v2  ;;  %v2487_v54 = vpack.c.bf16 %v2483_v16, %v2481_v39  ;;  %v2458_v5 = vpack.c.bf16 %v2454_v28, %v2452_v12  ;;  %v2648_v10 = vld [vmem:[#allocation2 + $0x2] ss:$2 sm:$0xff]  ;;  %v2650_v17 = vld [vmem:[#allocation2 + $0x12] ss:$2 sm:$0xff] }
 0x243   :  { %2446 = vst [vmem:[#allocation2 + $0x99] sm:$0xff] %v2436_v1  ;;  %2834 = vmatpush.bf16.msra.mxu3 %v8873_v23  ;;  %v8899_v33 = vld [vmem:[#allocation11 + $0xa0] sm:$0xff]  ;;  %v2657_v4 = vpack.c.bf16 %v2650_v17, %v2648_v10  ;;  %v8906_v30 = vld [vmem:[#allocation11 + $0xd8] sm:$0xff]  ;;  %v8897_v57 = vld [vmem:[#allocation11 + $0x90] sm:$0xff] }
 0x244   :  { %v2925_v8 = vld [vmem:[#allocation2 + $0x79] ss:$2 sm:$0xff]  ;;  %v2896_v0 = vld [vmem:[#allocation2 + $0x78] ss:$2 sm:$0xff]  ;;  %v8907_v52 = vld [vmem:[#allocation11 + $0xe0] sm:$0xff] }
 0x245   :  { %2730 = vmatpush.bf16.msra.mxu2 %v8864_v21  ;;  %v2753_v26 = vld [vmem:[#allocation2 + $0x3] ss:$2 sm:$0xff]  ;;  %v2755_v48 = vld [vmem:[#allocation2 + $0x13] ss:$2 sm:$0xff]  ;;  %v2652_v60 = vld [vmem:[#allocation2 + $0x22] ss:$2 sm:$0xff] }
 0x246   :  { %v2927_v42 = vld [vmem:[#allocation2 + $0x89] ss:$2 sm:$0xff]  ;;  %v2898_v49 = vld [vmem:[#allocation2 + $0x88] ss:$2 sm:$0xff]  ;;  %v2762_v9 = vpack.c.bf16 %v2755_v48, %v2753_v26  ;;  %v8905_v47 = vld [vmem:[#allocation11 + $0xd0] sm:$0xff] }
 0x247   :  { %2835 = vmatpush.bf16.msra.mxu3 %v8872_v25  ;;  %v2931_v3 = vpack.c.bf16 %v2927_v42, %v2925_v8  ;;  %v2902_v13 = vpack.c.bf16 %v2898_v49, %v2896_v0  ;;  %v8896_v50 = vld [vmem:[#allocation11 + $0x88] sm:$0xff]  ;;  %v8895_v56 = vld [vmem:[#allocation11 + $0x80] sm:$0xff] }
 0x248   :  { %v8904_v22 = vld [vmem:[#allocation11 + $0xc8] sm:$0xff]  ;;  %v8903_v59 = vld [vmem:[#allocation11 + $0xc0] sm:$0xff] }
 0x249   :  { %2731 = vmatpush.bf16.msra.mxu2 %v8863_v31  ;;  %v2485_v18 = vld [vmem:[#allocation2 + $0x41] ss:$2 sm:$0xff]  ;;  %v2456_v19 = vld [vmem:[#allocation2 + $0x40] ss:$2 sm:$0xff] }
 0x24a   :  { %v2488_v55 = vpack.c.bf16 %v2485_v18, %v2485_v18  ;;  %v2459_v63 = vpack.c.bf16 %v2456_v19, %v2456_v19  ;;  %v2929_v58 = vld [vmem:[#allocation2 + $0x99] ss:$2 sm:$0xff]  ;;  %v2900_v36 = vld [vmem:[#allocation2 + $0x98] ss:$2 sm:$0xff] }
 0x24b   :  { %2836 = vmatpush.bf16.msra.mxu3 %v8871_v61  ;;  %v2932_v51 = vpack.c.bf16 %v2929_v58, %v2929_v58  ;;  %v2903_v34 = vpack.c.bf16 %v2900_v36, %v2900_v36  ;;  %v2654_v14 = vld [vmem:[#allocation2 + $0x32] ss:$2 sm:$0xff]  ;;  %v2757_v43 = vld [vmem:[#allocation2 + $0x23] ss:$2 sm:$0xff]  ;;  %v2759_v35 = vld [vmem:[#allocation2 + $0x33] ss:$2 sm:$0xff] }
 0x24c   :  { %2566 = vmatmul.bf16.gmra.mxu2 %v2487_v54  ;;  %2637 = vmatmul.bf16.gmra.mxu3 %v2458_v5  ;;  %v2658_v11 = vpack.c.bf16 %v2654_v14, %v2652_v60  ;;  %v2763_v7 = vpack.c.bf16 %v2759_v35, %v2757_v43  ;;  %v2656_v15 = vld [vmem:[#allocation2 + $0x42] ss:$2 sm:$0xff]  ;;  %v2761_v24 = vld [vmem:[#allocation2 + $0x43] ss:$2 sm:$0xff] }
 0x24d   :  { %3168 = vmatpush.bf16.msrb.mxu2 %v8902_v62  ;;  %v2659_v27 = vpack.c.bf16 %v2656_v15, %v2656_v15  ;;  %v2764_v46 = vpack.c.bf16 %v2761_v24, %v2761_v24  ;;  %v3092_v41 = vld [vmem:[#allocation2 + $0x5a] ss:$2 sm:$0xff]  ;;  %v3094_v20 = vld [vmem:[#allocation2 + $0x6a] ss:$2 sm:$0xff]  ;;  %v3197_v38 = vld [vmem:[#allocation2 + $0x5b] ss:$2 sm:$0xff] }
 0x24e   :  { %v3199_v37 = vld [vmem:[#allocation2 + $0x6b] ss:$2 sm:$0xff]  ;;  %v3101_v2 = vpack.c.bf16 %v3094_v20, %v3092_v41  ;;  %v3096_v40 = vld [vmem:[#allocation2 + $0x7a] ss:$2 sm:$0xff]  ;;  %v3098_v23 = vld [vmem:[#allocation2 + $0x8a] ss:$2 sm:$0xff] }
 0x24f   :  { %3273 = vmatpush.bf16.msrb.mxu3 %v8910_v45  ;;  %v3206_v1 = vpack.c.bf16 %v3199_v37, %v3197_v38  ;;  %v3201_v39 = vld [vmem:[#allocation2 + $0x7b] ss:$2 sm:$0xff]  ;;  %v3203_v12 = vld [vmem:[#allocation2 + $0x8b] ss:$2 sm:$0xff]  ;;  %v3102_v16 = vpack.c.bf16 %v3098_v23, %v3096_v40  ;;  %v3100_v21 = vld [vmem:[#allocation2 + $0x9a] ss:$2 sm:$0xff] }
 0x250   :  { %3010 = vmatmul.bf16.gmra.mxu0 %v2931_v3  ;;  %3081 = vmatmul.bf16.gmra.mxu1 %v2902_v13  ;;  %v3207_v28 = vpack.c.bf16 %v3203_v12, %v3201_v39  ;;  %v3205_v25 = vld [vmem:[#allocation2 + $0x9b] ss:$2 sm:$0xff]  ;;  %v3103_v54 = vpack.c.bf16 %v3100_v21, %v3100_v21 }
 0x251   :  { %3169 = vmatpush.bf16.msrb.mxu2 %v8901_v44  ;;  %v3208_v5 = vpack.c.bf16 %v3205_v25, %v3205_v25 }
 0x253   :  { %3274 = vmatpush.bf16.msrb.mxu3 %v8909_v6 }
 0x255   :  { %3170 = vmatpush.bf16.msrb.mxu2 %v8900_v29 }
 0x257   :  { %3275 = vmatpush.bf16.msrb.mxu3 %v8908_v32 }
 0x259   :  { %3171 = vmatpush.bf16.msrb.mxu2 %v8899_v33 }
 0x25b   :  { %3276 = vmatpush.bf16.msrb.mxu3 %v8907_v52 }
 0x25c   :  { %2571 = vmatmul.bf16.gmra.mxu2 %v2488_v55  ;;  %2642 = vmatmul.bf16.gmra.mxu3 %v2459_v63 }
 0x25d   :  { %3172 = vmatpush.bf16.msrb.mxu2 %v8898_v53 }
 0x25f   :  { %3277 = vmatpush.bf16.msrb.mxu3 %v8906_v30 }
 0x260   :  { %3015 = vmatmul.bf16.gmra.mxu0 %v2932_v51  ;;  %3086 = vmatmul.bf16.gmra.mxu1 %v2903_v34 }
 0x261   :  { %3173 = vmatpush.bf16.msrb.mxu2 %v8897_v57 }
 0x263   :  { %3278 = vmatpush.bf16.msrb.mxu3 %v8905_v47 }
 0x265   :  { %3174 = vmatpush.bf16.msrb.mxu2 %v8896_v50 }
 0x267   :  { %3279 = vmatpush.bf16.msrb.mxu3 %v8904_v22 }
 0x269   :  { %3175 = vmatpush.bf16.msrb.mxu2 %v8895_v56 }
 0x26b   :  { %3280 = vmatpush.bf16.msrb.mxu3 %v8903_v59 }
 0x26c   :  { %2732 = vmatmul.bf16.vlgmr.msra.gmra.mxu2 %v2657_v4  ;;  %2837 = vmatmul.bf16.vlgmr.msra.gmra.mxu3 %v2762_v9 }
 0x27c   :  { %2737 = vmatmul.bf16.gmra.mxu2 %v2658_v11  ;;  %2842 = vmatmul.bf16.gmra.mxu3 %v2763_v7 }
 0x28c   :  { %2742 = vmatmul.bf16.gmra.mxu2 %v2659_v27  ;;  %2847 = vmatmul.bf16.gmra.mxu3 %v2764_v46 }
 0x29c   :  { %3176 = vmatmul.bf16.vlgmr.msrb.gmra.mxu2 %v3101_v2  ;;  %3281 = vmatmul.bf16.vlgmr.msrb.gmra.mxu3 %v3206_v1 }
 0x2ac   :  { %3181 = vmatmul.bf16.gmra.mxu2 %v3102_v16  ;;  %3286 = vmatmul.bf16.gmra.mxu3 %v3207_v28 }
 0x2bc   :  { %3186 = vmatmul.bf16.gmra.mxu2 %v3103_v54  ;;  %3291 = vmatmul.bf16.gmra.mxu3 %v3208_v5 }
 0x2bd   :  { %v3006_v8 = vpop.f32.mrf.mxu0  ;;  %v3077_v31 = vpop.f32.mrf.mxu1 }
 0x2be   :  { %v10215_v42 = vadd.f32 %v3077_v31, %v3006_v8 }
 0x2bf   :  { %v2562_v0 = vpop.f32.mrf.mxu2  ;;  %v2633_v49 = vpop.f32.mrf.mxu3 }
 0x2c0   :  { %v2634_v61 = vadd.f32 %v2633_v49, %v2562_v0 }
 0x2c5   :  { %v10217_v3 = vpop.f32.mrf.mxu0  ;;  %v10219_v13 = vpop.f32.mrf.mxu1 }
 0x2c7   :  { %v2564_v18 = vpop.f32.mrf.mxu2  ;;  %v2635_v19 = vpop.f32.mrf.mxu3 }
 0x2c8   :  { %v2636_v50 = vadd.f32 %v2635_v19, %v2564_v18 }
 0x2cd   :  { %v3011_v55 = vpop.f32.mrf.mxu0  ;;  %v3082_v63 = vpop.f32.mrf.mxu1 }
 0x2ce   :  { %v10221_v58 = vadd.f32 %v3082_v63, %v3011_v55 }
 0x2cf   :  { %v2567_v36 = vpop.f32.mrf.mxu2  ;;  %v2638_v62 = vpop.f32.mrf.mxu3 }
 0x2d0   :  { %v2639_v45 = vadd.f32 %v2638_v62, %v2567_v36  ;;  %v3080_v36 = vadd.f32 %v10219_v13, %v10217_v3 }
 0x2d5   :  { %v3013_v51 = vpop.f32.mrf.mxu0  ;;  %v3084_v34 = vpop.f32.mrf.mxu1 }
 0x2d7   :  { %v2569_v44 = vpop.f32.mrf.mxu2  ;;  %v2640_v6 = vpop.f32.mrf.mxu3 }
 0x2d8   :  { %v2641_v20 = vadd.f32 %v2640_v6, %v2569_v44 }
 0x2dd   :  { %v3016_v29 = vpop.f32.mrf.mxu0  ;;  %v3087_v32 = vpop.f32.mrf.mxu1 }
 0x2de   :  { %v10223_v10 = vadd.f32 %v3087_v32, %v3016_v29 }
 0x2df   :  { %v2572_v33 = vpop.f32.mrf.mxu2  ;;  %v2643_v52 = vpop.f32.mrf.mxu3 }
 0x2e0   :  { %v2644_v17 = vadd.f32 %v2643_v52, %v2572_v33 }
 0x2e5   :  { %v3018_v26 = vpop.f32.mrf.mxu0  ;;  %v3089_v48 = vpop.f32.mrf.mxu1 }
 0x2e7   :  { %v2574_v4 = vpop.f32.mrf.mxu2  ;;  %v2645_v9 = vpop.f32.mrf.mxu3 }
 0x2ef   :  { %v2733_v53 = vpop.f32.mrf.mxu2  ;;  %v2838_v30 = vpop.f32.mrf.mxu3 }
 0x2f0   :  { %v2747_v57 = vadd.f32 %v2733_v53, %v2634_v61 }
 0x2f2   :  { %v10225_v47 = vadd.f32 %v2838_v30, %v2747_v57 }
 0x2f4   :  { %v2868_v7 = vmul.f32 %v10225_v47, %v10225_v47 }
 0x2f7   :  { %v2735_v22 = vpop.f32.mrf.mxu2  ;;  %v2840_v60 = vpop.f32.mrf.mxu3 }
 0x2f8   :  { %v2748_v56 = vadd.f32 %v2735_v22, %v2636_v50 }
 0x2fa   :  { %v10227_v59 = vadd.f32 %v2840_v60, %v2748_v56 }
 0x2fc   :  { %v2869_v35 = vmul.f32 %v10227_v59, %v10227_v59  ;;  %v2857_v15 = vadd.f32 %v10227_v59, %v10225_v47 }
 0x2fe   :  { %v2873_v27 = vadd.f32 %v2869_v35, %v2868_v7 }
 0x2ff   :  { %v2738_v14 = vpop.f32.mrf.mxu2  ;;  %v2843_v43 = vpop.f32.mrf.mxu3 }
 0x300   :  { %v2749_v11 = vadd.f32 %v2738_v14, %v2639_v45  ;;  %v3085_v45 = vadd.f32 %v3084_v34, %v3013_v51 }
 0x302   :  { %v10235_v24 = vadd.f32 %v2843_v43, %v2749_v11 }
 0x304   :  { %v2858_v46 = vadd.f32 %v2857_v15, %v10235_v24  ;;  %v2870_v41 = vmul.f32 %v10235_v24, %v10235_v24 }
 0x306   :  { %v2874_v38 = vadd.f32 %v2873_v27, %v2870_v41 }
 0x307   :  { %v2740_v37 = vpop.f32.mrf.mxu2  ;;  %v2845_v2 = vpop.f32.mrf.mxu3 }
 0x308   :  { %v2750_v1 = vadd.f32 %v2740_v37, %v2641_v20 }
 0x30a   :  { %v10240_v40 = vadd.f32 %v2845_v2, %v2750_v1 }
 0x30c   :  { %v2871_v12 = vmul.f32 %v10240_v40, %v10240_v40  ;;  %v2859_v28 = vadd.f32 %v2858_v46, %v10240_v40 }
 0x30e   :  { %v2875_v25 = vadd.f32 %v2874_v38, %v2871_v12 }
 0x30f   :  { %v2743_v23 = vpop.f32.mrf.mxu2  ;;  %v2848_v39 = vpop.f32.mrf.mxu3 }
 0x310   :  { %v2751_v16 = vadd.f32 %v2743_v23, %v2644_v17 }
 0x312   :  { %v10245_v21 = vadd.f32 %v2848_v39, %v2751_v16 }
 0x314   :  { %v2860_v54 = vadd.f32 %v2859_v28, %v10245_v21  ;;  %v2872_v5 = vmul.f32 %v10245_v21, %v10245_v21 }
 0x316   :  { %v2876_v8 = vadd.f32 %v2875_v25, %v2872_v5  ;;  %v2861_v48 = vrot.slane %v2860_v54, 4 }
 0x317   :  { %v2745_v31 = vpop.f32.mrf.mxu2  ;;  %v2850_v0 = vpop.f32.mrf.mxu3 }
 0x318   :  { %v2877_v13 = vrot.slane %v2876_v8, 4  ;;  %v2862_v34 = vadd.f32 %v2861_v48, %v2860_v54  ;;  %v8925_v48 = vld [vmem:[#allocation12 + $0x70] sm:$0xff] }
 0x31a   :  { %v2878_v60 = vadd.f32 %v2877_v13, %v2876_v8  ;;  %v2863_v35 = vrot.slane %v2862_v34, 2  ;;  %v8933_v13 = vld [vmem:[#allocation12 + $0xb0] sm:$0xff] }
 0x31c   :  { %v2879_v27 = vrot.slane %v2878_v60, 2  ;;  %v2864_v37 = vadd.f32 %v2863_v35, %v2862_v34  ;;  %v8932_v34 = vld [vmem:[#allocation12 + $0xa8] sm:$0xff]  ;;  %v8914_v35 = vld [vmem:[#allocation12 + $0x18] sm:$0xff] }
 0x31e   :  { %v2880_v1 = vadd.f32 %v2879_v27, %v2878_v60  ;;  %v2865_v12 = vrot.slane %v2864_v37, 1 }
 0x31f   :  { %v3177_v49 = vpop.f32.mrf.mxu2  ;;  %v3282_v61 = vpop.f32.mrf.mxu3 }
 0x320   :  { %v3191_v44 = vadd.f32 %v3177_v49, %v10215_v42  ;;  %v2881_v25 = vrot.slane %v2880_v1, 1  ;;  %v2866_v8 = vadd.f32 %v2865_v12, %v2864_v37  ;;  %v3340_v37 = vld [vmem:[%s10442_s7] sm:$0x1]  ;;  %v8928_v12 = vld [vmem:[#allocation12 + $0x88] sm:$0xff] }
 0x322   :  { %v10256_v17 = vadd.f32 %v3282_v61, %v3191_v44  ;;  %v2882_v49 = vadd.f32 %v2881_v25, %v2880_v1  ;;  %v8918_v44 = vld [vmem:[#allocation12 + $0x38] sm:$0xff]  ;;  %v8920_v1 = vld [vmem:[#allocation12 + $0x48] sm:$0xff] }
 0x323   :  { %3593 = vmatpush.bf16.msrb.mxu1 %v8918_v44 }
 0x324   :  { %v3312_v42 = vmul.f32 %v10256_v17, %v10256_v17 }
 0x327   :  { %v3179_v18 = vpop.f32.mrf.mxu2  ;;  %v3284_v19 = vpop.f32.mrf.mxu3 }
 0x328   :  { %v3192_v62 = vadd.f32 %v3179_v18, %v3080_v36 }
 0x32a   :  { %v10254_v33 = vadd.f32 %v3284_v19, %v3192_v62 }
 0x32c   :  { %v3313_v4 = vmul.f32 %v10254_v33, %v10254_v33 }
 0x32e   :  { %v3317_v30 = vadd.f32 %v3313_v4, %v3312_v42  ;;  %v8917_v4 = vld [vmem:[#allocation12 + $0x30] sm:$0xff] }
 0x32f   :  { %v3182_v55 = vpop.f32.mrf.mxu2  ;;  %v3287_v63 = vpop.f32.mrf.mxu3  ;;  %v8941_v42 = vld [vmem:[#allocation12 + $0xf0] sm:$0xff]  ;;  %3594 = vmatpush.bf16.msrb.mxu1 %v8917_v4 }
 0x330   :  { %v3193_v6 = vadd.f32 %v3182_v55, %v10221_v58  ;;  %v3301_v58 = vadd.f32 %v10254_v33, %v10256_v17 }
 0x332   :  { %v10258_v26 = vadd.f32 %v3287_v63, %v3193_v6  ;;  %v8934_v6 = vld [vmem:[#allocation12 + $0xb8] sm:$0xff] }
 0x333   :  { %3683 = vmatpush.bf16.msra.mxu2 %v8934_v6  ;;  %v8966_v6 = vld [vmem:[#allocation12 + $0xb8] sm:$0xff] }
 0x334   :  { %v3314_v51 = vmul.f32 %v10258_v26, %v10258_v26  ;;  %v3302_v57 = vadd.f32 %v3301_v58, %v10258_v26  ;;  %v8924_v58 = vld [vmem:[#allocation12 + $0x68] sm:$0xff] }
 0x336   :  { %v3318_v56 = vadd.f32 %v3317_v30, %v3314_v51  ;;  %v8916_v51 = vld [vmem:[#allocation12 + $0x28] sm:$0xff]  ;;  %v8915_v30 = vld [vmem:[#allocation12 + $0x20] sm:$0xff] }
 0x337   :  { %v3184_v29 = vpop.f32.mrf.mxu2  ;;  %v3289_v32 = vpop.f32.mrf.mxu3  ;;  %3684 = vmatpush.bf16.msra.mxu2 %v8933_v13  ;;  %3595 = vmatpush.bf16.msrb.mxu1 %v8916_v51  ;;  %v8957_v13 = vld [vmem:[#allocation12 + $0x70] sm:$0xff] }
 0x338   :  { %v3194_v52 = vadd.f32 %v3184_v29, %v3085_v45  ;;  %v8926_v45 = vld [vmem:[#allocation12 + $0x78] sm:$0xff] }
 0x339   :  { %3527 = vmatpush.bf16.msrb.mxu0 %v8926_v45 }
 0x33a   :  { %v10262_v3 = vadd.f32 %v3289_v32, %v3194_v52  ;;  %v8942_v32 = vld [vmem:[#allocation12 + $0xf8] sm:$0xff] }
 0x33b   :  { %3776 = vmatpush.bf16.msra.mxu3 %v8942_v32  ;;  %3685 = vmatpush.bf16.msra.mxu2 %v8932_v34 }
 0x33c   :  { %v3315_v50 = vmul.f32 %v10262_v3, %v10262_v3  ;;  %v3303_v14 = vadd.f32 %v3302_v57, %v10262_v3  ;;  %3596 = vmatpush.bf16.msrb.mxu1 %v8915_v30 }
 0x33d   :  { %3528 = vmatpush.bf16.msrb.mxu0 %v8925_v48 }
 0x33e   :  { %v3319_v11 = vadd.f32 %v3318_v56, %v3315_v50  ;;  %v8931_v50 = vld [vmem:[#allocation12 + $0xa0] sm:$0xff] }
 0x33f   :  { %v3187_v9 = vpop.f32.mrf.mxu2  ;;  %v3292_v53 = vpop.f32.mrf.mxu3  ;;  %3777 = vmatpush.bf16.msra.mxu3 %v8941_v42  ;;  %3686 = vmatpush.bf16.msra.mxu2 %v8931_v50  ;;  %v8965_v42 = vld [vmem:[#allocation12 + $0xb0] sm:$0xff]  ;;  %v8956_v50 = vld [vmem:[#allocation12 + $0x68] sm:$0xff] }
 0x340   :  { %v3195_v22 = vadd.f32 %v3187_v9, %v10223_v10  ;;  %v8940_v9 = vld [vmem:[#allocation12 + $0xe8] sm:$0xff]  ;;  %3597 = vmatpush.bf16.msrb.mxu1 %v8914_v35 }
 0x341   :  { %3529 = vmatpush.bf16.msrb.mxu0 %v8924_v58  ;;  %v8972_v35 = vld [vmem:[#allocation12 + $0xe8] sm:$0xff] }
 0x342   :  { %v10275_v43 = vadd.f32 %v3292_v53, %v3195_v22  ;;  %v8923_v53 = vld [vmem:[#allocation12 + $0x60] sm:$0xff] }
 0x343   :  { %3778 = vmatpush.bf16.msra.mxu3 %v8940_v9  ;;  %v8939_v22 = vld [vmem:[#allocation12 + $0xe0] sm:$0xff] }
 0x344   :  { %v3304_v7 = vadd.f32 %v3303_v14, %v10275_v43  ;;  %v3316_v15 = vmul.f32 %v10275_v43, %v10275_v43  ;;  %v8922_v14 = vld [vmem:[#allocation12 + $0x58] sm:$0xff] }
 0x345   :  { %3530 = vmatpush.bf16.msrb.mxu0 %v8923_v53 }
 0x346   :  { %v3305_v46 = vrot.slane %v3304_v7, 4  ;;  %v3320_v41 = vadd.f32 %v3319_v11, %v3316_v15  ;;  %v8930_v11 = vld [vmem:[#allocation12 + $0x98] sm:$0xff] }
 0x347   :  { %v3189_v20 = vpop.f32.mrf.mxu2  ;;  %v3294_v38 = vpop.f32.mrf.mxu3  ;;  %3779 = vmatpush.bf16.msra.mxu3 %v8939_v22  ;;  %3687 = vmatpush.bf16.msra.mxu2 %v8930_v11  ;;  %v8948_v22 = vld [vmem:[#allocation12 + $0x28] sm:$0xff] }
 0x348   :  { %v3306_v10 = vadd.f32 %v3305_v46, %v3304_v7  ;;  %v3321_v2 = vrot.slane %v3320_v41, 4  ;;  %v8938_v7 = vld [vmem:[#allocation12 + $0xd8] sm:$0xff]  ;;  %v8921_v46 = vld [vmem:[#allocation12 + $0x50] sm:$0xff] }
 0x349   :  { %3531 = vmatpush.bf16.msrb.mxu0 %v8922_v14  ;;  %v8929_v20 = vld [vmem:[#allocation12 + $0x90] sm:$0xff]  ;;  %v8964_v14 = vld [vmem:[#allocation12 + $0xa8] sm:$0xff] }
 0x34a   :  { %v3307_v23 = vrot.slane %v3306_v10, 2  ;;  %v3322_v39 = vadd.f32 %v3321_v2, %v3320_v41  ;;  %v8913_v41 = vld [vmem:[#allocation12 + $0x10] sm:$0xff] }
 0x34b   :  { %3780 = vmatpush.bf16.msra.mxu3 %v8938_v7  ;;  %v8937_v38 = vld [vmem:[#allocation12 + $0xd0] sm:$0xff]  ;;  %3598 = vmatpush.bf16.msrb.mxu1 %v8913_v41  ;;  %v8955_v41 = vld [vmem:[#allocation12 + $0x60] sm:$0xff] }
 0x34c   :  { %v3308_v16 = vadd.f32 %v3307_v23, %v3306_v10  ;;  %v3323_v28 = vrot.slane %v3322_v39, 2  ;;  %v8912_v23 = vld [vmem:[#allocation12 + $0x8] sm:$0xff]  ;;  %3688 = vmatpush.bf16.msra.mxu2 %v8929_v20  ;;  %v8947_v20 = vld [vmem:[#allocation12 + $0x20] sm:$0xff] }
 0x34d   :  { %3532 = vmatpush.bf16.msrb.mxu0 %v8921_v46 }
 0x34e   :  { %v3309_v54 = vrot.slane %v3308_v16, 1  ;;  %v3324_v5 = vadd.f32 %v3323_v28, %v3322_v39  ;;  %v3353_v28 = vld [vmem:[%s10446_s11] sm:$0x1] }
 0x34f   :  { %3781 = vmatpush.bf16.msra.mxu3 %v8937_v38  ;;  %3599 = vmatpush.bf16.msrb.mxu1 %v8912_v23  ;;  %v8963_v38 = vld [vmem:[#allocation12 + $0xa0] sm:$0xff]  ;;  %v8954_v23 = vld [vmem:[#allocation12 + $0x58] sm:$0xff] }
 0x350   :  { %v3310_v31 = vadd.f32 %v3309_v54, %v3308_v16  ;;  %v3325_v0 = vrot.slane %v3324_v5, 1  ;;  %v8936_v16 = vld [vmem:[#allocation12 + $0xc8] sm:$0xff]  ;;  %3689 = vmatpush.bf16.msra.mxu2 %v8928_v12 }
 0x351   :  { %3533 = vmatpush.bf16.msrb.mxu0 %v8920_v1 }
 0x352   :  { %v3311_v61 = vadd.f32 %v3310_v31, %v2866_v8  ;;  %v3326_v18 = vadd.f32 %v3325_v0, %v3324_v5  ;;  %v8919_v5 = vld [vmem:[#allocation12 + $0x40] sm:$0xff] }
 0x353   :  { %v8911_v8 = vld [vmem:[#allocation12] sm:$0xff]  ;;  %3782 = vmatpush.bf16.msra.mxu3 %v8936_v16 }
 0x354   :  { %v3327_v19 = vadd.f32 %v3326_v18, %v2882_v49  ;;  %v10280_v55 = vmul.f32 0.0125, %v3311_v61  ;;  %v8927_v49 = vld [vmem:[#allocation12 + $0x80] sm:$0xff]  ;;  %3600 = vmatpush.bf16.msrb.mxu1 %v8911_v8 }
 0x355   :  { %v8935_v61 = vld [vmem:[#allocation12 + $0xc0] sm:$0xff]  ;;  %3534 = vmatpush.bf16.msrb.mxu0 %v8919_v5  ;;  %3690 = vmatpush.bf16.msra.mxu2 %v8927_v49 }
 0x356   :  { %v3336_v63 = vmul.f32 0.0125, %v3327_v19  ;;  %v3337_v36 = vmul.f32 %v10280_v55, %v10280_v55 }
 0x357   :  { %3783 = vmatpush.bf16.msra.mxu3 %v8935_v61 }
 0x358   :  { %v3338_v62 = vsub.f32 %v3336_v63, %v3337_v36  ;;  %v8958_v36 = vld [vmem:[#allocation12 + $0x78] sm:$0xff] }
 0x359   :  { %3922 = vmatpush.bf16.msra.mxu0 %v8958_v36  ;;  %4078 = vmatpush.bf16.msrb.mxu2 %v8966_v6  ;;  %v8945_v6 = vld [vmem:[#allocation12 + $0x10] sm:$0xff] }
 0x35a   :  { %v3339_v29 = vmax.f32 %v3338_v62, 0.0 }
 0x35c   :  { %v3341_v52 = vadd.f32 1e-05, %v3339_v29  ;;  %v8974_v29 = vld [vmem:[#allocation12 + $0xf8] sm:$0xff] }
 0x35d   :  { %4171 = vmatpush.bf16.msrb.mxu3 %v8974_v29  ;;  %3923 = vmatpush.bf16.msra.mxu0 %v8957_v13 }
 0x35e   :  { %9220 = vrsqrt.f32 %v3341_v52  ;;  %vm3348_vm15 = vweird.f32 %v3341_v52  ;;  %4079 = vmatpush.bf16.msrb.mxu2 %v8965_v42 }
 0x361   :  { %3924 = vmatpush.bf16.msra.mxu0 %v8956_v50 }
 0x362   :  { %4080 = vmatpush.bf16.msrb.mxu2 %v8964_v14 }
 0x364   :  { %v9221_v57 = vpop.eup %9220 }
 0x365   :  { %v3343_v60 = vmul.f32 %v9221_v57, %v3341_v52  ;;  %vm3349_vm14 = vweird.f32 %v9221_v57  ;;  %3925 = vmatpush.bf16.msra.mxu0 %v8955_v41 }
 0x366   :  { %vm3350_vm0 = vmor %vm3348_vm15, %vm3349_vm14  ;;  %4081 = vmatpush.bf16.msrb.mxu2 %v8963_v38 }
 0x367   :  { %v3344_v56 = vmul.f32 %v9221_v57, %v3343_v60 }
 0x369   :  { %v3345_v15 = vmul.f32 0.5, %v3344_v56  ;;  %3926 = vmatpush.bf16.msra.mxu0 %v8954_v23 }
 0x36b   :  { %v3346_v27 = vsub.f32 1.5, %v3345_v15 }
 0x36d   :  { %v3347_v10 = vmul.f32 %v9221_v57, %v3346_v27 }
 0x36f   :  { %v3351_v2 = vsel %vm3350_vm0, %v9221_v57, %v3347_v10 }
 0x370   :  { %v3352_v39 = vmul.f32 %v3351_v2, %v3340_v37  ;;  %v8971_v37 = vld [vmem:[#allocation12 + $0xe0] sm:$0xff] }
 0x372   :  { %v3354_v25 = vmul.f32 %v3352_v39, %v10280_v55  ;;  %v3357_v54 = vperm.slane %v3352_v39, 0  ;;  %v8950_v55 = vld [vmem:[#allocation12 + $0x38] sm:$0xff] }
 0x373   :  { %3988 = vmatpush.bf16.msra.mxu1 %v8950_v55 }
 0x374   :  { %v3355_v31 = vsub.f32 %v3353_v28, %v3354_v25  ;;  %v3406_v0 = vmul.f32 %v3357_v54, %v10275_v43  ;;  %v3367_v18 = vmul.f32 %v3357_v54, %v10225_v47  ;;  %v3369_v19 = vmul.f32 %v3357_v54, %v10235_v24  ;;  %v8946_v28 = vld [vmem:[#allocation12 + $0x18] sm:$0xff] }
 0x375   :  { %v3371_v63 = vmul.f32 %v3357_v54, %v10245_v21  ;;  %v3368_v45 = vmul.f32 %v3357_v54, %v10227_v59  ;;  %v3370_v44 = vmul.f32 %v3357_v54, %v10240_v40  ;;  %v3402_v43 = vmul.f32 %v3357_v54, %v10256_v17  ;;  %v8949_v17 = vld [vmem:[#allocation12 + $0x30] sm:$0xff]  ;;  %v8962_v25 = vld [vmem:[#allocation12 + $0x98] sm:$0xff] }
 0x376   :  { %v3360_v62 = vperm.slane %v3355_v31, 0  ;;  %v3403_v32 = vmul.f32 %v3357_v54, %v10254_v33  ;;  %v3404_v47 = vmul.f32 %v3357_v54, %v10258_v26  ;;  %v3405_v24 = vmul.f32 %v3357_v54, %v10262_v3  ;;  %v8973_v33 = vld [vmem:[#allocation12 + $0xf0] sm:$0xff]  ;;  %v8970_v54 = vld [vmem:[#allocation12 + $0xd8] sm:$0xff]  ;;  %4082 = vmatpush.bf16.msrb.mxu2 %v8962_v25 }
 0x377   :  { %3989 = vmatpush.bf16.msra.mxu1 %v8949_v17  ;;  %4172 = vmatpush.bf16.msrb.mxu3 %v8973_v33 }
 0x378   :  { %v3411_v21 = vadd.f32 %v3406_v0, %v3360_v62  ;;  %v3372_v52 = vadd.f32 %v3367_v18, %v3360_v62  ;;  %v3373_v48 = vadd.f32 %v3368_v45, %v3360_v62  ;;  %v3374_v59 = vadd.f32 %v3369_v19, %v3360_v62 }
 0x379   :  { %v3375_v4 = vadd.f32 %v3370_v44, %v3360_v62  ;;  %v3376_v40 = vadd.f32 %v3371_v63, %v3360_v62  ;;  %v3407_v11 = vadd.f32 %v3402_v43, %v3360_v62  ;;  %v3408_v15 = vadd.f32 %v3403_v32, %v3360_v62  ;;  %v8953_v44 = vld [vmem:[#allocation12 + $0x50] sm:$0xff] }
 0x37a   :  { %vm3416_vm1 = vcmp.gt.f32.partialorder %v3411_v21, 0.0  ;;  %v3421_v58 = vmul.f32 0.01, %v3411_v21  ;;  %vm3377_vm2 = vcmp.gt.f32.partialorder %v3372_v52, 0.0  ;;  %vm3378_vm3 = vcmp.gt.f32.partialorder %v3373_v48, 0.0  ;;  %v8961_v43 = vld [vmem:[#allocation12 + $0x90] sm:$0xff]  ;;  %3927 = vmatpush.bf16.msra.mxu0 %v8953_v44 }
 0x37b   :  { %vm3379_vm4 = vcmp.gt.f32.partialorder %v3374_v59, 0.0  ;;  %vm3380_vm5 = vcmp.gt.f32.partialorder %v3375_v4, 0.0  ;;  %v3382_v26 = vmul.f32 0.01, %v3372_v52  ;;  %v3383_v3 = vmul.f32 0.01, %v3373_v48  ;;  %3990 = vmatpush.bf16.msra.mxu1 %v8948_v22  ;;  %4173 = vmatpush.bf16.msrb.mxu3 %v8972_v35 }
 0x37c   :  { %v3426_v51 = vsel %vm3416_vm1, %v3411_v21, %v3421_v58  ;;  %v3384_v34 = vmul.f32 0.01, %v3374_v59  ;;  %v3385_v9 = vmul.f32 0.01, %v3375_v4  ;;  %vm3381_vm6 = vcmp.gt.f32.partialorder %v3376_v40, 0.0  ;;  %v8969_v32 = vld [vmem:[#allocation12 + $0xd0] sm:$0xff]  ;;  %4083 = vmatpush.bf16.msrb.mxu2 %v8961_v43 }
 0x37d   :  { %3431 = vst [vmem:[#allocation3 + $0x51] sm:$0xff] %v3426_v51  ;;  %v3387_v53 = vsel %vm3377_vm2, %v3372_v52, %v3382_v26  ;;  %v3388_v30 = vsel %vm3378_vm3, %v3373_v48, %v3383_v3  ;;  %v3386_v57 = vmul.f32 0.01, %v3376_v40  ;;  %v3409_v27 = vadd.f32 %v3404_v47, %v3360_v62  ;;  %v8952_v47 = vld [vmem:[#allocation12 + $0x48] sm:$0xff]  ;;  %v8951_v48 = vld [vmem:[#allocation12 + $0x40] sm:$0xff] }
 0x37e   :  { %v3389_v60 = vsel %vm3379_vm4, %v3374_v59, %v3384_v34  ;;  %v3390_v56 = vsel %vm3380_vm5, %v3375_v4, %v3385_v9  ;;  %3392 = vst [vmem:[#allocation3 + $0x1] sm:$0xff] %v3387_v53  ;;  %v3410_v46 = vadd.f32 %v3405_v24, %v3360_v62  ;;  %vm3412_vm7 = vcmp.gt.f32.partialorder %v3407_v11, 0.0  ;;  %v8944_v24 = vld [vmem:[#allocation12 + $0x8] sm:$0xff]  ;;  %3928 = vmatpush.bf16.msra.mxu0 %v8952_v47  ;;  %v8943_v59 = vld [vmem:[#allocation12] sm:$0xff] }
 0x37f   :  { %3393 = vst [vmem:[#allocation3 + $0x9] sm:$0xff] %v3388_v30  ;;  %v3391_v7 = vsel %vm3381_vm6, %v3376_v40, %v3386_v57  ;;  %vm3413_vm8 = vcmp.gt.f32.partialorder %v3408_v15, 0.0  ;;  %v3417_v10 = vmul.f32 0.01, %v3407_v11  ;;  %v3418_v2 = vmul.f32 0.01, %v3408_v15  ;;  %3991 = vmatpush.bf16.msra.mxu1 %v8947_v20  ;;  %4174 = vmatpush.bf16.msrb.mxu3 %v8971_v37 }
 0x380   :  { %3394 = vst [vmem:[#allocation3 + $0x11] sm:$0xff] %v3389_v60  ;;  %vm3414_vm9 = vcmp.gt.f32.partialorder %v3409_v27, 0.0  ;;  %v3419_v1 = vmul.f32 0.01, %v3409_v27  ;;  %v3420_v39 = vmul.f32 0.01, %v3410_v46 }
 0x381   :  { %3395 = vst [vmem:[#allocation3 + $0x19] sm:$0xff] %v3390_v56  ;;  %v3422_v12 = vsel %vm3412_vm7, %v3407_v11, %v3417_v10  ;;  %v3423_v16 = vsel %vm3413_vm8, %v3408_v15, %v3418_v2  ;;  %vm3415_vm10 = vcmp.gt.f32.partialorder %v3410_v46, 0.0  ;;  %v8960_v21 = vld [vmem:[#allocation12 + $0x88] sm:$0xff]  ;;  %v8959_v4 = vld [vmem:[#allocation12 + $0x80] sm:$0xff]  ;;  %vm4669_vm5 = vsmask.f32 7938 }
 0x382   :  { %3396 = vst [vmem:[#allocation3 + $0x21] sm:$0xff] %v3391_v7  ;;  %v3424_v0 = vsel %vm3414_vm9, %v3409_v27, %v3419_v1  ;;  %v3425_v63 = vsel %vm3415_vm10, %v3410_v46, %v3420_v39  ;;  %v8968_v52 = vld [vmem:[#allocation12 + $0xc8] sm:$0xff]  ;;  %4084 = vmatpush.bf16.msrb.mxu2 %v8960_v21  ;;  %v8967_v40 = vld [vmem:[#allocation12 + $0xc0] sm:$0xff]  ;;  %3929 = vmatpush.bf16.msra.mxu0 %v8951_v48  ;;  %vm10349_vm6 = vmand %vm3798_vm11, %vm4669_vm5  ;;  %vm4624_vm7 = vcmask 1041408   ;;  %vm4647_vm8 = vsmask.f32 256 }
 0x383   :  { %3427 = vst [vmem:[#allocation3 + $0x31] sm:$0xff] %v3422_v12  ;;  %3992 = vmatpush.bf16.msra.mxu1 %v8946_v28  ;;  %4175 = vmatpush.bf16.msrb.mxu3 %v8970_v54  ;;  %vm4648_vm9 = vsmask.f32 4368  ;;  %vm4675_vm10 = vsmask.f32 1280 }
 0x384   :  { %3428 = vst [vmem:[#allocation3 + $0x39] sm:$0xff] %v3423_v16  ;;  %v3855_v7 = vld [vmem:[#allocation3 + $0x51] ss:$2 sm:$0xf] }
 0x385   :  { %3429 = vst [vmem:[#allocation3 + $0x41] sm:$0xff] %v3424_v0  ;;  %v4011_v27 = vld [vmem:[#allocation3 + $0x52] ss:$2 sm:$0xf]  ;;  %v3857_v41 = vpack.c.bf16 %v3855_v7, %v3855_v7 }
 0x386   :  { %v3456_v5 = vld [vmem:[#allocation3 + $0x1] ss:$2 sm:$0xff]  ;;  %v3432_v8 = vld [vmem:[#allocation3] ss:$2 sm:$0xff]  ;;  %3430 = vst [vmem:[#allocation3 + $0x49] sm:$0xff] %v3425_v63  ;;  %4085 = vmatpush.bf16.msrb.mxu2 %v8959_v4  ;;  %v4013_v38 = vpack.c.bf16 %v4011_v27, %v4011_v27 }
 0x387   :  { %v3612_v31 = vld [vmem:[#allocation3 + $0x2] ss:$2 sm:$0xff]  ;;  %v3705_v49 = vld [vmem:[#allocation3 + $0x3] ss:$2 sm:$0xff]  ;;  %3993 = vmatpush.bf16.msra.mxu1 %v8945_v6  ;;  %4176 = vmatpush.bf16.msrb.mxu3 %v8969_v32 }
 0x388   :  { %v3458_v61 = vld [vmem:[#allocation3 + $0x11] ss:$2 sm:$0xff]  ;;  %v3434_v18 = vld [vmem:[#allocation3 + $0x10] ss:$2 sm:$0xff] }
 0x389   :  { %v3614_v19 = vld [vmem:[#allocation3 + $0x12] ss:$2 sm:$0xff]  ;;  %v3461_v36 = vpack.c.bf16 %v3458_v61, %v3456_v5  ;;  %v3437_v55 = vpack.c.bf16 %v3434_v18, %v3432_v8  ;;  %v3707_v45 = vld [vmem:[#allocation3 + $0x13] ss:$2 sm:$0xff] }
 0x38a   :  { %v3617_v62 = vpack.c.bf16 %v3614_v19, %v3612_v31  ;;  %v3710_v29 = vpack.c.bf16 %v3707_v45, %v3705_v49  ;;  %v3460_v13 = vld [vmem:[#allocation3 + $0x21] ss:$2 sm:$0xf]  ;;  %v3436_v17 = vld [vmem:[#allocation3 + $0x20] ss:$2 sm:$0xf] }
 0x38b   :  { %3535 = vmatmul.bf16.vlgmr.msrb.gmra.mxu0 %v3461_v36  ;;  %3601 = vmatmul.bf16.vlgmr.msrb.gmra.mxu1 %v3437_v55  ;;  %v3616_v42 = vld [vmem:[#allocation3 + $0x22] ss:$2 sm:$0xf]  ;;  %v3709_v58 = vld [vmem:[#allocation3 + $0x23] ss:$2 sm:$0xf]  ;;  %v3462_v33 = vpack.c.bf16 %v3460_v13, %v3460_v13  ;;  %v3438_v26 = vpack.c.bf16 %v3436_v17, %v3436_v17 }
 0x38c   :  { %3691 = vmatmul.bf16.vlgmr.msra.gmra.mxu2 %v3617_v62  ;;  %3784 = vmatmul.bf16.vlgmr.msra.gmra.mxu3 %v3710_v29  ;;  %v3618_v3 = vpack.c.bf16 %v3616_v42, %v3616_v42  ;;  %v3711_v51 = vpack.c.bf16 %v3709_v58, %v3709_v58  ;;  %v3851_v34 = vld [vmem:[#allocation3 + $0x31] ss:$2 sm:$0xff]  ;;  %v3827_v9 = vld [vmem:[#allocation3 + $0x30] ss:$2 sm:$0xff] }
 0x38d   :  { %3994 = vmatpush.bf16.msra.mxu1 %v8944_v24  ;;  %4177 = vmatpush.bf16.msrb.mxu3 %v8968_v52  ;;  %v3853_v53 = vld [vmem:[#allocation3 + $0x41] ss:$2 sm:$0xff]  ;;  %v3829_v30 = vld [vmem:[#allocation3 + $0x40] ss:$2 sm:$0xff] }
 0x38e   :  { %v4007_v57 = vld [vmem:[#allocation3 + $0x32] ss:$2 sm:$0xff]  ;;  %v4009_v50 = vld [vmem:[#allocation3 + $0x42] ss:$2 sm:$0xff]  ;;  %v4100_v22 = vld [vmem:[#allocation3 + $0x33] ss:$2 sm:$0xff]  ;;  %v3856_v56 = vpack.c.bf16 %v3853_v53, %v3851_v34  ;;  %v3832_v14 = vpack.c.bf16 %v3829_v30, %v3827_v9 }
 0x38f   :  { %v4102_v60 = vld [vmem:[#allocation3 + $0x43] ss:$2 sm:$0xff]  ;;  %v4012_v35 = vpack.c.bf16 %v4009_v50, %v4007_v57  ;;  %v3831_v15 = vld [vmem:[#allocation3 + $0x50] ss:$2 sm:$0xf] }
 0x390   :  { %v4105_v11 = vpack.c.bf16 %v4102_v60, %v4100_v22  ;;  %v4104_v46 = vld [vmem:[#allocation3 + $0x53] ss:$2 sm:$0xf]  ;;  %v3833_v20 = vpack.c.bf16 %v3831_v15, %v3831_v15 }
 0x391   :  { %3995 = vmatpush.bf16.msra.mxu1 %v8943_v59  ;;  %4178 = vmatpush.bf16.msrb.mxu3 %v8967_v40  ;;  %v4106_v37 = vpack.c.bf16 %v4104_v46, %v4104_v46 }
 0x39b   :  { %3540 = vmatmul.bf16.gmra.mxu0 %v3462_v33  ;;  %3606 = vmatmul.bf16.gmra.mxu1 %v3438_v26 }
 0x39c   :  { %3696 = vmatmul.bf16.gmra.mxu2 %v3618_v3  ;;  %3789 = vmatmul.bf16.gmra.mxu3 %v3711_v51 }
 0x3ab   :  { %3930 = vmatmul.bf16.vlgmr.msra.gmra.mxu0 %v3856_v56  ;;  %3996 = vmatmul.bf16.vlgmr.msra.gmra.mxu1 %v3832_v14 }
 0x3ac   :  { %4086 = vmatmul.bf16.vlgmr.msrb.gmra.mxu2 %v4012_v35  ;;  %4179 = vmatmul.bf16.vlgmr.msrb.gmra.mxu3 %v4105_v11 }
 0x3bb   :  { %3935 = vmatmul.bf16.gmra.mxu0 %v3857_v41  ;;  %4001 = vmatmul.bf16.gmra.mxu1 %v3833_v20 }
 0x3bc   :  { %4091 = vmatmul.bf16.gmra.mxu2 %v4013_v38  ;;  %4184 = vmatmul.bf16.gmra.mxu3 %v4106_v37 }
 0x408   :  { %v3536_v10 = vpop.f32.mrf.mxu0  ;;  %v3602_v2 = vpop.f32.mrf.mxu1 }
 0x409   :  { %v3603_v45 = vadd.f32 %v3602_v2, %v3536_v10 }
 0x40f   :  { %v3692_v1 = vpop.f32.mrf.mxu2  ;;  %v3785_v23 = vpop.f32.mrf.mxu3 }
 0x410   :  { %v3538_v39 = vpop.f32.mrf.mxu0  ;;  %v3604_v12 = vpop.f32.mrf.mxu1  ;;  %v3701_v6 = vadd.f32 %v3692_v1, %v3603_v45  ;;  %v8981_v45 = vld [vmem:[#allocation14 + $0x30] sm:$0xff] }
 0x411   :  { %v3605_v62 = vadd.f32 %v3604_v12, %v3538_v39 }
 0x412   :  { %v10307_v21 = vadd.f32 %v3785_v23, %v3701_v6 }
 0x414   :  { %v3808_v4 = vmul.f32 %v10307_v21, %v10307_v21 }
 0x417   :  { %v3694_v16 = vpop.f32.mrf.mxu2  ;;  %v3787_v28 = vpop.f32.mrf.mxu3 }
 0x418   :  { %v3541_v25 = vpop.f32.mrf.mxu0  ;;  %v3607_v54 = vpop.f32.mrf.mxu1  ;;  %v3702_v44 = vadd.f32 %v3694_v16, %v3605_v62  ;;  %v8989_v62 = vld [vmem:[#allocation14 + $0x70] sm:$0xff] }
 0x419   :  { %v3608_v5 = vadd.f32 %v3607_v54, %v3541_v25 }
 0x41a   :  { %v10305_v24 = vadd.f32 %v3787_v28, %v3702_v44  ;;  %v8997_v44 = vld [vmem:[#allocation14 + $0xb0] sm:$0xff] }
 0x41c   :  { %v3809_v48 = vmul.f32 %v10305_v24, %v10305_v24  ;;  %v3797_v40 = vadd.f32 %v10305_v24, %v10307_v21 }
 0x41e   :  { %v3811_v3 = vadd.f32 %v3809_v48, %v3808_v4  ;;  %v8980_v4 = vld [vmem:[#allocation14 + $0x28] sm:$0xff] }
 0x41f   :  { %v3697_v8 = vpop.f32.mrf.mxu2  ;;  %v3790_v31 = vpop.f32.mrf.mxu3 }
 0x420   :  { %v3703_v0 = vadd.f32 %v3697_v8, %v3608_v5  ;;  %v3543_v49 = vpop.f32.mrf.mxu0  ;;  %v3609_v61 = vpop.f32.mrf.mxu1  ;;  %v8990_v8 = vld [vmem:[#allocation14 + $0x78] sm:$0xff] }
 0x421   :  { %4378 = vmatpush.bf16.msrb.mxu0 %v8990_v8  ;;  %v9030_v8 = vld [vmem:[#allocation14 + $0xb8] sm:$0xff] }
 0x422   :  { %v3796_v18 = vadd.f32 %v3790_v31, %v3703_v0  ;;  %v8982_v31 = vld [vmem:[#allocation14 + $0x38] sm:$0xff] }
 0x423   :  { %v8998_v0 = vld [vmem:[#allocation14 + $0xb8] sm:$0xff]  ;;  %4440 = vmatpush.bf16.msrb.mxu1 %v8982_v31 }
 0x424   :  { %3823 = vst [vmem:[#allocation4 + $0x11] sm:$0xf] %v3796_v18  ;;  %v3810_v52 = vmul.f32 %v3796_v18, %v3796_v18  ;;  %v3799_v59 = vsel %vm3798_vm11, %v3796_v18, 0.0  ;;  %4523 = vmatpush.bf16.msra.mxu2 %v8998_v0  ;;  %v9038_v31 = vld [vmem:[#allocation14 + $0xf8] sm:$0xff] }
 0x425   :  { %v3800_v51 = vadd.f32 %v3799_v59, %v3797_v40  ;;  %4379 = vmatpush.bf16.msrb.mxu0 %v8989_v62  ;;  %v8988_v59 = vld [vmem:[#allocation14 + $0x68] sm:$0xff] }
 0x426   :  { %v3812_v58 = vsel %vm3798_vm11, %v3810_v52, 0.0  ;;  %v8996_v40 = vld [vmem:[#allocation14 + $0xa8] sm:$0xff] }
 0x427   :  { %v3699_v19 = vpop.f32.mrf.mxu2  ;;  %v3792_v63 = vpop.f32.mrf.mxu3  ;;  %v3813_v53 = vadd.f32 %v3812_v58, %v3811_v3  ;;  %v3801_v57 = vrot.slane %v3800_v51, 4  ;;  %4441 = vmatpush.bf16.msrb.mxu1 %v8981_v45  ;;  %v9004_v58 = vld [vmem:[#allocation14 + $0xe8] sm:$0xff] }
 0x428   :  { %v3931_v36 = vpop.f32.mrf.mxu0  ;;  %v3997_v55 = vpop.f32.mrf.mxu1  ;;  %v9006_v19 = vld [vmem:[#allocation14 + $0xf8] sm:$0xff]  ;;  %4524 = vmatpush.bf16.msra.mxu2 %v8997_v44  ;;  %v9020_v62 = vld [vmem:[#allocation14 + $0x68] sm:$0xff] }
 0x429   :  { %v3998_v34 = vadd.f32 %v3997_v55, %v3931_v36  ;;  %v3814_v60 = vrot.slane %v3813_v53, 4  ;;  %v3802_v27 = vadd.f32 %v3801_v57, %v3800_v51  ;;  %4608 = vmatpush.bf16.msra.mxu3 %v9006_v19  ;;  %4380 = vmatpush.bf16.msrb.mxu0 %v8988_v59  ;;  %v8987_v51 = vld [vmem:[#allocation14 + $0x60] sm:$0xff]  ;;  %v9029_v19 = vld [vmem:[#allocation14 + $0xb0] sm:$0xff]  ;;  %v9012_v45 = vld [vmem:[#allocation14 + $0x28] sm:$0xff] }
 0x42a   :  { %v9003_v57 = vld [vmem:[#allocation14 + $0xe0] sm:$0xff]  ;;  %v9028_v44 = vld [vmem:[#allocation14 + $0xa8] sm:$0xff] }
 0x42b   :  { %v3815_v20 = vadd.f32 %v3814_v60, %v3813_v53  ;;  %v3803_v1 = vrot.slane %v3802_v27, 2  ;;  %4442 = vmatpush.bf16.msrb.mxu1 %v8980_v4  ;;  %v9027_v59 = vld [vmem:[#allocation14 + $0xa0] sm:$0xff]  ;;  %v4238_v4 = vld [vmem:[%s10447_s12] sm:$0x1] }
 0x42c   :  { %4525 = vmatpush.bf16.msra.mxu2 %v8996_v40  ;;  %v9035_v40 = vld [vmem:[#allocation14 + $0xe0] sm:$0xff] }
 0x42d   :  { %v3816_v16 = vrot.slane %v3815_v20, 2  ;;  %v3804_v49 = vadd.f32 %v3803_v1, %v3802_v27  ;;  %4381 = vmatpush.bf16.msrb.mxu0 %v8987_v51  ;;  %v8992_v1 = vld [vmem:[#allocation14 + $0x88] sm:$0xff] }
 0x42f   :  { %v4087_v29 = vpop.f32.mrf.mxu2  ;;  %v4180_v43 = vpop.f32.mrf.mxu3  ;;  %v3817_v63 = vadd.f32 %v3816_v16, %v3815_v20  ;;  %v3805_v6 = vrot.slane %v3804_v49, 1  ;;  %v8993_v20 = vld [vmem:[#allocation14 + $0x90] sm:$0xff]  ;;  %v8991_v16 = vld [vmem:[#allocation14 + $0x80] sm:$0xff] }
 0x430   :  { %v3933_v32 = vpop.f32.mrf.mxu0  ;;  %v3999_v47 = vpop.f32.mrf.mxu1  ;;  %v4096_v30 = vadd.f32 %v4087_v29, %v3998_v34  ;;  %v8979_v34 = vld [vmem:[#allocation14 + $0x20] sm:$0xff] }
 0x431   :  { %v4000_v13 = vadd.f32 %v3999_v47, %v3933_v32  ;;  %v9005_v32 = vld [vmem:[#allocation14 + $0xf0] sm:$0xff]  ;;  %v3818_v47 = vrot.slane %v3817_v63, 1  ;;  %4443 = vmatpush.bf16.msrb.mxu1 %v8979_v34  ;;  %v9034_v34 = vld [vmem:[#allocation14 + $0xd8] sm:$0xff] }
 0x432   :  { %v10319_v56 = vadd.f32 %v4180_v43, %v4096_v30  ;;  %4609 = vmatpush.bf16.msra.mxu3 %v9005_v32 }
 0x434   :  { %v4202_v38 = vmul.f32 %v10319_v56, %v10319_v56 }
 0x436   :  { %4610 = vmatpush.bf16.msra.mxu3 %v9004_v58  ;;  %v9010_v58 = vld [vmem:[#allocation14 + $0x18] sm:$0xff] }
 0x437   :  { %v4089_v17 = vpop.f32.mrf.mxu2  ;;  %v4182_v42 = vpop.f32.mrf.mxu3 }
 0x438   :  { %v3936_v33 = vpop.f32.mrf.mxu0  ;;  %v4002_v26 = vpop.f32.mrf.mxu1  ;;  %v4097_v9 = vadd.f32 %v4089_v17, %v4000_v13  ;;  %v3806_v13 = vadd.f32 %v3805_v6, %v3804_v49  ;;  %v9036_v6 = vld [vmem:[#allocation14 + $0xe8] sm:$0xff] }
 0x439   :  { %v4003_v22 = vadd.f32 %v4002_v26, %v3936_v33  ;;  %v3819_v33 = vadd.f32 %v3818_v47, %v3817_v63  ;;  %v9037_v63 = vld [vmem:[#allocation14 + $0xf0] sm:$0xff]  ;;  %v9019_v47 = vld [vmem:[#allocation14 + $0x60] sm:$0xff] }
 0x43a   :  { %v10317_v50 = vadd.f32 %v4182_v42, %v4097_v9  ;;  %v8995_v9 = vld [vmem:[#allocation14 + $0xa0] sm:$0xff]  ;;  %4611 = vmatpush.bf16.msra.mxu3 %v9003_v57 }
 0x43b   :  { %4526 = vmatpush.bf16.msra.mxu2 %v8995_v9 }
 0x43c   :  { %v4203_v46 = vmul.f32 %v10317_v50, %v10317_v50  ;;  %v4192_v37 = vadd.f32 %v10317_v50, %v10319_v56 }
 0x43e   :  { %v4205_v23 = vadd.f32 %v4203_v46, %v4202_v38  ;;  %v8985_v46 = vld [vmem:[#allocation14 + $0x50] sm:$0xff] }
 0x43f   :  { %v4092_v14 = vpop.f32.mrf.mxu2  ;;  %v4185_v35 = vpop.f32.mrf.mxu3 }
 0x440   :  { %v4098_v11 = vadd.f32 %v4092_v14, %v4003_v22  ;;  %v3938_v7 = vpop.f32.mrf.mxu0  ;;  %v4004_v15 = vpop.f32.mrf.mxu1  ;;  %v8986_v14 = vld [vmem:[#allocation14 + $0x58] sm:$0xff] }
 0x441   :  { %v9002_v15 = vld [vmem:[#allocation14 + $0xd8] sm:$0xff]  ;;  %4382 = vmatpush.bf16.msrb.mxu0 %v8986_v14 }
 0x442   :  { %v4191_v41 = vadd.f32 %v4185_v35, %v4098_v11  ;;  %v8978_v35 = vld [vmem:[#allocation14 + $0x18] sm:$0xff]  ;;  %4612 = vmatpush.bf16.msra.mxu3 %v9002_v15 }
 0x443   :  { %v8994_v11 = vld [vmem:[#allocation14 + $0x98] sm:$0xff]  ;;  %4444 = vmatpush.bf16.msrb.mxu1 %v8978_v35  ;;  %v9017_v35 = vld [vmem:[#allocation14 + $0x50] sm:$0xff] }
 0x444   :  { %v4193_v10 = vsel %vm3798_vm11, %v4191_v41, 0.0  ;;  %v4204_v2 = vmul.f32 %v4191_v41, %v4191_v41  ;;  %4217 = vst [vmem:[#allocation4 + $0x29] sm:$0xf] %v4191_v41  ;;  %4527 = vmatpush.bf16.msra.mxu2 %v8994_v11  ;;  %v8977_v41 = vld [vmem:[#allocation14 + $0x10] sm:$0xff] }
 0x445   :  { %v4194_v39 = vadd.f32 %v4193_v10, %v4192_v37  ;;  %v9001_v37 = vld [vmem:[#allocation14 + $0xd0] sm:$0xff]  ;;  %4383 = vmatpush.bf16.msrb.mxu0 %v8985_v46  ;;  %v8984_v10 = vld [vmem:[#allocation14 + $0x48] sm:$0xff] }
 0x446   :  { %v4206_v12 = vsel %vm3798_vm11, %v4204_v2, 0.0  ;;  %4613 = vmatpush.bf16.msra.mxu3 %v9001_v37  ;;  %v8976_v2 = vld [vmem:[#allocation14 + $0x8] sm:$0xff]  ;;  %v9009_v11 = vld [vmem:[#allocation14 + $0x10] sm:$0xff]  ;;  %vm4680_vm11 = vcmask 1040384  }
 0x447   :  { %v4195_v28 = vrot.slane %v4194_v39, 4  ;;  %v4207_v25 = vadd.f32 %v4206_v12, %v4205_v23  ;;  %v4094_v54 = vpop.f32.mrf.mxu2  ;;  %v4187_v5 = vpop.f32.mrf.mxu3  ;;  %4445 = vmatpush.bf16.msrb.mxu1 %v8977_v41  ;;  %v9000_v23 = vld [vmem:[#allocation14 + $0xc8] sm:$0xff]  ;;  %v8975_v12 = vld [vmem:[#allocation14] sm:$0xff]  ;;  %v9025_v46 = vld [vmem:[#allocation14 + $0x90] sm:$0xff] }
 0x448   :  { %4528 = vmatpush.bf16.msra.mxu2 %v8993_v20  ;;  %v9014_v54 = vld [vmem:[#allocation14 + $0x38] sm:$0xff] }
 0x449   :  { %v4196_v61 = vadd.f32 %v4195_v28, %v4194_v39  ;;  %v4208_v18 = vrot.slane %v4207_v25, 4  ;;  %4384 = vmatpush.bf16.msrb.mxu0 %v8984_v10  ;;  %v8983_v39 = vld [vmem:[#allocation14 + $0x40] sm:$0xff] }
 0x44a   :  { %4614 = vmatpush.bf16.msra.mxu3 %v9000_v23  ;;  %v8999_v28 = vld [vmem:[#allocation14 + $0xc0] sm:$0xff] }
 0x44b   :  { %v4197_v36 = vrot.slane %v4196_v61, 2  ;;  %v4209_v55 = vadd.f32 %v4208_v18, %v4207_v25  ;;  %4446 = vmatpush.bf16.msrb.mxu1 %v8976_v2  ;;  %v9022_v25 = vld [vmem:[#allocation14 + $0x78] sm:$0xff]  ;;  %v9013_v18 = vld [vmem:[#allocation14 + $0x30] sm:$0xff] }
 0x44c   :  { %4529 = vmatpush.bf16.msra.mxu2 %v8992_v1 }
 0x44d   :  { %v4198_v29 = vadd.f32 %v4197_v36, %v4196_v61  ;;  %v4210_v43 = vrot.slane %v4209_v55, 2  ;;  %4385 = vmatpush.bf16.msrb.mxu0 %v8983_v39  ;;  %v9021_v61 = vld [vmem:[#allocation14 + $0x70] sm:$0xff]  ;;  %v9024_v39 = vld [vmem:[#allocation14 + $0x88] sm:$0xff] }
 0x44e   :  { %4615 = vmatpush.bf16.msra.mxu3 %v8999_v28 }
 0x44f   :  { %v4199_v52 = vrot.slane %v4198_v29, 1  ;;  %v4211_v48 = vadd.f32 %v4210_v43, %v4209_v55  ;;  %4447 = vmatpush.bf16.msrb.mxu1 %v8975_v12 }
 0x450   :  { %4530 = vmatpush.bf16.msra.mxu2 %v8991_v16 }
 0x451   :  { %v4200_v17 = vadd.f32 %v4199_v52, %v4198_v29  ;;  %v4212_v42 = vrot.slane %v4211_v48, 1  ;;  %4781 = vmatpush.bf16.msra.mxu0 %v9022_v25  ;;  %v4225_v29 = vld [vmem:[%s10443_s8] sm:$0x1]  ;;  %v9011_v52 = vld [vmem:[#allocation14 + $0x20] sm:$0xff]  ;;  %v9032_v25 = vld [vmem:[#allocation14 + $0xc8] sm:$0xff] }
 0x452   :  { %5011 = vmatpush.bf16.msrb.mxu3 %v9038_v31  ;;  %v9015_v31 = vld [vmem:[#allocation14 + $0x40] sm:$0xff] }
 0x453   :  { %v4201_v26 = vadd.f32 %v4200_v17, %v3806_v13  ;;  %v4213_v3 = vadd.f32 %v4212_v42, %v4211_v48  ;;  %4843 = vmatpush.bf16.msra.mxu1 %v9014_v54  ;;  %v9018_v42 = vld [vmem:[#allocation14 + $0x58] sm:$0xff] }
 0x454   :  { %4926 = vmatpush.bf16.msrb.mxu2 %v9030_v8 }
 0x455   :  { %v4214_v53 = vadd.f32 %v4213_v3, %v3819_v33  ;;  %v10329_v30 = vmul.f32 0.025, %v4201_v26  ;;  %4782 = vmatpush.bf16.msra.mxu0 %v9021_v61  ;;  %v9026_v26 = vld [vmem:[#allocation14 + $0x98] sm:$0xff]  ;;  %v4249_v3 = vld [vmem:[#allocation4 + $0x11] sm:$0xf]  ;;  %v9031_v61 = vld [vmem:[#allocation14 + $0xc0] sm:$0xff] }
 0x456   :  { %5012 = vmatpush.bf16.msrb.mxu3 %v9037_v63 }
 0x457   :  { %v4221_v22 = vmul.f32 0.025, %v4214_v53  ;;  %v4222_v60 = vmul.f32 %v10329_v30, %v10329_v30  ;;  %4844 = vmatpush.bf16.msra.mxu1 %v9013_v18 }
 0x458   :  { %4927 = vmatpush.bf16.msrb.mxu2 %v9029_v19 }
 0x459   :  { %v4223_v7 = vsub.f32 %v4221_v22, %v4222_v60  ;;  %4783 = vmatpush.bf16.msra.mxu0 %v9020_v62  ;;  %v4270_v22 = vld [vmem:[#allocation4 + $0x29] sm:$0xf] }
 0x45a   :  { %5013 = vmatpush.bf16.msrb.mxu3 %v9036_v6 }
 0x45b   :  { %v4224_v27 = vmax.f32 %v4223_v7, 0.0  ;;  %4845 = vmatpush.bf16.msra.mxu1 %v9012_v45 }
 0x45c   :  { %4928 = vmatpush.bf16.msrb.mxu2 %v9028_v44 }
 0x45d   :  { %v4226_v38 = vadd.f32 1e-05, %v4224_v27  ;;  %4784 = vmatpush.bf16.msra.mxu0 %v9019_v47 }
 0x45e   :  { %5014 = vmatpush.bf16.msrb.mxu3 %v9035_v40 }
 0x45f   :  { %9222 = vrsqrt.f32 %v4226_v38  ;;  %vm4233_vm13 = vweird.f32 %v4226_v38  ;;  %4846 = vmatpush.bf16.msra.mxu1 %v9011_v52 }
 0x460   :  { %4929 = vmatpush.bf16.msrb.mxu2 %v9027_v59 }
 0x461   :  { %4785 = vmatpush.bf16.msra.mxu0 %v9018_v42 }
 0x462   :  { %5015 = vmatpush.bf16.msrb.mxu3 %v9034_v34 }
 0x463   :  { %4847 = vmatpush.bf16.msra.mxu1 %v9010_v58 }
 0x464   :  { %4930 = vmatpush.bf16.msrb.mxu2 %v9026_v26 }
 0x465   :  { %v9223_v5 = vpop.eup %9222  ;;  %4786 = vmatpush.bf16.msra.mxu0 %v9017_v35 }
 0x466   :  { %v4228_v0 = vmul.f32 %v9223_v5, %v4226_v38  ;;  %vm4234_vm12 = vweird.f32 %v9223_v5  ;;  %v9016_v38 = vld [vmem:[#allocation14 + $0x48] sm:$0xff] }
 0x467   :  { %vm4235_vm14 = vmor %vm4233_vm13, %vm4234_vm12  ;;  %4848 = vmatpush.bf16.msra.mxu1 %v9009_v11 }
 0x468   :  { %v4229_v49 = vmul.f32 %v9223_v5, %v4228_v0  ;;  %4931 = vmatpush.bf16.msrb.mxu2 %v9025_v46  ;;  %v9007_v0 = vld [vmem:[#allocation14] sm:$0xff]  ;;  %vm10358_vm12 = vmor %vm4647_vm8, %vm4648_vm9 }
 0x469   :  { %4787 = vmatpush.bf16.msra.mxu0 %v9016_v38  ;;  %vm10363_vm13 = vmand %vm4624_vm7, %vm4675_vm10 }
 0x46a   :  { %v4230_v36 = vmul.f32 0.5, %v4229_v49  ;;  %v9023_v49 = vld [vmem:[#allocation14 + $0x80] sm:$0xff] }
 0x46c   :  { %v4231_v55 = vsub.f32 1.5, %v4230_v36  ;;  %4932 = vmatpush.bf16.msrb.mxu2 %v9024_v39 }
 0x46d   :  { %4788 = vmatpush.bf16.msra.mxu0 %v9015_v31 }
 0x46e   :  { %v4232_v43 = vmul.f32 %v9223_v5, %v4231_v55 }
 0x470   :  { %v4236_v32 = vsel %vm4235_vm14, %v9223_v5, %v4232_v43  ;;  %4933 = vmatpush.bf16.msrb.mxu2 %v9023_v49  ;;  %vm10368_vm14 = vmand %vm4680_vm11, %vm4647_vm8 }
 0x471   :  { %v4237_v48 = vmul.f32 %v4236_v32, %v4225_v29 }
 0x473   :  { %v4239_v13 = vmul.f32 %v4237_v48, %v10329_v30  ;;  %v4242_v17 = vperm.slane %v4237_v48, 0 }
 0x475   :  { %v4240_v33 = vsub.f32 %v4238_v4, %v4239_v13  ;;  %v4250_v51 = vmul.f32 %v4242_v17, %v10307_v21  ;;  %v4251_v53 = vmul.f32 %v4242_v17, %v10305_v24  ;;  %v4252_v57 = vmul.f32 %v4249_v3, %v4242_v17  ;;  %v9033_v24 = vld [vmem:[#allocation14 + $0xd0] sm:$0xff] }
 0x476   :  { %v4271_v30 = vmul.f32 %v4242_v17, %v10319_v56  ;;  %v4272_v60 = vmul.f32 %v4242_v17, %v10317_v50  ;;  %v4273_v14 = vmul.f32 %v4270_v22, %v4242_v17  ;;  %v9008_v56 = vld [vmem:[#allocation14 + $0x8] sm:$0xff]  ;;  %5016 = vmatpush.bf16.msrb.mxu3 %v9033_v24 }
 0x477   :  { %v4245_v9 = vperm.slane %v4240_v33, 0  ;;  %4849 = vmatpush.bf16.msra.mxu1 %v9008_v56 }
 0x479   :  { %v4253_v7 = vadd.f32 %v4250_v51, %v4245_v9  ;;  %v4254_v15 = vadd.f32 %v4251_v53, %v4245_v9  ;;  %v4255_v27 = vadd.f32 %v4252_v57, %v4245_v9  ;;  %v4274_v21 = vadd.f32 %v4271_v30, %v4245_v9 }
 0x47a   :  { %v4275_v41 = vadd.f32 %v4272_v60, %v4245_v9  ;;  %v4276_v20 = vadd.f32 %v4273_v14, %v4245_v9  ;;  %5017 = vmatpush.bf16.msrb.mxu3 %v9032_v25 }
 0x47b   :  { %vm4256_vm15 = vcmp.gt.f32.partialorder %v4253_v7, 0.0  ;;  %vm4257_vm0 = vcmp.gt.f32.partialorder %v4254_v15, 0.0  ;;  %vm4258_vm1 = vcmp.gt.f32.partialorder %v4255_v27, 0.0  ;;  %v4259_v50 = vmul.f32 0.01, %v4253_v7  ;;  %4850 = vmatpush.bf16.msra.mxu1 %v9007_v0 }
 0x47c   :  { %v4260_v37 = vmul.f32 0.01, %v4254_v15  ;;  %v4261_v10 = vmul.f32 0.01, %v4255_v27  ;;  %vm4277_vm2 = vcmp.gt.f32.partialorder %v4274_v21, 0.0  ;;  %vm4278_vm3 = vcmp.gt.f32.partialorder %v4275_v41, 0.0 }
 0x47d   :  { %v4262_v2 = vsel %vm4256_vm15, %v4253_v7, %v4259_v50  ;;  %vm4279_vm4 = vcmp.gt.f32.partialorder %v4276_v20, 0.0  ;;  %v4280_v1 = vmul.f32 0.01, %v4274_v21  ;;  %v4281_v23 = vmul.f32 0.01, %v4275_v41 }
 0x47e   :  { %v4263_v12 = vsel %vm4257_vm0, %v4254_v15, %v4260_v37  ;;  %v4264_v16 = vsel %vm4258_vm1, %v4255_v27, %v4261_v10  ;;  %v4282_v28 = vmul.f32 0.01, %v4276_v20  ;;  %4265 = vst [vmem:[#allocation4 + $0x1] sm:$0xff] %v4262_v2  ;;  %5018 = vmatpush.bf16.msrb.mxu3 %v9031_v61  ;;  %vm4685_vm15 = vcmask 1043457  }
 0x47f   :  { %v4283_v54 = vsel %vm4277_vm2, %v4274_v21, %v4280_v1  ;;  %4266 = vst [vmem:[#allocation4 + $0x9] sm:$0xff] %v4263_v12  ;;  %v4284_v5 = vsel %vm4278_vm3, %v4275_v41, %v4281_v23  ;;  %vm4686_vm0 = vsmask.f32 7942 }
 0x480   :  { %v4285_v8 = vsel %vm4279_vm4, %v4276_v20, %v4282_v28  ;;  %4267 = vst [vmem:[#allocation4 + $0x11] sm:$0xf] %v4264_v16  ;;  %v4671_v20 = vld [vmem:[#allocation5] sm:$0xf]  ;;  %vm10383_vm1 = vmand %vm4685_vm15, %vm4686_vm0 }
 0x481   :  { %4288 = vst [vmem:[#allocation4 + $0x29] sm:$0xf] %v4285_v8 }
 0x482   :  { %4286 = vst [vmem:[#allocation4 + $0x19] sm:$0xff] %v4283_v54  ;;  %v9050_v54 = vld [vmem:[#allocation15 + $0x58] sm:$0xff] }
 0x483   :  { %4287 = vst [vmem:[#allocation4 + $0x21] sm:$0xff] %v4284_v5 }
 0x486   :  { %v4310_v18 = vld [vmem:[#allocation4 + $0x1] ss:$2 sm:$0xff]  ;;  %v4289_v19 = vld [vmem:[#allocation4] ss:$2 sm:$0xff] }
 0x487   :  { %v4455_v63 = vld [vmem:[#allocation4 + $0x2] ss:$2 sm:$0xff]  ;;  %v4312_v36 = vld [vmem:[#allocation4 + $0x11] ss:$2 sm:$0x3] }
 0x488   :  { %v4291_v55 = vld [vmem:[#allocation4 + $0x10] ss:$2 sm:$0x3]  ;;  %v4313_v62 = vpack.c.bf16 %v4312_v36, %v4310_v18  ;;  %v4540_v6 = vld [vmem:[#allocation4 + $0x3] ss:$2 sm:$0xff] }
 0x489   :  { %v4292_v45 = vpack.c.bf16 %v4291_v55, %v4289_v19  ;;  %v4457_v44 = vld [vmem:[#allocation4 + $0x12] ss:$2 sm:$0x3]  ;;  %v4542_v43 = vld [vmem:[#allocation4 + $0x13] ss:$2 sm:$0x3] }
 0x48a   :  { %v4458_v29 = vpack.c.bf16 %v4457_v44, %v4455_v63  ;;  %4386 = vmatmul.bf16.vlgmr.msrb.gmra.mxu0 %v4313_v62  ;;  %v4543_v32 = vpack.c.bf16 %v4542_v43, %v4540_v6  ;;  %v4713_v47 = vld [vmem:[#allocation4 + $0x19] ss:$2 sm:$0xff]  ;;  %v4715_v52 = vld [vmem:[#allocation4 + $0x29] ss:$2 sm:$0x3] }
 0x48b   :  { %4448 = vmatmul.bf16.vlgmr.msrb.gmra.mxu1 %v4292_v45  ;;  %v4692_v48 = vld [vmem:[#allocation4 + $0x18] ss:$2 sm:$0xff]  ;;  %v4694_v59 = vld [vmem:[#allocation4 + $0x28] ss:$2 sm:$0x3]  ;;  %v4716_v42 = vpack.c.bf16 %v4715_v52, %v4713_v47 }
 0x48c   :  { %4531 = vmatmul.bf16.vlgmr.msra.gmra.mxu2 %v4458_v29  ;;  %4616 = vmatmul.bf16.vlgmr.msra.gmra.mxu3 %v4543_v32  ;;  %v4858_v4 = vld [vmem:[#allocation4 + $0x1a] ss:$2 sm:$0xff]  ;;  %v4860_v40 = vld [vmem:[#allocation4 + $0x2a] ss:$2 sm:$0x3]  ;;  %v4695_v58 = vpack.c.bf16 %v4694_v59, %v4692_v48 }
 0x48d   :  { %v4943_v13 = vld [vmem:[#allocation4 + $0x1b] ss:$2 sm:$0xff]  ;;  %v4945_v17 = vld [vmem:[#allocation4 + $0x2b] ss:$2 sm:$0x3]  ;;  %v4861_v33 = vpack.c.bf16 %v4860_v40, %v4858_v4 }
 0x48e   :  { %v4946_v26 = vpack.c.bf16 %v4945_v17, %v4943_v13  ;;  %v4677_v63 = vld [vmem:[#allocation5 + $0x4] sm:$0x3]  ;;  %v9054_v4 = vld [vmem:[#allocation15 + $0x78] sm:$0xff] }
 0x48f   :  { %v9046_v40 = vld [vmem:[#allocation15 + $0x38] sm:$0xff]  ;;  %5236 = vmatpush.bf16.msrb.mxu0 %v9054_v4 }
 0x490   :  { %5304 = vmatpush.bf16.msrb.mxu1 %v9046_v40 }
 0x49a   :  { %4789 = vmatmul.bf16.vlgmr.msra.gmra.mxu0 %v4716_v42  ;;  %v9070_v42 = vld [vmem:[#allocation15 + $0xf8] sm:$0xff] }
 0x49b   :  { %4851 = vmatmul.bf16.vlgmr.msra.gmra.mxu1 %v4695_v58  ;;  %5470 = vmatpush.bf16.msra.mxu3 %v9070_v42  ;;  %v9058_v42 = vld [vmem:[#allocation15 + $0x98] sm:$0xff] }
 0x49c   :  { %4934 = vmatmul.bf16.vlgmr.msrb.gmra.mxu2 %v4861_v33  ;;  %5019 = vmatmul.bf16.vlgmr.msrb.gmra.mxu3 %v4946_v26 }
 0x507   :  { %v4387_v3 = vpop.f32.mrf.mxu0 }
 0x508   :  { %v4449_v51 = vpop.f32.mrf.mxu1 }
 0x509   :  { %v4450_v34 = vadd.f32 %v4449_v51, %v4387_v3  ;;  %v9062_v3 = vld [vmem:[#allocation15 + $0xb8] sm:$0xff] }
 0x50a   :  { %v5067_v51 = vld [vmem:[#allocation5 + $0x8] sm:$0xf]  ;;  %5386 = vmatpush.bf16.msra.mxu2 %v9062_v3  ;;  %v9041_v3 = vld [vmem:[#allocation15 + $0x10] sm:$0xff] }
 0x50f   :  { %v4532_v9 = vpop.f32.mrf.mxu2  ;;  %v4617_v57 = vpop.f32.mrf.mxu3 }
 0x510   :  { %v4537_v53 = vadd.f32 %v4532_v9, %v4450_v34  ;;  %v4389_v22 = vpop.f32.mrf.mxu0  ;;  %v4451_v30 = vpop.f32.mrf.mxu1 }
 0x511   :  { %v4452_v11 = vadd.f32 %v4451_v30, %v4389_v22  ;;  %v9053_v22 = vld [vmem:[#allocation15 + $0x70] sm:$0xff] }
 0x512   :  { %v4622_v60 = vadd.f32 %v4617_v57, %v4537_v53  ;;  %v9045_v30 = vld [vmem:[#allocation15 + $0x30] sm:$0xff]  ;;  %5237 = vmatpush.bf16.msrb.mxu0 %v9053_v22 }
 0x513   :  { %5305 = vmatpush.bf16.msrb.mxu1 %v9045_v30 }
 0x514   :  { %v4645_v14 = vpack.c.bf16 %v4622_v60, %v4622_v60  ;;  %v4634_v25 = vmul.f32 %v4622_v60, %v4622_v60 }
 0x516   :  { %v4651_v35 = vshrl.u32 %v4645_v14, 16  ;;  %v4654_v27 = vshll.u32 %v4645_v14, 16 }
 0x517   :  { %v4534_v7 = vpop.f32.mrf.mxu2  ;;  %v4619_v46 = vpop.f32.mrf.mxu3 }
 0x518   :  { %v4653_v15 = vrot.slane %v4651_v35, 7  ;;  %v4538_v21 = vadd.f32 %v4534_v7, %v4452_v11  ;;  %v4790_v24 = vpop.f32.mrf.mxu0  ;;  %v4852_v38 = vpop.f32.mrf.mxu1  ;;  %v9102_v35 = vld [vmem:[#allocation15 + $0x1f8] sm:$0xff] }
 0x519   :  { %v4853_v39 = vadd.f32 %v4852_v38, %v4790_v24 }
 0x51a   :  { %v4656_v50 = vor.u32 %v4654_v27, %v4653_v15  ;;  %v4623_v56 = vadd.f32 %v4619_v46, %v4538_v21  ;;  %v4657_v61 = vrot.slane %v4653_v15, 4  ;;  %v9061_v21 = vld [vmem:[#allocation15 + $0xb0] sm:$0xff] }
 0x51b   :  { %5387 = vmatpush.bf16.msra.mxu2 %v9061_v21  ;;  %v9064_v21 = vld [vmem:[#allocation15 + $0xc8] sm:$0xff] }
 0x51c   :  { %v4672_v37 = vsel %vm10349_vm6, %v4656_v50, %v4671_v20  ;;  %v4625_v10 = vsel %vm4624_vm7, %v4623_v56, 0.0  ;;  %v4635_v2 = vmul.f32 %v4623_v56, %v4623_v56  ;;  %v4646_v1 = vpack.c.bf16 %v4623_v56, %v4623_v56 }
 0x51d   :  { %4673 = vst [vmem:[#allocation5] sm:$0xf] %v4672_v37  ;;  %v4626_v12 = vadd.f32 %v4625_v10, %v4622_v60  ;;  %v9069_v60 = vld [vmem:[#allocation15 + $0xf0] sm:$0xff] }
 0x51e   :  { %v4659_v23 = vshrl.u32 %v4646_v1, 16  ;;  %v4636_v16 = vsel %vm4624_vm7, %v4635_v2, 0.0  ;;  %v4662_v8 = vshll.u32 %v4646_v1, 16  ;;  %5471 = vmatpush.bf16.msra.mxu3 %v9069_v60  ;;  %v9052_v1 = vld [vmem:[#allocation15 + $0x68] sm:$0xff] }
 0x51f   :  { %v4935_v28 = vpop.f32.mrf.mxu2  ;;  %v5020_v0 = vpop.f32.mrf.mxu3  ;;  %v4637_v18 = vadd.f32 %v4636_v16, %v4634_v25  ;;  %v4627_v62 = vrot.slane %v4626_v12, 4  ;;  %v9060_v25 = vld [vmem:[#allocation15 + $0xa8] sm:$0xff]  ;;  %5238 = vmatpush.bf16.msrb.mxu0 %v9052_v1 }
 0x520   :  { %v4661_v5 = vrot.slane %v4659_v23, 7  ;;  %v4940_v31 = vadd.f32 %v4935_v28, %v4853_v39  ;;  %v4792_v45 = vpop.f32.mrf.mxu0  ;;  %v4854_v44 = vpop.f32.mrf.mxu1  ;;  %v9044_v23 = vld [vmem:[#allocation15 + $0x28] sm:$0xff]  ;;  %5388 = vmatpush.bf16.msra.mxu2 %v9060_v25 }
 0x521   :  { %v4638_v52 = vrot.slane %v4637_v18, 4  ;;  %v4855_v59 = vadd.f32 %v4854_v44, %v4792_v45  ;;  %v4628_v13 = vadd.f32 %v4627_v62, %v4626_v12  ;;  %v9068_v39 = vld [vmem:[#allocation15 + $0xe8] sm:$0xff]  ;;  %5306 = vmatpush.bf16.msrb.mxu1 %v9044_v23  ;;  %v9094_v23 = vld [vmem:[#allocation15 + $0x1b8] sm:$0xff] }
 0x522   :  { %v4664_v19 = vor.u32 %v4662_v8, %v4661_v5  ;;  %v5025_v55 = vadd.f32 %v5020_v0, %v4940_v31  ;;  %v5070_v31 = vld [vmem:[#allocation5 + $0xc] sm:$0x3]  ;;  %5472 = vmatpush.bf16.msra.mxu3 %v9068_v39  ;;  %v9077_v39 = vld [vmem:[#allocation15 + $0x130] sm:$0xff]  ;;  %v9076_v25 = vld [vmem:[#allocation15 + $0x128] sm:$0xff] }
 0x523   :  { %v4639_v9 = vadd.f32 %v4638_v52, %v4637_v18  ;;  %v4629_v14 = vrot.slane %v4628_v13, 2 }
 0x524   :  { %v4665_v6 = vsel %vm10358_vm12, %v4657_v61, %v4664_v19  ;;  %v4682_v29 = vld [vmem:[#allocation5] sm:$0x1]  ;;  %v5047_v43 = vpack.c.bf16 %v5025_v55, %v5025_v55  ;;  %v5036_v20 = vmul.f32 %v5025_v55, %v5025_v55  ;;  %v9051_v19 = vld [vmem:[#allocation15 + $0x60] sm:$0xff] }
 0x525   :  { %v4678_v32 = vsel %vm10363_vm13, %v4665_v6, %v4677_v63  ;;  %v4683_v47 = vsel %vm10368_vm14, 0, %v4682_v29  ;;  %v4640_v38 = vrot.slane %v4639_v9, 2  ;;  %v4630_v12 = vadd.f32 %v4629_v14, %v4628_v13  ;;  %v9043_v63 = vld [vmem:[#allocation15 + $0x20] sm:$0xff]  ;;  %5239 = vmatpush.bf16.msrb.mxu0 %v9051_v19  ;;  %v9042_v13 = vld [vmem:[#allocation15 + $0x18] sm:$0xff]  ;;  %v9048_v14 = vld [vmem:[#allocation15 + $0x48] sm:$0xff] }
 0x526   :  { %4679 = vst [vmem:[#allocation5 + $0x4] sm:$0x3] %v4678_v32  ;;  %v5050_v48 = vshrl.u32 %v5047_v43, 16  ;;  %v5053_v33 = vshll.u32 %v5047_v43, 16  ;;  %v9059_v43 = vld [vmem:[#allocation15 + $0xa0] sm:$0xff]  ;;  %5307 = vmatpush.bf16.msrb.mxu1 %v9043_v63 }
 0x527   :  { %4684 = vst [vmem:[#allocation5] sm:$0x1] %v4683_v47  ;;  %v4937_v17 = vpop.f32.mrf.mxu2  ;;  %v5022_v34 = vpop.f32.mrf.mxu3  ;;  %v4641_v0 = vadd.f32 %v4640_v38, %v4639_v9  ;;  %v4631_v44 = vrot.slane %v4630_v12, 1  ;;  %5389 = vmatpush.bf16.msra.mxu2 %v9059_v43  ;;  %v9039_v38 = vld [vmem:[#allocation15] sm:$0xff] }
 0x528   :  { %v10378_v58 = vrot.slane %v5050_v48, 7  ;;  %v4941_v26 = vadd.f32 %v4937_v17, %v4855_v59  ;;  %v9066_v17 = vld [vmem:[#allocation15 + $0xd8] sm:$0xff]  ;;  %v9083_v19 = vld [vmem:[#allocation15 + $0x160] sm:$0xff] }
 0x529   :  { %v4642_v59 = vrot.slane %v4641_v0, 1  ;;  %v4632_v36 = vadd.f32 %v4631_v44, %v4630_v12  ;;  %5240 = vmatpush.bf16.msrb.mxu0 %v9050_v54  ;;  %v9085_v12 = vld [vmem:[#allocation15 + $0x170] sm:$0xff]  ;;  %v9099_v63 = vld [vmem:[#allocation15 + $0x1e0] sm:$0xff]  ;;  %v9074_v44 = vld [vmem:[#allocation15 + $0x118] sm:$0xff] }
 0x52a   :  { %v5055_v53 = vor.u32 %v5053_v33, %v10378_v58  ;;  %v5026_v57 = vadd.f32 %v5022_v34, %v4941_v26  ;;  %v5056_v61 = vrot.slane %v10378_v58, 4  ;;  %5308 = vmatpush.bf16.msrb.mxu1 %v9042_v13  ;;  %v9049_v26 = vld [vmem:[#allocation15 + $0x50] sm:$0xff] }
 0x52b   :  { %5390 = vmatpush.bf16.msra.mxu2 %v9058_v42  ;;  %v4643_v34 = vadd.f32 %v4642_v59, %v4641_v0  ;;  %v9092_v0 = vld [vmem:[#allocation15 + $0x1a8] sm:$0xff]  ;;  %v9081_v59 = vld [vmem:[#allocation15 + $0x150] sm:$0xff] }
 0x52c   :  { %v5068_v11 = vsel %vm10349_vm6, %v5055_v53, %v5067_v51  ;;  %v5027_v7 = vsel %vm4624_vm7, %v5026_v57, 0.0  ;;  %v5037_v15 = vmul.f32 %v5026_v57, %v5026_v57  ;;  %v5048_v27 = vpack.c.bf16 %v5026_v57, %v5026_v57  ;;  %v9065_v51 = vld [vmem:[#allocation15 + $0xd0] sm:$0xff] }
 0x52d   :  { %v4688_v46 = vld [vmem:[#allocation5 + $0x4] sm:$0xe]  ;;  %5069 = vst [vmem:[#allocation5 + $0x8] sm:$0xf] %v5068_v11  ;;  %v5028_v24 = vadd.f32 %v5027_v7, %v5025_v55  ;;  %v9067_v55 = vld [vmem:[#allocation15 + $0xe0] sm:$0xff]  ;;  %5241 = vmatpush.bf16.msrb.mxu0 %v9049_v26  ;;  %v9040_v11 = vld [vmem:[#allocation15 + $0x8] sm:$0xff] }
 0x52e   :  { %v4689_v50 = vsel %vm10383_vm1, 0, %v4688_v46  ;;  %v5038_v56 = vsel %vm4624_vm7, %v5037_v15, 0.0  ;;  %v5058_v37 = vshrl.u32 %v5048_v27, 16  ;;  %v5061_v28 = vshll.u32 %v5048_v27, 16  ;;  %5473 = vmatpush.bf16.msra.mxu3 %v9067_v55  ;;  %v9057_v57 = vld [vmem:[#allocation15 + $0x90] sm:$0xff]  ;;  %5309 = vmatpush.bf16.msrb.mxu1 %v9041_v3  ;;  %v9056_v46 = vld [vmem:[#allocation15 + $0x88] sm:$0xff] }
 0x52f   :  { %4690 = vst [vmem:[#allocation5 + $0x4] sm:$0xe] %v4689_v50  ;;  %v5029_v10 = vrot.slane %v5028_v24, 4  ;;  %v5039_v2 = vadd.f32 %v5038_v56, %v5036_v20  ;;  %5391 = vmatpush.bf16.msra.mxu2 %v9057_v57  ;;  %v9063_v50 = vld [vmem:[#allocation15 + $0xc0] sm:$0xff]  ;;  %v5106_v54 = vld [vmem:[#allocation5] sm:$0xf] }
 0x530   :  { %v5060_v16 = vrot.slane %v5058_v37, 7  ;;  %v9078_v37 = vld [vmem:[#allocation15 + $0x138] sm:$0xff]  ;;  %v9072_v26 = vld [vmem:[#allocation15 + $0x108] sm:$0xff] }
 0x531   :  { %v5030_v5 = vadd.f32 %v5029_v10, %v5028_v24  ;;  %v5040_v8 = vrot.slane %v5039_v2, 4  ;;  %5242 = vmatpush.bf16.msrb.mxu0 %v9048_v14  ;;  %v9047_v24 = vld [vmem:[#allocation15 + $0x40] sm:$0xff]  ;;  %v9086_v10 = vld [vmem:[#allocation15 + $0x178] sm:$0xff] }
 0x532   :  { %v5063_v18 = vor.u32 %v5061_v28, %v5060_v16  ;;  %5474 = vmatpush.bf16.msra.mxu3 %v9066_v17  ;;  %5310 = vmatpush.bf16.msrb.mxu1 %v9040_v11  ;;  %v9101_v16 = vld [vmem:[#allocation15 + $0x1f0] sm:$0xff]  ;;  %v9088_v11 = vld [vmem:[#allocation15 + $0x188] sm:$0xff] }
 0x533   :  { %v5031_v62 = vrot.slane %v5030_v5, 2  ;;  %v5041_v45 = vadd.f32 %v5040_v8, %v5039_v2  ;;  %5392 = vmatpush.bf16.msra.mxu2 %v9056_v46  ;;  %v9055_v2 = vld [vmem:[#allocation15 + $0x80] sm:$0xff]  ;;  %v9093_v28 = vld [vmem:[#allocation15 + $0x1b0] sm:$0xff]  ;;  %v9100_v8 = vld [vmem:[#allocation15 + $0x1e8] sm:$0xff] }
 0x534   :  { %v5073_v6 = vld [vmem:[#allocation5 + $0x8] sm:$0x1]  ;;  %v5064_v29 = vsel %vm10358_vm12, %v5056_v61, %v5063_v18  ;;  %v9075_v18 = vld [vmem:[#allocation15 + $0x120] sm:$0xff]  ;;  %v5097_v17 = vld [vmem:[%s10448_s13] sm:$0x1] }
 0x535   :  { %v5074_v32 = vsel %vm10368_vm14, 0, %v5073_v6  ;;  %v5032_v47 = vadd.f32 %v5031_v62, %v5030_v5  ;;  %v5042_v52 = vrot.slane %v5041_v45, 2  ;;  %v5071_v48 = vsel %vm10363_vm13, %v5064_v29, %v5070_v31  ;;  %5243 = vmatpush.bf16.msrb.mxu0 %v9047_v24  ;;  %v9084_v5 = vld [vmem:[#allocation15 + $0x168] sm:$0xff]  ;;  %v9091_v62 = vld [vmem:[#allocation15 + $0x1a0] sm:$0xff]  ;;  %v9082_v6 = vld [vmem:[#allocation15 + $0x158] sm:$0xff] }
 0x536   :  { %5075 = vst [vmem:[#allocation5 + $0x8] sm:$0x1] %v5074_v32  ;;  %5475 = vmatpush.bf16.msra.mxu3 %v9065_v51  ;;  %5311 = vmatpush.bf16.msrb.mxu1 %v9039_v38  ;;  %v9098_v29 = vld [vmem:[#allocation15 + $0x1d8] sm:$0xff]  ;;  %v5107_v42 = vld [vmem:[#allocation5 + $0x4] sm:$0x3]  ;;  %v9095_v24 = vld [vmem:[#allocation15 + $0x1c0] sm:$0xff] }
 0x537   :  { %v5033_v4 = vrot.slane %v5032_v47, 1  ;;  %v5043_v40 = vadd.f32 %v5042_v52, %v5041_v45  ;;  %5072 = vst [vmem:[#allocation5 + $0xc] sm:$0x3] %v5071_v48  ;;  %5393 = vmatpush.bf16.msra.mxu2 %v9055_v2  ;;  %v9090_v32 = vld [vmem:[#allocation15 + $0x198] sm:$0xff]  ;;  %v9073_v48 = vld [vmem:[#allocation15 + $0x110] sm:$0xff] }
 0x539   :  { %v5034_v58 = vadd.f32 %v5033_v4, %v5032_v47  ;;  %v5044_v33 = vrot.slane %v5043_v40, 1  ;;  %5553 = vmatpush.bf16.msra.mxu0 %v9078_v37  ;;  %v5084_v47 = vld [vmem:[%s10444_s9] sm:$0x1] }
 0x53a   :  { %5476 = vmatpush.bf16.msra.mxu3 %v9064_v21  ;;  %5637 = vmatpush.bf16.msra.mxu1 %v9086_v10  ;;  %v9097_v4 = vld [vmem:[#allocation15 + $0x1d0] sm:$0xff]  ;;  %v9087_v10 = vld [vmem:[#allocation15 + $0x180] sm:$0xff] }
 0x53b   :  { %v5035_v9 = vadd.f32 %v5034_v58, %v4632_v36  ;;  %v5045_v53 = vadd.f32 %v5044_v33, %v5043_v40  ;;  %5720 = vmatpush.bf16.msrb.mxu2 %v9094_v23  ;;  %v9089_v36 = vld [vmem:[#allocation15 + $0x190] sm:$0xff] }
 0x53d   :  { %v5046_v22 = vadd.f32 %v5045_v53, %v4643_v34  ;;  %v10400_v30 = vmul.f32 0.05, %v5035_v9  ;;  %5554 = vmatpush.bf16.msra.mxu0 %v9077_v39  ;;  %v5127_v58 = vld [vmem:[#allocation5 + $0x8] sm:$0xf]  ;;  %v9080_v34 = vld [vmem:[#allocation15 + $0x148] sm:$0xff]  ;;  %v5108_v53 = vunpack.c.l.bf16 %v5106_v54 }
 0x53e   :  { %v5076_v60 = vld [vmem:[#allocation5 + $0xc] sm:$0xe]  ;;  %5477 = vmatpush.bf16.msra.mxu3 %v9063_v50  ;;  %5638 = vmatpush.bf16.msra.mxu1 %v9085_v12  ;;  %v9096_v9 = vld [vmem:[#allocation15 + $0x1c8] sm:$0xff] }
 0x53f   :  { %v5077_v7 = vsel %vm10383_vm1, 0, %v5076_v60  ;;  %v5080_v15 = vmul.f32 0.05, %v5046_v22  ;;  %v5081_v27 = vmul.f32 %v10400_v30, %v10400_v30  ;;  %5721 = vmatpush.bf16.msrb.mxu2 %v9093_v28  ;;  %v5109_v22 = vunpack.c.l.bf16 %v5107_v42  ;;  %v9109_v42 = vld [vmem:[#allocation15 + $0x230] sm:$0xff] }
 0x540   :  { %5078 = vst [vmem:[#allocation5 + $0xc] sm:$0xe] %v5077_v7  ;;  %v5129_v60 = vunpack.c.l.bf16 %v5127_v58 }
 0x541   :  { %v5082_v20 = vsub.f32 %v5080_v15, %v5081_v27  ;;  %5555 = vmatpush.bf16.msra.mxu0 %v9076_v25  ;;  %v9071_v15 = vld [vmem:[#allocation15 + $0x100] sm:$0xff] }
 0x542   :  { %5799 = vmatpush.bf16.msrb.mxu3 %v9102_v35  ;;  %5639 = vmatpush.bf16.msra.mxu1 %v9084_v5 }
 0x543   :  { %v5083_v56 = vmax.f32 %v5082_v20, 0.0  ;;  %5722 = vmatpush.bf16.msrb.mxu2 %v9092_v0 }
 0x545   :  { %v5085_v1 = vadd.f32 1e-05, %v5083_v56  ;;  %5556 = vmatpush.bf16.msra.mxu0 %v9075_v18 }
 0x546   :  { %5800 = vmatpush.bf16.msrb.mxu3 %v9101_v16  ;;  %5640 = vmatpush.bf16.msra.mxu1 %v9083_v19 }
 0x547   :  { %9224 = vrsqrt.f32 %v5085_v1  ;;  %5723 = vmatpush.bf16.msrb.mxu2 %v9091_v62  ;;  %vm5092_vm3 = vweird.f32 %v5085_v1  ;;  %v5128_v33 = vld [vmem:[#allocation5 + $0xc] sm:$0x3] }
 0x548   :  { %v5130_v14 = vunpack.c.l.bf16 %v5128_v33  ;;  %v5145_v18 = vld [vmem:[#allocation5 + $0xc] sm:$0x3] }
 0x549   :  { %5557 = vmatpush.bf16.msra.mxu0 %v9074_v44 }
 0x54a   :  { %5801 = vmatpush.bf16.msrb.mxu3 %v9100_v8  ;;  %5641 = vmatpush.bf16.msra.mxu1 %v9082_v6 }
 0x54b   :  { %5724 = vmatpush.bf16.msrb.mxu2 %v9090_v32 }
 0x54d   :  { %v9225_v31 = vpop.eup %9224  ;;  %5558 = vmatpush.bf16.msra.mxu0 %v9073_v48  ;;  %v9110_v48 = vld [vmem:[#allocation15 + $0x238] sm:$0xff] }
 0x54e   :  { %v5087_v61 = vmul.f32 %v9225_v31, %v5085_v1  ;;  %5802 = vmatpush.bf16.msrb.mxu3 %v9099_v63  ;;  %vm5093_vm2 = vweird.f32 %v9225_v31  ;;  %5642 = vmatpush.bf16.msra.mxu1 %v9081_v59 }
 0x54f   :  { %vm5094_vm4 = vmor %vm5092_vm3, %vm5093_vm2  ;;  %5725 = vmatpush.bf16.msrb.mxu2 %v9089_v36  ;;  %v9117_v36 = vld [vmem:[#allocation15 + $0x270] sm:$0xff] }
 0x550   :  { %v5088_v55 = vmul.f32 %v9225_v31, %v5087_v61  ;;  %v5124_v61 = vld [vmem:[#allocation5 + $0x4] sm:$0x3] }
 0x551   :  { %5559 = vmatpush.bf16.msra.mxu0 %v9072_v26  ;;  %v9133_v26 = vld [vmem:[#allocation15 + $0x70] sm:$0xff] }
 0x552   :  { %v5089_v45 = vmul.f32 0.5, %v5088_v55  ;;  %5803 = vmatpush.bf16.msrb.mxu3 %v9098_v29  ;;  %5643 = vmatpush.bf16.msra.mxu1 %v9080_v34  ;;  %v9116_v34 = vld [vmem:[#allocation15 + $0x268] sm:$0xff] }
 0x553   :  { %5726 = vmatpush.bf16.msrb.mxu2 %v9088_v11 }
 0x554   :  { %v5090_v43 = vsub.f32 1.5, %v5089_v45 }
 0x555   :  { %5560 = vmatpush.bf16.msra.mxu0 %v9071_v15 }
 0x556   :  { %v5091_v52 = vmul.f32 %v9225_v31, %v5090_v43  ;;  %5804 = vmatpush.bf16.msrb.mxu3 %v9097_v4 }
 0x557   :  { %5727 = vmatpush.bf16.msrb.mxu2 %v9087_v10  ;;  %v9121_v10 = vld [vmem:[#allocation15 + $0x10] sm:$0xff] }
 0x558   :  { %v5095_v40 = vsel %vm5094_vm4, %v9225_v31, %v5091_v52 }
 0x559   :  { %v5096_v13 = vmul.f32 %v5095_v40, %v5084_v47  ;;  %v9118_v40 = vld [vmem:[#allocation15 + $0x278] sm:$0xff] }
 0x55a   :  { %5805 = vmatpush.bf16.msrb.mxu3 %v9096_v9  ;;  %v9124_v9 = vld [vmem:[#allocation15 + $0x28] sm:$0xff] }
 0x55b   :  { %v5098_v3 = vmul.f32 %v5096_v13, %v10400_v30  ;;  %v5101_v51 = vperm.slane %v5096_v13, 0  ;;  %v9079_v30 = vld [vmem:[#allocation15 + $0x140] sm:$0xff] }
 0x55c   :  { %5644 = vmatpush.bf16.msra.mxu1 %v9079_v30  ;;  %v9122_v30 = vld [vmem:[#allocation15 + $0x18] sm:$0xff] }
 0x55d   :  { %v5099_v57 = vsub.f32 %v5097_v17, %v5098_v3  ;;  %v5110_v7 = vmul.f32 %v5108_v53, %v5101_v51  ;;  %v5111_v21 = vmul.f32 %v5109_v22, %v5101_v51  ;;  %v5131_v46 = vmul.f32 %v5129_v60, %v5101_v51  ;;  %v9134_v17 = vld [vmem:[#allocation15 + $0x78] sm:$0xff]  ;;  %v9108_v3 = vld [vmem:[#allocation15 + $0x228] sm:$0xff]  ;;  %v9115_v60 = vld [vmem:[#allocation15 + $0x260] sm:$0xff] }
 0x55e   :  { %v5132_v20 = vmul.f32 %v5130_v14, %v5101_v51  ;;  %5806 = vmatpush.bf16.msrb.mxu3 %v9095_v24  ;;  %v9132_v53 = vld [vmem:[#allocation15 + $0x68] sm:$0xff]  ;;  %v9123_v14 = vld [vmem:[#allocation15 + $0x20] sm:$0xff] }
 0x55f   :  { %v5104_v27 = vperm.slane %v5099_v57, 0  ;;  %v9107_v57 = vld [vmem:[#allocation15 + $0x220] sm:$0xff] }
 0x561   :  { %v5112_v38 = vadd.f32 %v5110_v7, %v5104_v27  ;;  %v5113_v50 = vadd.f32 %v5111_v21, %v5104_v27  ;;  %v5133_v56 = vadd.f32 %v5131_v46, %v5104_v27  ;;  %v5134_v37 = vadd.f32 %v5132_v20, %v5104_v27  ;;  %v9131_v7 = vld [vmem:[#allocation15 + $0x60] sm:$0xff]  ;;  %v9106_v21 = vld [vmem:[#allocation15 + $0x218] sm:$0xff] }
 0x562   :  { %v9114_v46 = vld [vmem:[#allocation15 + $0x258] sm:$0xff] }
 0x563   :  { %vm5114_vm5 = vcmp.gt.f32.partialorder %v5112_v38, 0.0  ;;  %vm5115_vm7 = vcmp.gt.f32.partialorder %v5113_v50, 0.0  ;;  %v5116_v35 = vmul.f32 0.01, %v5112_v38  ;;  %v5117_v2 = vmul.f32 0.01, %v5113_v50 }
 0x564   :  { %vm5135_vm8 = vcmp.gt.f32.partialorder %v5133_v56, 0.0  ;;  %vm5136_vm9 = vcmp.gt.f32.partialorder %v5134_v37, 0.0  ;;  %v5137_v1 = vmul.f32 0.01, %v5133_v56  ;;  %v5138_v23 = vmul.f32 0.01, %v5134_v37 }
 0x565   :  { %v5118_v39 = vsel %vm5114_vm5, %v5112_v38, %v5116_v35  ;;  %v5119_v12 = vsel %vm5115_vm7, %v5113_v50, %v5117_v2  ;;  %v9130_v38 = vld [vmem:[#allocation15 + $0x58] sm:$0xff]  ;;  %v9129_v35 = vld [vmem:[#allocation15 + $0x50] sm:$0xff] }
 0x566   :  { %v5120_v16 = vpack.c.bf16 %v5118_v39, %v5118_v39  ;;  %v5121_v28 = vpack.c.bf16 %v5119_v12, %v5119_v12  ;;  %v5139_v25 = vsel %vm5135_vm8, %v5133_v56, %v5137_v1  ;;  %v5140_v5 = vsel %vm5136_vm9, %v5134_v37, %v5138_v23  ;;  %v9105_v56 = vld [vmem:[#allocation15 + $0x210] sm:$0xff]  ;;  %v9104_v1 = vld [vmem:[#allocation15 + $0x208] sm:$0xff] }
 0x567   :  { %v5141_v8 = vpack.c.bf16 %v5139_v25, %v5139_v25  ;;  %v5142_v31 = vpack.c.bf16 %v5140_v5, %v5140_v5  ;;  %v9113_v37 = vld [vmem:[#allocation15 + $0x250] sm:$0xff]  ;;  %v9112_v23 = vld [vmem:[#allocation15 + $0x248] sm:$0xff] }
 0x568   :  { %v5122_v0 = vsel %vm10349_vm6, %v5120_v16, %v5106_v54  ;;  %v5125_v19 = vsel %vm10363_vm13, %v5121_v28, %v5124_v61  ;;  %v9126_v54 = vld [vmem:[#allocation15 + $0x38] sm:$0xff]  ;;  %v9120_v16 = vld [vmem:[#allocation15 + $0x8] sm:$0xff] }
 0x569   :  { %5123 = vst [vmem:[#allocation5] sm:$0xf] %v5122_v0  ;;  %v5143_v63 = vsel %vm10349_vm6, %v5141_v8, %v5127_v58  ;;  %v5146_v55 = vsel %vm10363_vm13, %v5142_v31, %v5145_v18  ;;  %v9125_v58 = vld [vmem:[#allocation15 + $0x30] sm:$0xff]  ;;  %v9128_v28 = vld [vmem:[#allocation15 + $0x48] sm:$0xff]  ;;  %v9103_v31 = vld [vmem:[#allocation15 + $0x200] sm:$0xff] }
 0x56a   :  { %5144 = vst [vmem:[#allocation5 + $0x8] sm:$0xf] %v5143_v63  ;;  %v9111_v0 = vld [vmem:[#allocation15 + $0x240] sm:$0xff] }
 0x56b   :  { %5147 = vst [vmem:[#allocation5 + $0xc] sm:$0x3] %v5146_v55  ;;  %v9119_v18 = vld [vmem:[#allocation15] sm:$0xff]  ;;  %v9150_v55 = vld [vmem:[#allocation15 + $0xf8] sm:$0xff] }
 0x56c   :  { %5126 = vst [vmem:[#allocation5 + $0x4] sm:$0x3] %v5125_v19  ;;  %v9142_v19 = vld [vmem:[#allocation15 + $0xb8] sm:$0xff] }
 0x570   :  { %v5166_v62 = vld [vmem:[#allocation5] sm:$0x2]  ;;  %v5149_v45 = vld [vmem:[#allocation5] sm:$0x1]  ;;  %v5400_v44 = vld [vmem:[#allocation5] sm:$0x4] }
 0x571   :  { %v5184_v6 = vunpack.c.l.b16 %v5166_v62  ;;  %v5250_v29 = vunpack.c.l.b16 %v5149_v45  ;;  %v5418_v43 = vunpack.c.l.b16 %v5400_v44  ;;  %v5567_v33 = vld [vmem:[#allocation5] sm:$0x8]  ;;  %v5984_v39 = vld [vmem:[#allocation5 + $0x8] sm:$0x1]  ;;  %v6001_v5 = vld [vmem:[#allocation5 + $0x8] sm:$0x2] }
 0x572   :  { %v5585_v51 = vunpack.c.l.b16 %v5567_v33  ;;  %v6085_v8 = vunpack.c.l.b16 %v5984_v39  ;;  %v6019_v63 = vunpack.c.l.b16 %v6001_v5  ;;  %v9166_v62 = vld [vmem:[#allocation15 + $0x178] sm:$0xff]  ;;  %v9127_v44 = vld [vmem:[#allocation15 + $0x40] sm:$0xff]  ;;  %v9197_v5 = vld [vmem:[#allocation15 + $0x270] sm:$0xff] }
 0x573   :  { %v5185_v32 = vpack.c.b16 %v5184_v6, %v5184_v6  ;;  %v5251_v47 = vpack.c.b16 %v5250_v29, %v5250_v29  ;;  %v5419_v52 = vpack.c.b16 %v5418_v43, %v5418_v43  ;;  %v5734_v24 = vld [vmem:[#allocation5 + $0x4] sm:$0x1]  ;;  %v5898_v2 = vld [vmem:[#allocation5 + $0x4] sm:$0x2]  ;;  %v9158_v29 = vld [vmem:[#allocation15 + $0x138] sm:$0xff] }
 0x574   :  { %v5586_v22 = vpack.c.b16 %v5585_v51, %v5585_v51  ;;  %v5830_v12 = vunpack.c.l.b16 %v5734_v24  ;;  %v5916_v25 = vunpack.c.l.b16 %v5898_v2  ;;  %v6086_v6 = vpack.c.b16 %v6085_v8, %v6085_v8  ;;  %v9155_v33 = vld [vmem:[#allocation15 + $0x120] sm:$0xff]  ;;  %v9162_v51 = vld [vmem:[#allocation15 + $0x158] sm:$0xff] }
 0x575   :  { %v5186_v59 = vrot.slane %v5185_v32, 1  ;;  %v5253_v4 = vshrl.u32 %v5251_v47, 16  ;;  %v5420_v41 = vrot.slane %v5419_v52, 2  ;;  %v5334_v49 = vshrl.u32 %v5185_v32, 16  ;;  %v9141_v32 = vld [vmem:[#allocation15 + $0xb0] sm:$0xff] }
 0x576   :  { %v5501_v11 = vshrl.u32 %v5419_v52, 16  ;;  %v5668_v15 = vshrl.u32 %v5586_v22, 16  ;;  %v5587_v20 = vrot.slane %v5586_v22, 3  ;;  %v5831_v61 = vpack.c.b16 %v5830_v12, %v5830_v12  ;;  %v6235_v22 = vld [vmem:[#allocation5 + $0x8] sm:$0x4] }
 0x577   :  { %5244 = vmatmul.bf16.vlgmr.msrb.gmra.mxu0 %v5186_v59  ;;  %5312 = vmatmul.bf16.vlgmr.msrb.gmra.mxu1 %v5253_v4  ;;  %v5336_v13 = vrot.slane %v5334_v49, 1  ;;  %v5917_v45 = vpack.c.b16 %v5916_v25, %v5916_v25  ;;  %v10421_v47 = vpack.c.b16 %v6019_v63, %v6019_v63  ;;  %v9165_v59 = vld [vmem:[#allocation15 + $0x170] sm:$0xff]  ;;  %v6088_v4 = vshrl.u32 %v6086_v6, 16  ;;  %v9148_v49 = vld [vmem:[#allocation15 + $0xe8] sm:$0xff]  ;;  %v9171_v63 = vld [vmem:[#allocation15 + $0x1a0] sm:$0xff] }
 0x578   :  { %5478 = vmatmul.bf16.vlgmr.msra.gmra.mxu3 %v5420_v41  ;;  %5884 = vmatpush.bf16.msrb.mxu0 %v9110_v48  ;;  %v5503_v27 = vrot.slane %v5501_v11, 2  ;;  %v5670_v50 = vrot.slane %v5668_v15, 3  ;;  %v5833_v43 = vshrl.u32 %v5831_v61, 16  ;;  %v9149_v48 = vld [vmem:[#allocation15 + $0xf0] sm:$0xff]  ;;  %v6253_v11 = vunpack.c.l.b16 %v6235_v22  ;;  %v9144_v15 = vld [vmem:[#allocation15 + $0xc8] sm:$0xff]  ;;  %v9178_v6 = vld [vmem:[#allocation15 + $0x1d8] sm:$0xff] }
 0x579   :  { %5968 = vmatpush.bf16.msrb.mxu1 %v9118_v40  ;;  %6139 = vmatpush.bf16.msra.mxu3 %v9126_v54  ;;  %v5918_v52 = vrot.slane %v5917_v45, 1  ;;  %v9157_v41 = vld [vmem:[#allocation15 + $0x130] sm:$0xff]  ;;  %v6021_v40 = vrot.slane %v10421_v47, 1  ;;  %v9140_v54 = vld [vmem:[#allocation15 + $0xa8] sm:$0xff]  ;;  %v9187_v45 = vld [vmem:[#allocation15 + $0x220] sm:$0xff] }
 0x57a   :  { %5394 = vmatmul.bf16.vlgmr.msra.gmra.mxu2 %v5336_v13  ;;  %v9164_v13 = vld [vmem:[#allocation15 + $0x168] sm:$0xff]  ;;  %v9181_v25 = vld [vmem:[#allocation15 + $0x1f0] sm:$0xff] }
 0x57b   :  { %6071 = vmatpush.bf16.msra.mxu2 %v9134_v17  ;;  %v9156_v17 = vld [vmem:[#allocation15 + $0x128] sm:$0xff] }
 0x57c   :  { %5885 = vmatpush.bf16.msrb.mxu0 %v9109_v42  ;;  %v9139_v42 = vld [vmem:[#allocation15 + $0xa0] sm:$0xff]  ;;  %v9180_v61 = vld [vmem:[#allocation15 + $0x1e8] sm:$0xff] }
 0x57d   :  { %5969 = vmatpush.bf16.msrb.mxu1 %v9117_v36  ;;  %6140 = vmatpush.bf16.msra.mxu3 %v9125_v58  ;;  %v9147_v36 = vld [vmem:[#allocation15 + $0xe0] sm:$0xff] }
 0x57e   :  { %v9163_v58 = vld [vmem:[#allocation15 + $0x160] sm:$0xff] }
 0x57f   :  { %6072 = vmatpush.bf16.msra.mxu2 %v9133_v26  ;;  %v9138_v26 = vld [vmem:[#allocation15 + $0x98] sm:$0xff] }
 0x580   :  { %5886 = vmatpush.bf16.msrb.mxu0 %v9108_v3  ;;  %v9146_v3 = vld [vmem:[#allocation15 + $0xd8] sm:$0xff] }
 0x581   :  { %5970 = vmatpush.bf16.msrb.mxu1 %v9116_v34  ;;  %6141 = vmatpush.bf16.msra.mxu3 %v9124_v9  ;;  %v9154_v34 = vld [vmem:[#allocation15 + $0x118] sm:$0xff]  ;;  %v9137_v9 = vld [vmem:[#allocation15 + $0x90] sm:$0xff] }
 0x583   :  { %6073 = vmatpush.bf16.msra.mxu2 %v9132_v53  ;;  %v9145_v53 = vld [vmem:[#allocation15 + $0xd0] sm:$0xff] }
 0x584   :  { %5887 = vmatpush.bf16.msrb.mxu0 %v9107_v57  ;;  %v9161_v57 = vld [vmem:[#allocation15 + $0x150] sm:$0xff] }
 0x585   :  { %5971 = vmatpush.bf16.msrb.mxu1 %v9115_v60  ;;  %6142 = vmatpush.bf16.msra.mxu3 %v9123_v14  ;;  %v9153_v60 = vld [vmem:[#allocation15 + $0x110] sm:$0xff]  ;;  %v9136_v14 = vld [vmem:[#allocation15 + $0x88] sm:$0xff] }
 0x587   :  { %6074 = vmatpush.bf16.msra.mxu2 %v9131_v7  ;;  %5561 = vmatmul.bf16.vlgmr.msra.gmra.mxu0 %v5503_v27  ;;  %v6402_v7 = vld [vmem:[#allocation5 + $0x8] sm:$0x8]  ;;  %v9160_v27 = vld [vmem:[#allocation15 + $0x148] sm:$0xff] }
 0x588   :  { %5645 = vmatmul.bf16.vlgmr.msra.gmra.mxu1 %v5587_v20  ;;  %5807 = vmatmul.bf16.vlgmr.msrb.gmra.mxu3 %v5734_v24  ;;  %v9135_v20 = vld [vmem:[#allocation15 + $0x80] sm:$0xff] }
 0x589   :  { %5888 = vmatpush.bf16.msrb.mxu0 %v9106_v21  ;;  %5972 = vmatpush.bf16.msrb.mxu1 %v9114_v46  ;;  %v9152_v21 = vld [vmem:[#allocation15 + $0x108] sm:$0xff]  ;;  %v6420_v46 = vunpack.c.l.b16 %v6402_v7  ;;  %v9143_v24 = vld [vmem:[#allocation15 + $0xc0] sm:$0xff] }
 0x58a   :  { %6143 = vmatpush.bf16.msra.mxu3 %v9122_v30  ;;  %5728 = vmatmul.bf16.vlgmr.msrb.gmra.mxu2 %v5670_v50  ;;  %v6254_v30 = vpack.c.b16 %v6253_v11, %v6253_v11  ;;  %v9174_v50 = vld [vmem:[#allocation15 + $0x1b8] sm:$0xff] }
 0x58b   :  { %6075 = vmatpush.bf16.msra.mxu2 %v9130_v38  ;;  %v9159_v38 = vld [vmem:[#allocation15 + $0x140] sm:$0xff]  ;;  %v10425_v2 = vpack.c.b16 %v6420_v46, %v6420_v46 }
 0x58c   :  { %v6255_v12 = vrot.slane %v6254_v30, 2 }
 0x58d   :  { %5889 = vmatpush.bf16.msrb.mxu0 %v9105_v56  ;;  %5973 = vmatpush.bf16.msrb.mxu1 %v9113_v37  ;;  %v9182_v56 = vld [vmem:[#allocation15 + $0x1f8] sm:$0xff]  ;;  %v6169_v37 = vshrl.u32 %v10421_v47, 16  ;;  %v9177_v47 = vld [vmem:[#allocation15 + $0x1d0] sm:$0xff] }
 0x58e   :  { %6144 = vmatpush.bf16.msra.mxu3 %v9121_v10  ;;  %v9198_v10 = vld [vmem:[#allocation15 + $0x278] sm:$0xff] }
 0x58f   :  { %6076 = vmatpush.bf16.msra.mxu2 %v9129_v35  ;;  %v9151_v35 = vld [vmem:[#allocation15 + $0x100] sm:$0xff]  ;;  %v6171_v39 = vrot.slane %v6169_v37, 1 }
 0x591   :  { %5890 = vmatpush.bf16.msrb.mxu0 %v9104_v1  ;;  %5974 = vmatpush.bf16.msrb.mxu1 %v9112_v23  ;;  %v6336_v1 = vshrl.u32 %v6254_v30, 16  ;;  %v9190_v23 = vld [vmem:[#allocation15 + $0x238] sm:$0xff] }
 0x592   :  { %6145 = vmatpush.bf16.msra.mxu3 %v9120_v16  ;;  %v9173_v16 = vld [vmem:[#allocation15 + $0x1b0] sm:$0xff] }
 0x593   :  { %6077 = vmatpush.bf16.msra.mxu2 %v9128_v28  ;;  %v6422_v28 = vrot.slane %v10425_v2, 3  ;;  %v6338_v8 = vrot.slane %v6336_v1, 2 }
 0x595   :  { %5891 = vmatpush.bf16.msrb.mxu0 %v9103_v31  ;;  %5975 = vmatpush.bf16.msrb.mxu1 %v9111_v0  ;;  %v9189_v31 = vld [vmem:[#allocation15 + $0x230] sm:$0xff]  ;;  %v9172_v0 = vld [vmem:[#allocation15 + $0x1a8] sm:$0xff] }
 0x596   :  { %6146 = vmatpush.bf16.msra.mxu3 %v9119_v18  ;;  %v9196_v18 = vld [vmem:[#allocation15 + $0x268] sm:$0xff] }
 0x597   :  { %6078 = vmatpush.bf16.msra.mxu2 %v9127_v44  ;;  %v9170_v44 = vld [vmem:[#allocation15 + $0x198] sm:$0xff] }
 0x598   :  { %5892 = vmatmul.bf16.vlgmr.msrb.gmra.mxu0 %v5833_v43  ;;  %5976 = vmatmul.bf16.vlgmr.msrb.gmra.mxu1 %v5918_v52  ;;  %v9186_v43 = vld [vmem:[#allocation15 + $0x218] sm:$0xff]  ;;  %v9193_v52 = vld [vmem:[#allocation15 + $0x250] sm:$0xff] }
 0x599   :  { %6221 = vmatpush.bf16.msra.mxu0 %v9142_v19  ;;  %6305 = vmatpush.bf16.msra.mxu1 %v9150_v55  ;;  %v9188_v19 = vld [vmem:[#allocation15 + $0x228] sm:$0xff]  ;;  %v9179_v55 = vld [vmem:[#allocation15 + $0x1e0] sm:$0xff] }
 0x59a   :  { %6472 = vmatpush.bf16.msrb.mxu3 %v9166_v62  ;;  %6079 = vmatmul.bf16.vlgmr.msra.gmra.mxu2 %v6021_v40  ;;  %v9195_v62 = vld [vmem:[#allocation15 + $0x260] sm:$0xff]  ;;  %v9192_v40 = vld [vmem:[#allocation15 + $0x248] sm:$0xff] }
 0x59b   :  { %6388 = vmatpush.bf16.msrb.mxu2 %v9158_v29  ;;  %6147 = vmatmul.bf16.vlgmr.msra.gmra.mxu3 %v6088_v4  ;;  %v9194_v29 = vld [vmem:[#allocation15 + $0x258] sm:$0xff]  ;;  %v9168_v4 = vld [vmem:[#allocation15 + $0x188] sm:$0xff] }
 0x59d   :  { %6222 = vmatpush.bf16.msra.mxu0 %v9141_v32  ;;  %6306 = vmatpush.bf16.msra.mxu1 %v9149_v48  ;;  %v9169_v32 = vld [vmem:[#allocation15 + $0x190] sm:$0xff] }
 0x59e   :  { %6473 = vmatpush.bf16.msrb.mxu3 %v9165_v59  ;;  %v9185_v48 = vld [vmem:[#allocation15 + $0x210] sm:$0xff]  ;;  %v6733_v59 = vld [vmem:[#allocation5 + $0xc] sm:$0x2] }
 0x59f   :  { %6389 = vmatpush.bf16.msrb.mxu2 %v9157_v41  ;;  %v9176_v41 = vld [vmem:[#allocation15 + $0x1c8] sm:$0xff] }
 0x5a1   :  { %6223 = vmatpush.bf16.msra.mxu0 %v9140_v54  ;;  %6307 = vmatpush.bf16.msra.mxu1 %v9148_v49  ;;  %v6569_v54 = vld [vmem:[#allocation5 + $0xc] sm:$0x1]  ;;  %v6751_v49 = vunpack.c.l.b16 %v6733_v59 }
 0x5a2   :  { %6474 = vmatpush.bf16.msrb.mxu3 %v9164_v13  ;;  %v9184_v13 = vld [vmem:[#allocation15 + $0x208] sm:$0xff] }
 0x5a3   :  { %6390 = vmatpush.bf16.msrb.mxu2 %v9156_v17  ;;  %v9167_v17 = vld [vmem:[#allocation15 + $0x180] sm:$0xff] }
 0x5a5   :  { %6224 = vmatpush.bf16.msra.mxu0 %v9139_v42  ;;  %6308 = vmatpush.bf16.msra.mxu1 %v9147_v36  ;;  %v6665_v42 = vunpack.c.l.b16 %v6569_v54  ;;  %v9175_v36 = vld [vmem:[#allocation15 + $0x1c0] sm:$0xff] }
 0x5a6   :  { %6475 = vmatpush.bf16.msrb.mxu3 %v9163_v58  ;;  %v9191_v58 = vld [vmem:[#allocation15 + $0x240] sm:$0xff] }
 0x5a7   :  { %6391 = vmatpush.bf16.msrb.mxu2 %v9155_v33  ;;  %v6503_v33 = vshrl.u32 %v10425_v2, 16 }
 0x5a9   :  { %6225 = vmatpush.bf16.msra.mxu0 %v9138_v26  ;;  %6309 = vmatpush.bf16.msra.mxu1 %v9146_v3  ;;  %v6752_v26 = vpack.c.b16 %v6751_v49, %v6751_v49  ;;  %v9183_v3 = vld [vmem:[#allocation15 + $0x200] sm:$0xff] }
 0x5aa   :  { %6476 = vmatpush.bf16.msrb.mxu3 %v9162_v51  ;;  %v6666_v51 = vpack.c.b16 %v6665_v42, %v6665_v42 }
 0x5ab   :  { %6392 = vmatpush.bf16.msrb.mxu2 %v9154_v34  ;;  %v6505_v34 = vrot.slane %v6503_v33, 3 }
 0x5ad   :  { %6226 = vmatpush.bf16.msra.mxu0 %v9137_v9  ;;  %6310 = vmatpush.bf16.msra.mxu1 %v9145_v53  ;;  %v6753_v9 = vrot.slane %v6752_v26, 1  ;;  %v6668_v53 = vshrl.u32 %v6666_v51, 16 }
 0x5ae   :  { %6477 = vmatpush.bf16.msrb.mxu3 %v9161_v57 }
 0x5af   :  { %6393 = vmatpush.bf16.msrb.mxu2 %v9153_v60 }
 0x5b1   :  { %6227 = vmatpush.bf16.msra.mxu0 %v9136_v14  ;;  %6311 = vmatpush.bf16.msra.mxu1 %v9144_v15 }
 0x5b2   :  { %6478 = vmatpush.bf16.msrb.mxu3 %v9160_v27 }
 0x5b3   :  { %6394 = vmatpush.bf16.msrb.mxu2 %v9152_v21 }
 0x5b5   :  { %6228 = vmatpush.bf16.msra.mxu0 %v9135_v20  ;;  %6312 = vmatpush.bf16.msra.mxu1 %v9143_v24 }
 0x5b6   :  { %6479 = vmatpush.bf16.msrb.mxu3 %v9159_v38 }
 0x5b7   :  { %6395 = vmatpush.bf16.msrb.mxu2 %v9151_v35 }
 0x5b8   :  { %6229 = vmatmul.bf16.vlgmr.msra.gmra.mxu0 %v6171_v39  ;;  %6313 = vmatmul.bf16.vlgmr.msra.gmra.mxu1 %v6255_v12 }
 0x5b9   :  { %6555 = vmatpush.bf16.msrb.mxu0 %v9174_v50  ;;  %6634 = vmatpush.bf16.msrb.mxu1 %v9182_v56 }
 0x5ba   :  { %6803 = vmatpush.bf16.msra.mxu3 %v9198_v10  ;;  %6396 = vmatmul.bf16.vlgmr.msrb.gmra.mxu2 %v6338_v8 }
 0x5bb   :  { %6480 = vmatmul.bf16.vlgmr.msrb.gmra.mxu3 %v6422_v28  ;;  %6719 = vmatpush.bf16.msra.mxu2 %v9190_v23 }
 0x5bd   :  { %6556 = vmatpush.bf16.msrb.mxu0 %v9173_v16  ;;  %6635 = vmatpush.bf16.msrb.mxu1 %v9181_v25  ;;  %v5148_v25 = vld [vmem:[%s10449_s14] sm:$0x1]  ;;  %s9413_s14 = smov [#allocation17]  }
 0x5be   :  { %6804 = vmatpush.bf16.msra.mxu3 %v9197_v5  ;;  %s6824_s0 = sshll.u32 %s9413_s14, 4  ;;  %s6825_s0 = int_to_ptr.vmem [resolvable:$true] %s6824_s0 }
 0x5bf   :  { %6720 = vmatpush.bf16.msra.mxu2 %v9189_v31 }
 0x5c1   :  { %6557 = vmatpush.bf16.msrb.mxu0 %v9172_v0  ;;  %6636 = vmatpush.bf16.msrb.mxu1 %v9180_v61 }
 0x5c2   :  { %6805 = vmatpush.bf16.msra.mxu3 %v9196_v18 }
 0x5c3   :  { %6721 = vmatpush.bf16.msra.mxu2 %v9188_v19 }
 0x5c5   :  { %6558 = vmatpush.bf16.msrb.mxu0 %v9171_v63  ;;  %6637 = vmatpush.bf16.msrb.mxu1 %v9179_v55 }
 0x5c6   :  { %6806 = vmatpush.bf16.msra.mxu3 %v9195_v62 }
 0x5c7   :  { %6722 = vmatpush.bf16.msra.mxu2 %v9187_v45 }
 0x5c9   :  { %6559 = vmatpush.bf16.msrb.mxu0 %v9170_v44  ;;  %6638 = vmatpush.bf16.msrb.mxu1 %v9178_v6 }
 0x5ca   :  { %6807 = vmatpush.bf16.msra.mxu3 %v9194_v29 }
 0x5cb   :  { %6723 = vmatpush.bf16.msra.mxu2 %v9186_v43 }
 0x5cd   :  { %6560 = vmatpush.bf16.msrb.mxu0 %v9169_v32  ;;  %6639 = vmatpush.bf16.msrb.mxu1 %v9177_v47 }
 0x5ce   :  { %6808 = vmatpush.bf16.msra.mxu3 %v9193_v52 }
 0x5cf   :  { %6724 = vmatpush.bf16.msra.mxu2 %v9185_v48 }
 0x5d1   :  { %6561 = vmatpush.bf16.msrb.mxu0 %v9168_v4  ;;  %6640 = vmatpush.bf16.msrb.mxu1 %v9176_v41 }
 0x5d2   :  { %6809 = vmatpush.bf16.msra.mxu3 %v9192_v40 }
 0x5d3   :  { %6725 = vmatpush.bf16.msra.mxu2 %v9184_v13 }
 0x5d5   :  { %6562 = vmatpush.bf16.msrb.mxu0 %v9167_v17  ;;  %6641 = vmatpush.bf16.msrb.mxu1 %v9175_v36 }
 0x5d6   :  { %6810 = vmatpush.bf16.msra.mxu3 %v9191_v58 }
 0x5d7   :  { %6726 = vmatpush.bf16.msra.mxu2 %v9183_v3 }
 0x5d8   :  { %6563 = vmatmul.bf16.vlgmr.msrb.gmra.mxu0 %v6505_v34  ;;  %6642 = vmatmul.bf16.vlgmr.msrb.gmra.mxu1 %v6569_v54 }
 0x5d9   :  { %6811 = vmatmul.bf16.vlgmr.msra.gmra.mxu3 %v6753_v9 }
 0x5da   :  { %6727 = vmatmul.bf16.vlgmr.msra.gmra.mxu2 %v6668_v53 }
 0x5f4   :  { %v5245_v57 = vpop.f32.mrf.mxu0  ;;  %v5313_v22 = vpop.f32.mrf.mxu1 }
 0x5f5   :  { %v5314_v15 = vadd.f32 %v5313_v22, %v5245_v57 }
 0x5fb   :  { %v5479_v60 = vpop.f32.mrf.mxu3 }
 0x5fc   :  { %v5247_v14 = vpop.f32.mrf.mxu0  ;;  %v5315_v11 = vpop.f32.mrf.mxu1 }
 0x5fd   :  { %v5395_v7 = vpop.f32.mrf.mxu2 }
 0x5fe   :  { %v5399_v21 = vadd.f32 %v5395_v7, %v5314_v15 }
 0x600   :  { %v5483_v24 = vadd.f32 %v5479_v60, %v5399_v21 }
 0x603   :  { %v5481_v27 = vpop.f32.mrf.mxu3 }
 0x604   :  { %v5562_v46 = vpop.f32.mrf.mxu0 }
 0x605   :  { %v5397_v20 = vpop.f32.mrf.mxu2  ;;  %v5646_v30 = vpop.f32.mrf.mxu1  ;;  %v5566_v38 = vadd.f32 %v5562_v46, %v5483_v24 }
 0x607   :  { %v5650_v35 = vadd.f32 %v5646_v30, %v5566_v38 }
 0x60b   :  { %v5808_v50 = vpop.f32.mrf.mxu3 }
 0x60c   :  { %v5564_v56 = vpop.f32.mrf.mxu0 }
 0x60d   :  { %v5648_v37 = vpop.f32.mrf.mxu1  ;;  %v5729_v10 = vpop.f32.mrf.mxu2 }
 0x60e   :  { %v5733_v2 = vadd.f32 %v5729_v10, %v5650_v35 }
 0x610   :  { %v5812_v23 = vadd.f32 %v5808_v50, %v5733_v2 }
 0x613   :  { %v5810_v1 = vpop.f32.mrf.mxu3 }
 0x615   :  { %v5731_v39 = vpop.f32.mrf.mxu2  ;;  %v5893_v12 = vpop.f32.mrf.mxu0 }
 0x616   :  { %v5897_v16 = vadd.f32 %v5893_v12, %v5812_v23  ;;  %v5977_v28 = vpop.f32.mrf.mxu1 }
 0x618   :  { %v5981_v5 = vadd.f32 %v5977_v28, %v5897_v16 }
 0x61a   :  { %v5982_v8 = vadd.f32 %v5981_v5, %v5148_v25 }
 0x61c   :  { %5983 = vst [vmem:[#allocation17] sm:$0x1] %v5982_v8 }
 0x61d   :  { %v5895_v0 = vpop.f32.mrf.mxu0  ;;  %v6080_v18 = vpop.f32.mrf.mxu2 }
 0x61e   :  { %v6148_v31 = vpop.f32.mrf.mxu3  ;;  %v5979_v61 = vpop.f32.mrf.mxu1 }
 0x61f   :  { %v6149_v47 = vadd.f32 %v6148_v31, %v6080_v18 }
 0x625   :  { %v6082_v63 = vpop.f32.mrf.mxu2 }
 0x626   :  { %v6150_v19 = vpop.f32.mrf.mxu3 }
 0x635   :  { %v6230_v55 = vpop.f32.mrf.mxu0  ;;  %v6314_v62 = vpop.f32.mrf.mxu1 }
 0x636   :  { %v6234_v52 = vadd.f32 %v6230_v55, %v6149_v47 }
 0x638   :  { %v6318_v48 = vadd.f32 %v6314_v62, %v6234_v52 }
 0x63d   :  { %v6232_v44 = vpop.f32.mrf.mxu0  ;;  %v6316_v6 = vpop.f32.mrf.mxu1 }
 0x63e   :  { %v6481_v45 = vpop.f32.mrf.mxu3  ;;  %v6397_v29 = vpop.f32.mrf.mxu2 }
 0x63f   :  { %v6401_v59 = vadd.f32 %v6397_v29, %v6318_v48 }
 0x641   :  { %v6485_v40 = vadd.f32 %v6481_v45, %v6401_v59 }
 0x646   :  { %v6483_v43 = vpop.f32.mrf.mxu3  ;;  %v6399_v32 = vpop.f32.mrf.mxu2 }
 0x655   :  { %v6564_v4 = vpop.f32.mrf.mxu0  ;;  %v6643_v41 = vpop.f32.mrf.mxu1 }
 0x656   :  { %v6568_v54 = vadd.f32 %v6564_v4, %v6485_v40 }
 0x658   :  { %v6647_v13 = vadd.f32 %v6643_v41, %v6568_v54 }
 0x65c   :  { %v6812_v49 = vpop.f32.mrf.mxu3 }
 0x65d   :  { %v6566_v17 = vpop.f32.mrf.mxu0  ;;  %v6645_v42 = vpop.f32.mrf.mxu1 }
 0x65e   :  { %v6728_v36 = vpop.f32.mrf.mxu2 }
 0x65f   :  { %v6732_v58 = vadd.f32 %v6728_v36, %v6647_v13 }
 0x661   :  { %v6816_v33 = vadd.f32 %v6812_v49, %v6732_v58 }
 0x663   :  { %v6817_v26 = vadd.f32 %v6816_v33, %v5148_v25 }
 0x664   :  { %v6814_v3 = vpop.f32.mrf.mxu3 }
 0x665   :  { %6818 = vst [vmem:[#allocation17 + $0x1] sm:$0x1] %v6817_v26 }
 0x666   :  { %v6730_v51 = vpop.f32.mrf.mxu2  ;;  %6829 = dma.vmem_to_hbm [thread:$0]  %s6825_s0, 32, %s6827_s24, [#allocation8]  }
 0x667   :  { %9402 = dma.done.wait [#allocation8], 32  }
 0x668   :  { %9403 = vsyncadd [#allocation8], 4294967264 }
 0x669   :  { %6834 = vsyncpa [#allocation7], 1 }
 0x66a   :  { %6835 = vsyncpa [#allocation10], 1 }
 0x66b   :  { %6836 = vsyncpa [#allocation13], 1 }
 0x66c   :  { %6837 = vsyncpa [#allocation16], 1 }
 0x66d   :  { %6838 = vsyncpa [#allocation8], 1 }

</bundles_post_ra>
